<compile_context>
chip_gen: v6e
topology: v6e:2x2x1
jax: 0.10.0
libtpu: 0.0.40
codegen_flags: <defaults>
</compile_context>

<pallas_src>
import math

import jax
import jax.numpy as jnp
from jax.experimental import pallas as pl
from jax.experimental.pallas import tpu as pltpu


# ----------------------------- config (small) -----------------------------
IMG_SIZE = 16
PATCH_SIZE = 4
IN_CHANS = 4
EMBED_DIM = 32
DEPTH = 2
NUM_HEADS = 4
MLP_RATIO = 4
LN_EPS = 1e-5

NUM_PATCHES = (IMG_SIZE // PATCH_SIZE) ** 2          # 16
SEQ_LEN = NUM_PATCHES + 1                            # 17 (reg token + patches)
SEQ_PAD = 24                                         # padded to a multiple of 8
HEAD_DIM = EMBED_DIM // NUM_HEADS                    # 8
MLP_HIDDEN = EMBED_DIM * MLP_RATIO                   # 128
HEAD_MID = EMBED_DIM // 2                            # 16
PATCH_K = IN_CHANS * PATCH_SIZE * PATCH_SIZE         # 64
SCALE = HEAD_DIM ** (-0.5)

# ---------------- packed-parameter slab layouts (static offsets) ----------
# misc slab: (MISC_ROWS, 128) f32
PW_OFF = 0                                # patch-embed weight  (PATCH_K, :D)
TB_OFF = PW_OFF + PATCH_K                 # 64: token bias      (SEQ_PAD, :D)
HW1_OFF = TB_OFF + SEQ_PAD                # 88: head fc1 weight (D, :HEAD_MID)
HNG_ROW = 120                             # head LN gamma (:D)
HNB_ROW = 121                             # head LN beta  (:D)
HB1_ROW = 122                             # head fc1 bias (:HEAD_MID)
HW2_ROW = 123                             # head fc2 weight row (:HEAD_MID)
HB2_ROW = 124                             # head fc2 bias (:1)
MISC_ROWS = 128

# per-block matrix slab: (DEPTH, MAT_ROWS, 128) f32, densely packed
QKV_OFF = 0                                          # (D, :3*D)  Wq|Wk|Wv (scale folded into Wq)
WP_OFF = QKV_OFF + EMBED_DIM                         # 32: (D, :D) output projection
FC1_OFF = WP_OFF + EMBED_DIM                         # 64: (D, :MLP_HIDDEN)
FC2_OFF = FC1_OFF + EMBED_DIM                        # 96: (MLP_HIDDEN, :D)
MAT_ROWS = FC2_OFF + MLP_HIDDEN                      # 224

# per-block vector slab: (DEPTH, VEC_ROWS, 128) f32
V_LN1G, V_LN1B = 0, 1
V_BQKV = 2                                # fused qkv bias (:3*D), q part scaled, k part zeroed
V_BPROJ = 3
V_LN2G, V_LN2B = 4, 5
V_FC1B = 6
V_LNMG, V_LNMB = 7, 8
V_FC2B = 9
VEC_ROWS = 16


# ----------------------------- kernel helpers -----------------------------
def _layernorm(x, g, b, eps=LN_EPS):
    mu = jnp.mean(x, axis=-1, keepdims=True)
    xc = x - mu
    var = jnp.mean(xc * xc, axis=-1, keepdims=True)
    return xc * jax.lax.rsqrt(var + eps) * g + b


def _gelu(x):
    # exact (erf) GELU, matching torch.nn.GELU default
    return 0.5 * x * (1.0 + jax.lax.erf(x * (1.0 / math.sqrt(2.0))))


# ----------------------------- fused kernel -----------------------------
def make_vit_kernel(bb):
    """Build the fused ViT kernel for `bb` images per grid step."""
    D, H, HD, NH, S = EMBED_DIM, MLP_HIDDEN, HEAD_DIM, NUM_HEADS, SEQ_PAD

    def vit_kernel(patches_ref, misc_ref, bmat_ref, bvec_ref, out_ref):
        # ---- patch embedding + reg token + positional embedding ----
        # patches row 0 per image is zero (reg-token slot) and rows 17..23 are
        # zero padding; tok_bias folds reg_token + pos_embed (+ patch bias).
        patches = patches_ref[...].reshape(bb * S, PATCH_K)        # (bb*24, 64)
        patch_w = misc_ref[PW_OFF:PW_OFF + PATCH_K, 0:D]           # (64, 32)
        tok_bias = misc_ref[TB_OFF:TB_OFF + S, 0:D]                # (24, 32)
        x = jnp.dot(patches, patch_w, preferred_element_type=jnp.float32)
        tb = tok_bias if bb == 1 else jnp.concatenate([tok_bias] * bb, axis=0)
        x = x + tb                                                 # (bb*24, 32)

        # mask for padded key columns (hoisted out of the layer loop)
        col = jax.lax.broadcasted_iota(jnp.int32, (1, S), 1)
        kmask = jnp.where(col < SEQ_LEN, 0.0, -1e30).astype(jnp.float32)

        for l in range(DEPTH):
            # ---------------- attention branch ----------------
            xn = _layernorm(x,
                            bvec_ref[l, V_LN1G:V_LN1G + 1, 0:D],
                            bvec_ref[l, V_LN1B:V_LN1B + 1, 0:D])
            wqkv = bmat_ref[l, QKV_OFF:QKV_OFF + D, 0:3 * D]       # (32, 96)
            bqkv = bvec_ref[l, V_BQKV:V_BQKV + 1, 0:3 * D]         # (1, 96)
            qkv = jnp.dot(xn, wqkv, preferred_element_type=jnp.float32) + bqkv

            per_img = []
            for i in range(bb):
                qkv_i = qkv[i * S:(i + 1) * S, :]                  # (24, 96)
                heads = []
                for h in range(NH):
                    q = qkv_i[:, h * HD:(h + 1) * HD]              # (24, 8)
                    k = qkv_i[:, D + h * HD:D + (h + 1) * HD]
                    v = qkv_i[:, 2 * D + h * HD:2 * D + (h + 1) * HD]
                    # contract on last dims of both -> no explicit k.T relayout;
                    # softmax scale already folded into Wq / bq host-side.
                    s = jax.lax.dot_general(q, k, (((1,), (1,)), ((), ())),
                                            preferred_element_type=jnp.float32)
                    s = s + kmask                                  # mask pad keys
                    s = s - jnp.max(s, axis=-1, keepdims=True)
                    p = jnp.exp(s)
                    p = p / jnp.sum(p, axis=-1, keepdims=True)     # exact softmax
                    heads.append(jnp.dot(p, v, preferred_element_type=jnp.float32))
                per_img.append(jnp.concatenate(heads, axis=-1))    # (24, 32)
            o = per_img[0] if bb == 1 else jnp.concatenate(per_img, axis=0)

            wp = bmat_ref[l, WP_OFF:WP_OFF + D, 0:D]               # (32, 32)
            x = x + jnp.dot(o, wp, preferred_element_type=jnp.float32) \
                  + bvec_ref[l, V_BPROJ:V_BPROJ + 1, 0:D]

            # ---------------- MLP branch (fc1 -> GELU -> LN -> fc2) ----------------
            hx = _layernorm(x,
                            bvec_ref[l, V_LN2G:V_LN2G + 1, 0:D],
                            bvec_ref[l, V_LN2B:V_LN2B + 1, 0:D])
            hx = jnp.dot(hx, bmat_ref[l, FC1_OFF:FC1_OFF + D, 0:H],
                         preferred_element_type=jnp.float32) \
                 + bvec_ref[l, V_FC1B:V_FC1B + 1, 0:H]
            hx = _gelu(hx)
            hx = _layernorm(hx,
                            bvec_ref[l, V_LNMG:V_LNMG + 1, 0:H],
                            bvec_ref[l, V_LNMB:V_LNMB + 1, 0:H])
            x = x + jnp.dot(hx, bmat_ref[l, FC2_OFF:FC2_OFF + H, 0:D],
                            preferred_element_type=jnp.float32) \
                  + bvec_ref[l, V_FC2B:V_FC2B + 1, 0:D]

        # ---- final LayerNorm (per-token, so cls-only is exact) + reg head ----
        if bb == 1:
            cls = x[0:1, :]
        else:
            cls = jnp.concatenate([x[i * S:i * S + 1, :] for i in range(bb)], axis=0)
        cls = _layernorm(cls,
                         misc_ref[HNG_ROW:HNG_ROW + 1, 0:D],
                         misc_ref[HNB_ROW:HNB_ROW + 1, 0:D])
        hmid = jnp.dot(cls, misc_ref[HW1_OFF:HW1_OFF + D, 0:HEAD_MID],
                       preferred_element_type=jnp.float32) \
               + misc_ref[HB1_ROW:HB1_ROW + 1, 0:HEAD_MID]
        hmid = _gelu(hmid)
        w2 = misc_ref[HW2_ROW:HW2_ROW + 1, 0:HEAD_MID]
        val = jnp.sum(hmid * w2, axis=-1, keepdims=True) \
              + misc_ref[HB2_ROW:HB2_ROW + 1, 0:1]                 # (bb, 1)
        # lane-dense unmasked store; caller takes lane 0 per image
        out_ref[...] = jnp.broadcast_to(val[None, :, :], (1, bb, 128))

    return vit_kernel


# ----------------------------- wrapper -----------------------------
def vit_forward(params, x, block_batch=None):
    # x: (B, C, H, W) NCHW, like the PyTorch module
    B, C, Hh, Ww = x.shape
    p = PATCH_SIZE
    nh, nw = Hh // p, Ww // p

    if block_batch is None:
        # batch several images per grid step for larger batches, but always
        # keep >= 2 grid steps so both v7x TensorCores get work.
        bb = 1
        for cand in (8, 4, 2):
            if B >= 2 * cand and B % cand == 0:
                bb = cand
                break
    else:
        bb = block_batch
    steps = -(-B // bb)
    B_pad = steps * bb

    # conv(kernel=stride=patch) == matmul on extracted patches (host glue)
    patches = x.reshape(B, C, nh, p, nw, p).transpose(0, 2, 4, 1, 3, 5)
    patches = patches.reshape(B, nh * nw, C * p * p)
    # row 0 (reg-token slot) and rows 17..23 (seq pad) stay zero; batch pad too
    patches_pad = jnp.zeros((B_pad, SEQ_PAD, PATCH_K), patches.dtype)
    patches_pad = patches_pad.at[:B, 1:SEQ_LEN, :].set(patches)

    out = pl.pallas_call(
        make_vit_kernel(bb),
        out_shape=jax.ShapeDtypeStruct((steps, bb, 128), jnp.float32),
        grid=(steps,),
        in_specs=[
            pl.BlockSpec((bb, SEQ_PAD, PATCH_K), lambda s: (s, 0, 0)),
            pl.BlockSpec((MISC_ROWS, 128), lambda s: (0, 0)),
            pl.BlockSpec((DEPTH, MAT_ROWS, 128), lambda s: (0, 0, 0)),
            pl.BlockSpec((DEPTH, VEC_ROWS, 128), lambda s: (0, 0, 0)),
        ],
        out_specs=pl.BlockSpec((1, bb, 128), lambda s: (s, 0, 0)),
        compiler_params=pltpu.CompilerParams(dimension_semantics=("parallel",)),
    )(patches_pad, params["misc"], params["bmat"], params["bvec"])
    return out.reshape(B_pad, 128)[:B, 0]          # (B,)


# ----------------------------- parameter init + packing -----------------------------
def _tn(key, shape, std=0.02):
    return std * jax.random.truncated_normal(key, -2.0, 2.0, shape, dtype=jnp.float32)


def init_params(key):
    keys = iter(jax.random.split(key, 64))
    nk = lambda: next(keys)
    D, H, HD, NH = EMBED_DIM, MLP_HIDDEN, HEAD_DIM, NUM_HEADS

    # ---- raw parameters (mirroring the torch module's shapes / init) ----
    patch_w = _tn(nk(), (D, PATCH_K))                 # conv weight flattened (D, C*p*p)
    patch_b = jnp.zeros((D,), jnp.float32)
    pos_embed = _tn(nk(), (SEQ_LEN, D))
    reg_token = _tn(nk(), (D,))

    blocks = []
    for _ in range(DEPTH):
        blocks.append(dict(
            qkv_w=_tn(nk(), (3 * D, D)), qkv_b=jnp.zeros((3 * D,), jnp.float32),
            proj_w=_tn(nk(), (D, D)), proj_b=jnp.zeros((D,), jnp.float32),
            ln1_g=jnp.ones((D,), jnp.float32), ln1_b=jnp.zeros((D,), jnp.float32),
            ln2_g=jnp.ones((D,), jnp.float32), ln2_b=jnp.zeros((D,), jnp.float32),
            fc1_w=_tn(nk(), (H, D)), fc1_b=jnp.zeros((H,), jnp.float32),
            lnm_g=jnp.ones((H,), jnp.float32), lnm_b=jnp.zeros((H,), jnp.float32),
            fc2_w=_tn(nk(), (D, H)), fc2_b=jnp.zeros((D,), jnp.float32),
        ))

    head = dict(
        norm_g=jnp.ones((D,), jnp.float32), norm_b=jnp.zeros((D,), jnp.float32),
        w1=_tn(nk(), (HEAD_MID, D)), b1=jnp.zeros((HEAD_MID,), jnp.float32),
        w2=_tn(nk(), (1, HEAD_MID)), b2=jnp.zeros((1,), jnp.float32),
    )

    # ---- pack into the 3 kernel slabs ----
    misc = jnp.zeros((MISC_ROWS, 128), jnp.float32)
    misc = misc.at[PW_OFF:PW_OFF + PATCH_K, :D].set(patch_w.T)
    tok = jnp.zeros((SEQ_PAD, D), jnp.float32)
    tok = tok.at[:SEQ_LEN].set(pos_embed)
    tok = tok.at[0].add(reg_token)                    # reg token + pos[0]
    tok = tok.at[1:SEQ_LEN].add(patch_b[None, :])     # patch-embed bias folded in
    misc = misc.at[TB_OFF:TB_OFF + SEQ_PAD, :D].set(tok)
    misc = misc.at[HW1_OFF:HW1_OFF + D, :HEAD_MID].set(head["w1"].T)
    misc = misc.at[HNG_ROW, :D].set(head["norm_g"])
    misc = misc.at[HNB_ROW, :D].set(head["norm_b"])
    misc = misc.at[HB1_ROW, :HEAD_MID].set(head["b1"])
    misc = misc.at[HW2_ROW, :HEAD_MID].set(head["w2"][0])
    misc = misc.at[HB2_ROW, :1].set(head["b2"])

    bmat = jnp.zeros((DEPTH, MAT_ROWS, 128), jnp.float32)
    bvec = jnp.zeros((DEPTH, VEC_ROWS, 128), jnp.float32)
    for l, bp in enumerate(blocks):
        wqkv = bp["qkv_w"].T                          # (D, 3D), features = [q|k|v] x heads
        wqkv = wqkv.at[:, :D].multiply(SCALE)         # fold softmax scale into Wq (exact)
        bqkv = bp["qkv_b"]
        bqkv = bqkv.at[:D].multiply(SCALE)            # ... and into bq
        bqkv = bqkv.at[D:2 * D].set(0.0)              # key bias cancels in row softmax (exact)
        bmat = bmat.at[l, QKV_OFF:QKV_OFF + D, :3 * D].set(wqkv)
        bmat = bmat.at[l, WP_OFF:WP_OFF + D, :D].set(bp["proj_w"].T)
        bmat = bmat.at[l, FC1_OFF:FC1_OFF + D, :H].set(bp["fc1_w"].T)
        bmat = bmat.at[l, FC2_OFF:FC2_OFF + H, :D].set(bp["fc2_w"].T)
        bvec = bvec.at[l, V_BQKV, :3 * D].set(bqkv)
        bvec = bvec.at[l, V_LN1G, :D].set(bp["ln1_g"])
        bvec = bvec.at[l, V_LN1B, :D].set(bp["ln1_b"])
        bvec = bvec.at[l, V_BPROJ, :D].set(bp["proj_b"])
        bvec = bvec.at[l, V_LN2G, :D].set(bp["ln2_g"])
        bvec = bvec.at[l, V_LN2B, :D].set(bp["ln2_b"])
        bvec = bvec.at[l, V_FC1B, :H].set(bp["fc1_b"])
        bvec = bvec.at[l, V_LNMG, :H].set(bp["lnm_g"])
        bvec = bvec.at[l, V_LNMB, :H].set(bp["lnm_b"])
        bvec = bvec.at[l, V_FC2B, :D].set(bp["fc2_b"])

    return {"misc": misc, "bmat": bmat, "bvec": bvec}


# ----------------------------- main -----------------------------
if __name__ == "__main__":
    key = jax.random.PRNGKey(0)
    pkey, xkey = jax.random.split(key)

    params = init_params(pkey)
    x = jax.random.normal(xkey, (2, IN_CHANS, IMG_SIZE, IMG_SIZE), dtype=jnp.float32)

    out = jax.jit(vit_forward)(params, x)
    out = jax.block_until_ready(out)

    assert out.shape == (2,), out.shape
    assert bool(jnp.all(jnp.isfinite(out)))
    print("KERNEL_OK")
</pallas_src>

<mosaic_0001>
module attributes {stable_mosaic.version = 11 : i64} {
  func.func @vit_kernel(%arg0: i32, %arg1: memref<1x24x64xf32, #tpu.memory_space<vmem>>, %arg2: memref<128x128xf32, #tpu.memory_space<vmem>>, %arg3: memref<2x224x128xf32, #tpu.memory_space<vmem>>, %arg4: memref<2x16x128xf32, #tpu.memory_space<vmem>>, %arg5: memref<1x1x128xf32, #tpu.memory_space<vmem>>) attributes {dimension_semantics = [#tpu.dimension_semantics<parallel>], iteration_bounds = array<i64: 2>, scalar_prefetch = 0 : i64, scratch_operands = 0 : i64, tpu.core_type = #tpu.core_type<tc>, window_params = [{transform_indices = @transform_0, window_bounds = array<i64: 1, 24, 64>}, {pipeline_mode = #tpu.pipeline_mode<synchronous>, transform_indices = @transform_1, window_bounds = array<i64: 128, 128>}, {pipeline_mode = #tpu.pipeline_mode<synchronous>, transform_indices = @transform_2, window_bounds = array<i64: 2, 224, 128>}, {pipeline_mode = #tpu.pipeline_mode<synchronous>, transform_indices = @transform_3, window_bounds = array<i64: 2, 16, 128>}, {transform_indices = @transform_4, window_bounds = array<i64: 1, 1, 128>}]} {
    %c0 = arith.constant 0 : index
    %c0_0 = arith.constant 0 : index
    %c0_1 = arith.constant 0 : index
    %0 = vector.load %arg1[%c0, %c0_0, %c0_1] : memref<1x24x64xf32, #tpu.memory_space<vmem>>, vector<1x24x64xf32>
    %1 = vector.shape_cast %0 : vector<1x24x64xf32> to vector<24x64xf32>
    %c0_2 = arith.constant 0 : index
    %c0_3 = arith.constant 0 : index
    %2 = vector.load %arg2[%c0_2, %c0_3] : memref<128x128xf32, #tpu.memory_space<vmem>>, vector<64x32xf32>
    %c64 = arith.constant 64 : index
    %c0_4 = arith.constant 0 : index
    %3 = vector.load %arg2[%c64, %c0_4] : memref<128x128xf32, #tpu.memory_space<vmem>>, vector<24x32xf32>
    %cst = arith.constant dense<0.000000e+00> : vector<24x32xf32>
    %4 = tpu.matmul %1, %2, %cst {dimension_numbers = #tpu.dot_dimension_numbers<[1], [0], [0], [1], [0, 0, 1, 1], [], []>} : vector<24x64xf32>, vector<64x32xf32>, vector<24x32xf32> -> vector<24x32xf32>
    %5 = arith.addf %4, %3 : vector<24x32xf32>
    %6 = tpu.iota {dimensions = array<i32: 1>} : vector<1x24xi32>
    %c17_i32 = arith.constant 17 : i32
    %7 = vector.broadcast %c17_i32 : i32 to vector<1x24xi32>
    %8 = arith.cmpi slt, %6, %7 : vector<1x24xi32>
    %cst_5 = arith.constant 0.000000e+00 : f32
    %cst_6 = arith.constant -1.000000e+30 : f32
    %9 = vector.broadcast %cst_5 : f32 to vector<1x24xf32>
    %10 = vector.broadcast %cst_6 : f32 to vector<1x24xf32>
    %11 = arith.select %8, %9, %10 : vector<1x24xi1>, vector<1x24xf32>
    %c0_7 = arith.constant 0 : index
    %c0_8 = arith.constant 0 : index
    %c0_9 = arith.constant 0 : index
    %12 = vector.load %arg4[%c0_7, %c0_8, %c0_9] : memref<2x16x128xf32, #tpu.memory_space<vmem>>, vector<1x1x32xf32>
    %13 = vector.shape_cast %12 : vector<1x1x32xf32> to vector<1x32xf32>
    %c0_10 = arith.constant 0 : index
    %c1 = arith.constant 1 : index
    %c0_11 = arith.constant 0 : index
    %14 = vector.load %arg4[%c0_10, %c1, %c0_11] : memref<2x16x128xf32, #tpu.memory_space<vmem>>, vector<1x1x32xf32>
    %15 = vector.shape_cast %14 : vector<1x1x32xf32> to vector<1x32xf32>
    %cst_12 = arith.constant dense<0.000000e+00> : vector<24xf32>
    %16 = vector.multi_reduction <add>, %5, %cst_12 [1] : vector<24x32xf32> to vector<24xf32>
    %17 = vector.shape_cast %16 : vector<24xf32> to vector<24x1xf32>
    %cst_13 = arith.constant 3.200000e+01 : f32
    %18 = vector.broadcast %cst_13 : f32 to vector<24x1xf32>
    %19 = arith.divf %17, %18 : vector<24x1xf32>
    %20 = vector.broadcast %19 : vector<24x1xf32> to vector<24x32xf32>
    %21 = arith.subf %5, %20 : vector<24x32xf32>
    %22 = arith.mulf %21, %21 : vector<24x32xf32>
    %cst_14 = arith.constant dense<0.000000e+00> : vector<24xf32>
    %23 = vector.multi_reduction <add>, %22, %cst_14 [1] : vector<24x32xf32> to vector<24xf32>
    %24 = vector.shape_cast %23 : vector<24xf32> to vector<24x1xf32>
    %cst_15 = arith.constant 3.200000e+01 : f32
    %25 = vector.broadcast %cst_15 : f32 to vector<24x1xf32>
    %26 = arith.divf %24, %25 : vector<24x1xf32>
    %cst_16 = arith.constant 9.99999974E-6 : f32
    %27 = vector.broadcast %cst_16 : f32 to vector<24x1xf32>
    %28 = arith.addf %26, %27 : vector<24x1xf32>
    %29 = math.rsqrt %28 : vector<24x1xf32>
    %30 = vector.broadcast %29 : vector<24x1xf32> to vector<24x32xf32>
    %31 = arith.mulf %21, %30 : vector<24x32xf32>
    %32 = vector.broadcast %13 : vector<1x32xf32> to vector<24x32xf32>
    %33 = arith.mulf %31, %32 : vector<24x32xf32>
    %34 = vector.broadcast %15 : vector<1x32xf32> to vector<24x32xf32>
    %35 = arith.addf %33, %34 : vector<24x32xf32>
    %c0_17 = arith.constant 0 : index
    %c0_18 = arith.constant 0 : index
    %c0_19 = arith.constant 0 : index
    %36 = vector.load %arg3[%c0_17, %c0_18, %c0_19] : memref<2x224x128xf32, #tpu.memory_space<vmem>>, vector<1x32x96xf32>
    %37 = vector.shape_cast %36 : vector<1x32x96xf32> to vector<32x96xf32>
    %c0_20 = arith.constant 0 : index
    %c2 = arith.constant 2 : index
    %c0_21 = arith.constant 0 : index
    %38 = vector.load %arg4[%c0_20, %c2, %c0_21] : memref<2x16x128xf32, #tpu.memory_space<vmem>>, vector<1x1x96xf32>
    %39 = vector.shape_cast %38 : vector<1x1x96xf32> to vector<1x96xf32>
    %cst_22 = arith.constant dense<0.000000e+00> : vector<24x96xf32>
    %40 = tpu.matmul %35, %37, %cst_22 {dimension_numbers = #tpu.dot_dimension_numbers<[1], [0], [0], [1], [0, 0, 1, 1], [], []>} : vector<24x32xf32>, vector<32x96xf32>, vector<24x96xf32> -> vector<24x96xf32>
    %41 = vector.broadcast %39 : vector<1x96xf32> to vector<24x96xf32>
    %42 = arith.addf %40, %41 : vector<24x96xf32>
    %43 = vector.extract_strided_slice %42 {offsets = [0, 0], sizes = [24, 8], strides = [1, 1]} : vector<24x96xf32> to vector<24x8xf32>
    %44 = vector.extract_strided_slice %42 {offsets = [0, 32], sizes = [24, 8], strides = [1, 1]} : vector<24x96xf32> to vector<24x8xf32>
    %45 = vector.extract_strided_slice %42 {offsets = [0, 64], sizes = [24, 8], strides = [1, 1]} : vector<24x96xf32> to vector<24x8xf32>
    %cst_23 = arith.constant dense<0.000000e+00> : vector<24x24xf32>
    %46 = tpu.matmul %43, %44, %cst_23 {dimension_numbers = #tpu.dot_dimension_numbers<[1], [1], [0], [0], [0, 0, 1, 0], [], []>} : vector<24x8xf32>, vector<24x8xf32>, vector<24x24xf32> -> vector<24x24xf32>
    %47 = vector.broadcast %11 : vector<1x24xf32> to vector<24x24xf32>
    %48 = arith.addf %46, %47 : vector<24x24xf32>
    %cst_24 = arith.constant dense<0xFF800000> : vector<24xf32>
    %49 = vector.multi_reduction <maximumf>, %48, %cst_24 [1] : vector<24x24xf32> to vector<24xf32>
    %50 = vector.shape_cast %49 : vector<24xf32> to vector<24x1xf32>
    %51 = vector.broadcast %50 : vector<24x1xf32> to vector<24x24xf32>
    %52 = arith.subf %48, %51 : vector<24x24xf32>
    %53 = math.exp %52 : vector<24x24xf32>
    %cst_25 = arith.constant dense<0.000000e+00> : vector<24xf32>
    %54 = vector.multi_reduction <add>, %53, %cst_25 [1] : vector<24x24xf32> to vector<24xf32>
    %55 = vector.shape_cast %54 : vector<24xf32> to vector<24x1xf32>
    %56 = vector.broadcast %55 : vector<24x1xf32> to vector<24x24xf32>
    %57 = arith.divf %53, %56 : vector<24x24xf32>
    %cst_26 = arith.constant dense<0.000000e+00> : vector<24x8xf32>
    %58 = tpu.matmul %57, %45, %cst_26 {dimension_numbers = #tpu.dot_dimension_numbers<[1], [0], [0], [1], [0, 0, 1, 1], [], []>} : vector<24x24xf32>, vector<24x8xf32>, vector<24x8xf32> -> vector<24x8xf32>
    %59 = vector.extract_strided_slice %42 {offsets = [0, 8], sizes = [24, 8], strides = [1, 1]} : vector<24x96xf32> to vector<24x8xf32>
    %60 = vector.extract_strided_slice %42 {offsets = [0, 40], sizes = [24, 8], strides = [1, 1]} : vector<24x96xf32> to vector<24x8xf32>
    %61 = vector.extract_strided_slice %42 {offsets = [0, 72], sizes = [24, 8], strides = [1, 1]} : vector<24x96xf32> to vector<24x8xf32>
    %cst_27 = arith.constant dense<0.000000e+00> : vector<24x24xf32>
    %62 = tpu.matmul %59, %60, %cst_27 {dimension_numbers = #tpu.dot_dimension_numbers<[1], [1], [0], [0], [0, 0, 1, 0], [], []>} : vector<24x8xf32>, vector<24x8xf32>, vector<24x24xf32> -> vector<24x24xf32>
    %63 = vector.broadcast %11 : vector<1x24xf32> to vector<24x24xf32>
    %64 = arith.addf %62, %63 : vector<24x24xf32>
    %cst_28 = arith.constant dense<0xFF800000> : vector<24xf32>
    %65 = vector.multi_reduction <maximumf>, %64, %cst_28 [1] : vector<24x24xf32> to vector<24xf32>
    %66 = vector.shape_cast %65 : vector<24xf32> to vector<24x1xf32>
    %67 = vector.broadcast %66 : vector<24x1xf32> to vector<24x24xf32>
    %68 = arith.subf %64, %67 : vector<24x24xf32>
    %69 = math.exp %68 : vector<24x24xf32>
    %cst_29 = arith.constant dense<0.000000e+00> : vector<24xf32>
    %70 = vector.multi_reduction <add>, %69, %cst_29 [1] : vector<24x24xf32> to vector<24xf32>
    %71 = vector.shape_cast %70 : vector<24xf32> to vector<24x1xf32>
    %72 = vector.broadcast %71 : vector<24x1xf32> to vector<24x24xf32>
    %73 = arith.divf %69, %72 : vector<24x24xf32>
    %cst_30 = arith.constant dense<0.000000e+00> : vector<24x8xf32>
    %74 = tpu.matmul %73, %61, %cst_30 {dimension_numbers = #tpu.dot_dimension_numbers<[1], [0], [0], [1], [0, 0, 1, 1], [], []>} : vector<24x24xf32>, vector<24x8xf32>, vector<24x8xf32> -> vector<24x8xf32>
    %75 = vector.extract_strided_slice %42 {offsets = [0, 16], sizes = [24, 8], strides = [1, 1]} : vector<24x96xf32> to vector<24x8xf32>
    %76 = vector.extract_strided_slice %42 {offsets = [0, 48], sizes = [24, 8], strides = [1, 1]} : vector<24x96xf32> to vector<24x8xf32>
    %77 = vector.extract_strided_slice %42 {offsets = [0, 80], sizes = [24, 8], strides = [1, 1]} : vector<24x96xf32> to vector<24x8xf32>
    %cst_31 = arith.constant dense<0.000000e+00> : vector<24x24xf32>
    %78 = tpu.matmul %75, %76, %cst_31 {dimension_numbers = #tpu.dot_dimension_numbers<[1], [1], [0], [0], [0, 0, 1, 0], [], []>} : vector<24x8xf32>, vector<24x8xf32>, vector<24x24xf32> -> vector<24x24xf32>
    %79 = vector.broadcast %11 : vector<1x24xf32> to vector<24x24xf32>
    %80 = arith.addf %78, %79 : vector<24x24xf32>
    %cst_32 = arith.constant dense<0xFF800000> : vector<24xf32>
    %81 = vector.multi_reduction <maximumf>, %80, %cst_32 [1] : vector<24x24xf32> to vector<24xf32>
    %82 = vector.shape_cast %81 : vector<24xf32> to vector<24x1xf32>
    %83 = vector.broadcast %82 : vector<24x1xf32> to vector<24x24xf32>
    %84 = arith.subf %80, %83 : vector<24x24xf32>
    %85 = math.exp %84 : vector<24x24xf32>
    %cst_33 = arith.constant dense<0.000000e+00> : vector<24xf32>
    %86 = vector.multi_reduction <add>, %85, %cst_33 [1] : vector<24x24xf32> to vector<24xf32>
    %87 = vector.shape_cast %86 : vector<24xf32> to vector<24x1xf32>
    %88 = vector.broadcast %87 : vector<24x1xf32> to vector<24x24xf32>
    %89 = arith.divf %85, %88 : vector<24x24xf32>
    %cst_34 = arith.constant dense<0.000000e+00> : vector<24x8xf32>
    %90 = tpu.matmul %89, %77, %cst_34 {dimension_numbers = #tpu.dot_dimension_numbers<[1], [0], [0], [1], [0, 0, 1, 1], [], []>} : vector<24x24xf32>, vector<24x8xf32>, vector<24x8xf32> -> vector<24x8xf32>
    %91 = vector.extract_strided_slice %42 {offsets = [0, 24], sizes = [24, 8], strides = [1, 1]} : vector<24x96xf32> to vector<24x8xf32>
    %92 = vector.extract_strided_slice %42 {offsets = [0, 56], sizes = [24, 8], strides = [1, 1]} : vector<24x96xf32> to vector<24x8xf32>
    %93 = vector.extract_strided_slice %42 {offsets = [0, 88], sizes = [24, 8], strides = [1, 1]} : vector<24x96xf32> to vector<24x8xf32>
    %cst_35 = arith.constant dense<0.000000e+00> : vector<24x24xf32>
    %94 = tpu.matmul %91, %92, %cst_35 {dimension_numbers = #tpu.dot_dimension_numbers<[1], [1], [0], [0], [0, 0, 1, 0], [], []>} : vector<24x8xf32>, vector<24x8xf32>, vector<24x24xf32> -> vector<24x24xf32>
    %95 = vector.broadcast %11 : vector<1x24xf32> to vector<24x24xf32>
    %96 = arith.addf %94, %95 : vector<24x24xf32>
    %cst_36 = arith.constant dense<0xFF800000> : vector<24xf32>
    %97 = vector.multi_reduction <maximumf>, %96, %cst_36 [1] : vector<24x24xf32> to vector<24xf32>
    %98 = vector.shape_cast %97 : vector<24xf32> to vector<24x1xf32>
    %99 = vector.broadcast %98 : vector<24x1xf32> to vector<24x24xf32>
    %100 = arith.subf %96, %99 : vector<24x24xf32>
    %101 = math.exp %100 : vector<24x24xf32>
    %cst_37 = arith.constant dense<0.000000e+00> : vector<24xf32>
    %102 = vector.multi_reduction <add>, %101, %cst_37 [1] : vector<24x24xf32> to vector<24xf32>
    %103 = vector.shape_cast %102 : vector<24xf32> to vector<24x1xf32>
    %104 = vector.broadcast %103 : vector<24x1xf32> to vector<24x24xf32>
    %105 = arith.divf %101, %104 : vector<24x24xf32>
    %cst_38 = arith.constant dense<0.000000e+00> : vector<24x8xf32>
    %106 = tpu.matmul %105, %93, %cst_38 {dimension_numbers = #tpu.dot_dimension_numbers<[1], [0], [0], [1], [0, 0, 1, 1], [], []>} : vector<24x24xf32>, vector<24x8xf32>, vector<24x8xf32> -> vector<24x8xf32>
    %107 = tpu.concatenate %58, %74, %90, %106 in 1 : vector<24x8xf32>, vector<24x8xf32>, vector<24x8xf32>, vector<24x8xf32> -> vector<24x32xf32>
    %c0_39 = arith.constant 0 : index
    %c32 = arith.constant 32 : index
    %c0_40 = arith.constant 0 : index
    %108 = vector.load %arg3[%c0_39, %c32, %c0_40] : memref<2x224x128xf32, #tpu.memory_space<vmem>>, vector<1x32x32xf32>
    %109 = vector.shape_cast %108 : vector<1x32x32xf32> to vector<32x32xf32>
    %cst_41 = arith.constant dense<0.000000e+00> : vector<24x32xf32>
    %110 = tpu.matmul %107, %109, %cst_41 {dimension_numbers = #tpu.dot_dimension_numbers<[1], [0], [0], [1], [0, 0, 1, 1], [], []>} : vector<24x32xf32>, vector<32x32xf32>, vector<24x32xf32> -> vector<24x32xf32>
    %111 = arith.addf %5, %110 : vector<24x32xf32>
    %c0_42 = arith.constant 0 : index
    %c3 = arith.constant 3 : index
    %c0_43 = arith.constant 0 : index
    %112 = vector.load %arg4[%c0_42, %c3, %c0_43] : memref<2x16x128xf32, #tpu.memory_space<vmem>>, vector<1x1x32xf32>
    %113 = vector.shape_cast %112 : vector<1x1x32xf32> to vector<1x32xf32>
    %114 = vector.broadcast %113 : vector<1x32xf32> to vector<24x32xf32>
    %115 = arith.addf %111, %114 : vector<24x32xf32>
    %c0_44 = arith.constant 0 : index
    %c4 = arith.constant 4 : index
    %c0_45 = arith.constant 0 : index
    %116 = vector.load %arg4[%c0_44, %c4, %c0_45] : memref<2x16x128xf32, #tpu.memory_space<vmem>>, vector<1x1x32xf32>
    %117 = vector.shape_cast %116 : vector<1x1x32xf32> to vector<1x32xf32>
    %c0_46 = arith.constant 0 : index
    %c5 = arith.constant 5 : index
    %c0_47 = arith.constant 0 : index
    %118 = vector.load %arg4[%c0_46, %c5, %c0_47] : memref<2x16x128xf32, #tpu.memory_space<vmem>>, vector<1x1x32xf32>
    %119 = vector.shape_cast %118 : vector<1x1x32xf32> to vector<1x32xf32>
    %cst_48 = arith.constant dense<0.000000e+00> : vector<24xf32>
    %120 = vector.multi_reduction <add>, %115, %cst_48 [1] : vector<24x32xf32> to vector<24xf32>
    %121 = vector.shape_cast %120 : vector<24xf32> to vector<24x1xf32>
    %cst_49 = arith.constant 3.200000e+01 : f32
    %122 = vector.broadcast %cst_49 : f32 to vector<24x1xf32>
    %123 = arith.divf %121, %122 : vector<24x1xf32>
    %124 = vector.broadcast %123 : vector<24x1xf32> to vector<24x32xf32>
    %125 = arith.subf %115, %124 : vector<24x32xf32>
    %126 = arith.mulf %125, %125 : vector<24x32xf32>
    %cst_50 = arith.constant dense<0.000000e+00> : vector<24xf32>
    %127 = vector.multi_reduction <add>, %126, %cst_50 [1] : vector<24x32xf32> to vector<24xf32>
    %128 = vector.shape_cast %127 : vector<24xf32> to vector<24x1xf32>
    %cst_51 = arith.constant 3.200000e+01 : f32
    %129 = vector.broadcast %cst_51 : f32 to vector<24x1xf32>
    %130 = arith.divf %128, %129 : vector<24x1xf32>
    %cst_52 = arith.constant 9.99999974E-6 : f32
    %131 = vector.broadcast %cst_52 : f32 to vector<24x1xf32>
    %132 = arith.addf %130, %131 : vector<24x1xf32>
    %133 = math.rsqrt %132 : vector<24x1xf32>
    %134 = vector.broadcast %133 : vector<24x1xf32> to vector<24x32xf32>
    %135 = arith.mulf %125, %134 : vector<24x32xf32>
    %136 = vector.broadcast %117 : vector<1x32xf32> to vector<24x32xf32>
    %137 = arith.mulf %135, %136 : vector<24x32xf32>
    %138 = vector.broadcast %119 : vector<1x32xf32> to vector<24x32xf32>
    %139 = arith.addf %137, %138 : vector<24x32xf32>
    %c0_53 = arith.constant 0 : index
    %c64_54 = arith.constant 64 : index
    %c0_55 = arith.constant 0 : index
    %140 = vector.load %arg3[%c0_53, %c64_54, %c0_55] : memref<2x224x128xf32, #tpu.memory_space<vmem>>, vector<1x32x128xf32>
    %141 = vector.shape_cast %140 : vector<1x32x128xf32> to vector<32x128xf32>
    %cst_56 = arith.constant dense<0.000000e+00> : vector<24x128xf32>
    %142 = tpu.matmul %139, %141, %cst_56 {dimension_numbers = #tpu.dot_dimension_numbers<[1], [0], [0], [1], [0, 0, 1, 1], [], []>} : vector<24x32xf32>, vector<32x128xf32>, vector<24x128xf32> -> vector<24x128xf32>
    %c0_57 = arith.constant 0 : index
    %c6 = arith.constant 6 : index
    %c0_58 = arith.constant 0 : index
    %143 = vector.load %arg4[%c0_57, %c6, %c0_58] : memref<2x16x128xf32, #tpu.memory_space<vmem>>, vector<1x1x128xf32>
    %144 = vector.shape_cast %143 : vector<1x1x128xf32> to vector<1x128xf32>
    %145 = vector.broadcast %144 : vector<1x128xf32> to vector<24x128xf32>
    %146 = arith.addf %142, %145 : vector<24x128xf32>
    %cst_59 = arith.constant 5.000000e-01 : f32
    %147 = vector.broadcast %cst_59 : f32 to vector<24x128xf32>
    %148 = arith.mulf %147, %146 : vector<24x128xf32>
    %cst_60 = arith.constant 0.707106769 : f32
    %149 = vector.broadcast %cst_60 : f32 to vector<24x128xf32>
    %150 = arith.mulf %146, %149 : vector<24x128xf32>
    %151 = math.erf %150 : vector<24x128xf32>
    %cst_61 = arith.constant 1.000000e+00 : f32
    %152 = vector.broadcast %cst_61 : f32 to vector<24x128xf32>
    %153 = arith.addf %152, %151 : vector<24x128xf32>
    %154 = arith.mulf %148, %153 : vector<24x128xf32>
    %c0_62 = arith.constant 0 : index
    %c7 = arith.constant 7 : index
    %c0_63 = arith.constant 0 : index
    %155 = vector.load %arg4[%c0_62, %c7, %c0_63] : memref<2x16x128xf32, #tpu.memory_space<vmem>>, vector<1x1x128xf32>
    %156 = vector.shape_cast %155 : vector<1x1x128xf32> to vector<1x128xf32>
    %c0_64 = arith.constant 0 : index
    %c8 = arith.constant 8 : index
    %c0_65 = arith.constant 0 : index
    %157 = vector.load %arg4[%c0_64, %c8, %c0_65] : memref<2x16x128xf32, #tpu.memory_space<vmem>>, vector<1x1x128xf32>
    %158 = vector.shape_cast %157 : vector<1x1x128xf32> to vector<1x128xf32>
    %cst_66 = arith.constant dense<0.000000e+00> : vector<24xf32>
    %159 = vector.multi_reduction <add>, %154, %cst_66 [1] : vector<24x128xf32> to vector<24xf32>
    %160 = vector.shape_cast %159 : vector<24xf32> to vector<24x1xf32>
    %cst_67 = arith.constant 1.280000e+02 : f32
    %161 = vector.broadcast %cst_67 : f32 to vector<24x1xf32>
    %162 = arith.divf %160, %161 : vector<24x1xf32>
    %163 = vector.broadcast %162 : vector<24x1xf32> to vector<24x128xf32>
    %164 = arith.subf %154, %163 : vector<24x128xf32>
    %165 = arith.mulf %164, %164 : vector<24x128xf32>
    %cst_68 = arith.constant dense<0.000000e+00> : vector<24xf32>
    %166 = vector.multi_reduction <add>, %165, %cst_68 [1] : vector<24x128xf32> to vector<24xf32>
    %167 = vector.shape_cast %166 : vector<24xf32> to vector<24x1xf32>
    %cst_69 = arith.constant 1.280000e+02 : f32
    %168 = vector.broadcast %cst_69 : f32 to vector<24x1xf32>
    %169 = arith.divf %167, %168 : vector<24x1xf32>
    %cst_70 = arith.constant 9.99999974E-6 : f32
    %170 = vector.broadcast %cst_70 : f32 to vector<24x1xf32>
    %171 = arith.addf %169, %170 : vector<24x1xf32>
    %172 = math.rsqrt %171 : vector<24x1xf32>
    %173 = vector.broadcast %172 : vector<24x1xf32> to vector<24x128xf32>
    %174 = arith.mulf %164, %173 : vector<24x128xf32>
    %175 = vector.broadcast %156 : vector<1x128xf32> to vector<24x128xf32>
    %176 = arith.mulf %174, %175 : vector<24x128xf32>
    %177 = vector.broadcast %158 : vector<1x128xf32> to vector<24x128xf32>
    %178 = arith.addf %176, %177 : vector<24x128xf32>
    %c0_71 = arith.constant 0 : index
    %c96 = arith.constant 96 : index
    %c0_72 = arith.constant 0 : index
    %179 = vector.load %arg3[%c0_71, %c96, %c0_72] : memref<2x224x128xf32, #tpu.memory_space<vmem>>, vector<1x128x32xf32>
    %180 = vector.shape_cast %179 : vector<1x128x32xf32> to vector<128x32xf32>
    %cst_73 = arith.constant dense<0.000000e+00> : vector<24x32xf32>
    %181 = tpu.matmul %178, %180, %cst_73 {dimension_numbers = #tpu.dot_dimension_numbers<[1], [0], [0], [1], [0, 0, 1, 1], [], []>} : vector<24x128xf32>, vector<128x32xf32>, vector<24x32xf32> -> vector<24x32xf32>
    %182 = arith.addf %115, %181 : vector<24x32xf32>
    %c0_74 = arith.constant 0 : index
    %c9 = arith.constant 9 : index
    %c0_75 = arith.constant 0 : index
    %183 = vector.load %arg4[%c0_74, %c9, %c0_75] : memref<2x16x128xf32, #tpu.memory_space<vmem>>, vector<1x1x32xf32>
    %184 = vector.shape_cast %183 : vector<1x1x32xf32> to vector<1x32xf32>
    %185 = vector.broadcast %184 : vector<1x32xf32> to vector<24x32xf32>
    %186 = arith.addf %182, %185 : vector<24x32xf32>
    %c1_76 = arith.constant 1 : index
    %c0_77 = arith.constant 0 : index
    %c0_78 = arith.constant 0 : index
    %187 = vector.load %arg4[%c1_76, %c0_77, %c0_78] : memref<2x16x128xf32, #tpu.memory_space<vmem>>, vector<1x1x32xf32>
    %188 = vector.shape_cast %187 : vector<1x1x32xf32> to vector<1x32xf32>
    %c1_79 = arith.constant 1 : index
    %c1_80 = arith.constant 1 : index
    %c0_81 = arith.constant 0 : index
    %189 = vector.load %arg4[%c1_79, %c1_80, %c0_81] : memref<2x16x128xf32, #tpu.memory_space<vmem>>, vector<1x1x32xf32>
    %190 = vector.shape_cast %189 : vector<1x1x32xf32> to vector<1x32xf32>
    %cst_82 = arith.constant dense<0.000000e+00> : vector<24xf32>
    %191 = vector.multi_reduction <add>, %186, %cst_82 [1] : vector<24x32xf32> to vector<24xf32>
    %192 = vector.shape_cast %191 : vector<24xf32> to vector<24x1xf32>
    %cst_83 = arith.constant 3.200000e+01 : f32
    %193 = vector.broadcast %cst_83 : f32 to vector<24x1xf32>
    %194 = arith.divf %192, %193 : vector<24x1xf32>
    %195 = vector.broadcast %194 : vector<24x1xf32> to vector<24x32xf32>
    %196 = arith.subf %186, %195 : vector<24x32xf32>
    %197 = arith.mulf %196, %196 : vector<24x32xf32>
    %cst_84 = arith.constant dense<0.000000e+00> : vector<24xf32>
    %198 = vector.multi_reduction <add>, %197, %cst_84 [1] : vector<24x32xf32> to vector<24xf32>
    %199 = vector.shape_cast %198 : vector<24xf32> to vector<24x1xf32>
    %cst_85 = arith.constant 3.200000e+01 : f32
    %200 = vector.broadcast %cst_85 : f32 to vector<24x1xf32>
    %201 = arith.divf %199, %200 : vector<24x1xf32>
    %cst_86 = arith.constant 9.99999974E-6 : f32
    %202 = vector.broadcast %cst_86 : f32 to vector<24x1xf32>
    %203 = arith.addf %201, %202 : vector<24x1xf32>
    %204 = math.rsqrt %203 : vector<24x1xf32>
    %205 = vector.broadcast %204 : vector<24x1xf32> to vector<24x32xf32>
    %206 = arith.mulf %196, %205 : vector<24x32xf32>
    %207 = vector.broadcast %188 : vector<1x32xf32> to vector<24x32xf32>
    %208 = arith.mulf %206, %207 : vector<24x32xf32>
    %209 = vector.broadcast %190 : vector<1x32xf32> to vector<24x32xf32>
    %210 = arith.addf %208, %209 : vector<24x32xf32>
    %c1_87 = arith.constant 1 : index
    %c0_88 = arith.constant 0 : index
    %c0_89 = arith.constant 0 : index
    %211 = vector.load %arg3[%c1_87, %c0_88, %c0_89] : memref<2x224x128xf32, #tpu.memory_space<vmem>>, vector<1x32x96xf32>
    %212 = vector.shape_cast %211 : vector<1x32x96xf32> to vector<32x96xf32>
    %c1_90 = arith.constant 1 : index
    %c2_91 = arith.constant 2 : index
    %c0_92 = arith.constant 0 : index
    %213 = vector.load %arg4[%c1_90, %c2_91, %c0_92] : memref<2x16x128xf32, #tpu.memory_space<vmem>>, vector<1x1x96xf32>
    %214 = vector.shape_cast %213 : vector<1x1x96xf32> to vector<1x96xf32>
    %cst_93 = arith.constant dense<0.000000e+00> : vector<24x96xf32>
    %215 = tpu.matmul %210, %212, %cst_93 {dimension_numbers = #tpu.dot_dimension_numbers<[1], [0], [0], [1], [0, 0, 1, 1], [], []>} : vector<24x32xf32>, vector<32x96xf32>, vector<24x96xf32> -> vector<24x96xf32>
    %216 = vector.broadcast %214 : vector<1x96xf32> to vector<24x96xf32>
    %217 = arith.addf %215, %216 : vector<24x96xf32>
    %218 = vector.extract_strided_slice %217 {offsets = [0, 0], sizes = [24, 8], strides = [1, 1]} : vector<24x96xf32> to vector<24x8xf32>
    %219 = vector.extract_strided_slice %217 {offsets = [0, 32], sizes = [24, 8], strides = [1, 1]} : vector<24x96xf32> to vector<24x8xf32>
    %220 = vector.extract_strided_slice %217 {offsets = [0, 64], sizes = [24, 8], strides = [1, 1]} : vector<24x96xf32> to vector<24x8xf32>
    %cst_94 = arith.constant dense<0.000000e+00> : vector<24x24xf32>
    %221 = tpu.matmul %218, %219, %cst_94 {dimension_numbers = #tpu.dot_dimension_numbers<[1], [1], [0], [0], [0, 0, 1, 0], [], []>} : vector<24x8xf32>, vector<24x8xf32>, vector<24x24xf32> -> vector<24x24xf32>
    %222 = vector.broadcast %11 : vector<1x24xf32> to vector<24x24xf32>
    %223 = arith.addf %221, %222 : vector<24x24xf32>
    %cst_95 = arith.constant dense<0xFF800000> : vector<24xf32>
    %224 = vector.multi_reduction <maximumf>, %223, %cst_95 [1] : vector<24x24xf32> to vector<24xf32>
    %225 = vector.shape_cast %224 : vector<24xf32> to vector<24x1xf32>
    %226 = vector.broadcast %225 : vector<24x1xf32> to vector<24x24xf32>
    %227 = arith.subf %223, %226 : vector<24x24xf32>
    %228 = math.exp %227 : vector<24x24xf32>
    %cst_96 = arith.constant dense<0.000000e+00> : vector<24xf32>
    %229 = vector.multi_reduction <add>, %228, %cst_96 [1] : vector<24x24xf32> to vector<24xf32>
    %230 = vector.shape_cast %229 : vector<24xf32> to vector<24x1xf32>
    %231 = vector.broadcast %230 : vector<24x1xf32> to vector<24x24xf32>
    %232 = arith.divf %228, %231 : vector<24x24xf32>
    %cst_97 = arith.constant dense<0.000000e+00> : vector<24x8xf32>
    %233 = tpu.matmul %232, %220, %cst_97 {dimension_numbers = #tpu.dot_dimension_numbers<[1], [0], [0], [1], [0, 0, 1, 1], [], []>} : vector<24x24xf32>, vector<24x8xf32>, vector<24x8xf32> -> vector<24x8xf32>
    %234 = vector.extract_strided_slice %217 {offsets = [0, 8], sizes = [24, 8], strides = [1, 1]} : vector<24x96xf32> to vector<24x8xf32>
    %235 = vector.extract_strided_slice %217 {offsets = [0, 40], sizes = [24, 8], strides = [1, 1]} : vector<24x96xf32> to vector<24x8xf32>
    %236 = vector.extract_strided_slice %217 {offsets = [0, 72], sizes = [24, 8], strides = [1, 1]} : vector<24x96xf32> to vector<24x8xf32>
    %cst_98 = arith.constant dense<0.000000e+00> : vector<24x24xf32>
    %237 = tpu.matmul %234, %235, %cst_98 {dimension_numbers = #tpu.dot_dimension_numbers<[1], [1], [0], [0], [0, 0, 1, 0], [], []>} : vector<24x8xf32>, vector<24x8xf32>, vector<24x24xf32> -> vector<24x24xf32>
    %238 = vector.broadcast %11 : vector<1x24xf32> to vector<24x24xf32>
    %239 = arith.addf %237, %238 : vector<24x24xf32>
    %cst_99 = arith.constant dense<0xFF800000> : vector<24xf32>
    %240 = vector.multi_reduction <maximumf>, %239, %cst_99 [1] : vector<24x24xf32> to vector<24xf32>
    %241 = vector.shape_cast %240 : vector<24xf32> to vector<24x1xf32>
    %242 = vector.broadcast %241 : vector<24x1xf32> to vector<24x24xf32>
    %243 = arith.subf %239, %242 : vector<24x24xf32>
    %244 = math.exp %243 : vector<24x24xf32>
    %cst_100 = arith.constant dense<0.000000e+00> : vector<24xf32>
    %245 = vector.multi_reduction <add>, %244, %cst_100 [1] : vector<24x24xf32> to vector<24xf32>
    %246 = vector.shape_cast %245 : vector<24xf32> to vector<24x1xf32>
    %247 = vector.broadcast %246 : vector<24x1xf32> to vector<24x24xf32>
    %248 = arith.divf %244, %247 : vector<24x24xf32>
    %cst_101 = arith.constant dense<0.000000e+00> : vector<24x8xf32>
    %249 = tpu.matmul %248, %236, %cst_101 {dimension_numbers = #tpu.dot_dimension_numbers<[1], [0], [0], [1], [0, 0, 1, 1], [], []>} : vector<24x24xf32>, vector<24x8xf32>, vector<24x8xf32> -> vector<24x8xf32>
    %250 = vector.extract_strided_slice %217 {offsets = [0, 16], sizes = [24, 8], strides = [1, 1]} : vector<24x96xf32> to vector<24x8xf32>
    %251 = vector.extract_strided_slice %217 {offsets = [0, 48], sizes = [24, 8], strides = [1, 1]} : vector<24x96xf32> to vector<24x8xf32>
    %252 = vector.extract_strided_slice %217 {offsets = [0, 80], sizes = [24, 8], strides = [1, 1]} : vector<24x96xf32> to vector<24x8xf32>
    %cst_102 = arith.constant dense<0.000000e+00> : vector<24x24xf32>
    %253 = tpu.matmul %250, %251, %cst_102 {dimension_numbers = #tpu.dot_dimension_numbers<[1], [1], [0], [0], [0, 0, 1, 0], [], []>} : vector<24x8xf32>, vector<24x8xf32>, vector<24x24xf32> -> vector<24x24xf32>
    %254 = vector.broadcast %11 : vector<1x24xf32> to vector<24x24xf32>
    %255 = arith.addf %253, %254 : vector<24x24xf32>
    %cst_103 = arith.constant dense<0xFF800000> : vector<24xf32>
    %256 = vector.multi_reduction <maximumf>, %255, %cst_103 [1] : vector<24x24xf32> to vector<24xf32>
    %257 = vector.shape_cast %256 : vector<24xf32> to vector<24x1xf32>
    %258 = vector.broadcast %257 : vector<24x1xf32> to vector<24x24xf32>
    %259 = arith.subf %255, %258 : vector<24x24xf32>
    %260 = math.exp %259 : vector<24x24xf32>
    %cst_104 = arith.constant dense<0.000000e+00> : vector<24xf32>
    %261 = vector.multi_reduction <add>, %260, %cst_104 [1] : vector<24x24xf32> to vector<24xf32>
    %262 = vector.shape_cast %261 : vector<24xf32> to vector<24x1xf32>
    %263 = vector.broadcast %262 : vector<24x1xf32> to vector<24x24xf32>
    %264 = arith.divf %260, %263 : vector<24x24xf32>
    %cst_105 = arith.constant dense<0.000000e+00> : vector<24x8xf32>
    %265 = tpu.matmul %264, %252, %cst_105 {dimension_numbers = #tpu.dot_dimension_numbers<[1], [0], [0], [1], [0, 0, 1, 1], [], []>} : vector<24x24xf32>, vector<24x8xf32>, vector<24x8xf32> -> vector<24x8xf32>
    %266 = vector.extract_strided_slice %217 {offsets = [0, 24], sizes = [24, 8], strides = [1, 1]} : vector<24x96xf32> to vector<24x8xf32>
    %267 = vector.extract_strided_slice %217 {offsets = [0, 56], sizes = [24, 8], strides = [1, 1]} : vector<24x96xf32> to vector<24x8xf32>
    %268 = vector.extract_strided_slice %217 {offsets = [0, 88], sizes = [24, 8], strides = [1, 1]} : vector<24x96xf32> to vector<24x8xf32>
    %cst_106 = arith.constant dense<0.000000e+00> : vector<24x24xf32>
    %269 = tpu.matmul %266, %267, %cst_106 {dimension_numbers = #tpu.dot_dimension_numbers<[1], [1], [0], [0], [0, 0, 1, 0], [], []>} : vector<24x8xf32>, vector<24x8xf32>, vector<24x24xf32> -> vector<24x24xf32>
    %270 = vector.broadcast %11 : vector<1x24xf32> to vector<24x24xf32>
    %271 = arith.addf %269, %270 : vector<24x24xf32>
    %cst_107 = arith.constant dense<0xFF800000> : vector<24xf32>
    %272 = vector.multi_reduction <maximumf>, %271, %cst_107 [1] : vector<24x24xf32> to vector<24xf32>
    %273 = vector.shape_cast %272 : vector<24xf32> to vector<24x1xf32>
    %274 = vector.broadcast %273 : vector<24x1xf32> to vector<24x24xf32>
    %275 = arith.subf %271, %274 : vector<24x24xf32>
    %276 = math.exp %275 : vector<24x24xf32>
    %cst_108 = arith.constant dense<0.000000e+00> : vector<24xf32>
    %277 = vector.multi_reduction <add>, %276, %cst_108 [1] : vector<24x24xf32> to vector<24xf32>
    %278 = vector.shape_cast %277 : vector<24xf32> to vector<24x1xf32>
    %279 = vector.broadcast %278 : vector<24x1xf32> to vector<24x24xf32>
    %280 = arith.divf %276, %279 : vector<24x24xf32>
    %cst_109 = arith.constant dense<0.000000e+00> : vector<24x8xf32>
    %281 = tpu.matmul %280, %268, %cst_109 {dimension_numbers = #tpu.dot_dimension_numbers<[1], [0], [0], [1], [0, 0, 1, 1], [], []>} : vector<24x24xf32>, vector<24x8xf32>, vector<24x8xf32> -> vector<24x8xf32>
    %282 = tpu.concatenate %233, %249, %265, %281 in 1 : vector<24x8xf32>, vector<24x8xf32>, vector<24x8xf32>, vector<24x8xf32> -> vector<24x32xf32>
    %c1_110 = arith.constant 1 : index
    %c32_111 = arith.constant 32 : index
    %c0_112 = arith.constant 0 : index
    %283 = vector.load %arg3[%c1_110, %c32_111, %c0_112] : memref<2x224x128xf32, #tpu.memory_space<vmem>>, vector<1x32x32xf32>
    %284 = vector.shape_cast %283 : vector<1x32x32xf32> to vector<32x32xf32>
    %cst_113 = arith.constant dense<0.000000e+00> : vector<24x32xf32>
    %285 = tpu.matmul %282, %284, %cst_113 {dimension_numbers = #tpu.dot_dimension_numbers<[1], [0], [0], [1], [0, 0, 1, 1], [], []>} : vector<24x32xf32>, vector<32x32xf32>, vector<24x32xf32> -> vector<24x32xf32>
    %286 = arith.addf %186, %285 : vector<24x32xf32>
    %c1_114 = arith.constant 1 : index
    %c3_115 = arith.constant 3 : index
    %c0_116 = arith.constant 0 : index
    %287 = vector.load %arg4[%c1_114, %c3_115, %c0_116] : memref<2x16x128xf32, #tpu.memory_space<vmem>>, vector<1x1x32xf32>
    %288 = vector.shape_cast %287 : vector<1x1x32xf32> to vector<1x32xf32>
    %289 = vector.broadcast %288 : vector<1x32xf32> to vector<24x32xf32>
    %290 = arith.addf %286, %289 : vector<24x32xf32>
    %c1_117 = arith.constant 1 : index
    %c4_118 = arith.constant 4 : index
    %c0_119 = arith.constant 0 : index
    %291 = vector.load %arg4[%c1_117, %c4_118, %c0_119] : memref<2x16x128xf32, #tpu.memory_space<vmem>>, vector<1x1x32xf32>
    %292 = vector.shape_cast %291 : vector<1x1x32xf32> to vector<1x32xf32>
    %c1_120 = arith.constant 1 : index
    %c5_121 = arith.constant 5 : index
    %c0_122 = arith.constant 0 : index
    %293 = vector.load %arg4[%c1_120, %c5_121, %c0_122] : memref<2x16x128xf32, #tpu.memory_space<vmem>>, vector<1x1x32xf32>
    %294 = vector.shape_cast %293 : vector<1x1x32xf32> to vector<1x32xf32>
    %cst_123 = arith.constant dense<0.000000e+00> : vector<24xf32>
    %295 = vector.multi_reduction <add>, %290, %cst_123 [1] : vector<24x32xf32> to vector<24xf32>
    %296 = vector.shape_cast %295 : vector<24xf32> to vector<24x1xf32>
    %cst_124 = arith.constant 3.200000e+01 : f32
    %297 = vector.broadcast %cst_124 : f32 to vector<24x1xf32>
    %298 = arith.divf %296, %297 : vector<24x1xf32>
    %299 = vector.broadcast %298 : vector<24x1xf32> to vector<24x32xf32>
    %300 = arith.subf %290, %299 : vector<24x32xf32>
    %301 = arith.mulf %300, %300 : vector<24x32xf32>
    %cst_125 = arith.constant dense<0.000000e+00> : vector<24xf32>
    %302 = vector.multi_reduction <add>, %301, %cst_125 [1] : vector<24x32xf32> to vector<24xf32>
    %303 = vector.shape_cast %302 : vector<24xf32> to vector<24x1xf32>
    %cst_126 = arith.constant 3.200000e+01 : f32
    %304 = vector.broadcast %cst_126 : f32 to vector<24x1xf32>
    %305 = arith.divf %303, %304 : vector<24x1xf32>
    %cst_127 = arith.constant 9.99999974E-6 : f32
    %306 = vector.broadcast %cst_127 : f32 to vector<24x1xf32>
    %307 = arith.addf %305, %306 : vector<24x1xf32>
    %308 = math.rsqrt %307 : vector<24x1xf32>
    %309 = vector.broadcast %308 : vector<24x1xf32> to vector<24x32xf32>
    %310 = arith.mulf %300, %309 : vector<24x32xf32>
    %311 = vector.broadcast %292 : vector<1x32xf32> to vector<24x32xf32>
    %312 = arith.mulf %310, %311 : vector<24x32xf32>
    %313 = vector.broadcast %294 : vector<1x32xf32> to vector<24x32xf32>
    %314 = arith.addf %312, %313 : vector<24x32xf32>
    %c1_128 = arith.constant 1 : index
    %c64_129 = arith.constant 64 : index
    %c0_130 = arith.constant 0 : index
    %315 = vector.load %arg3[%c1_128, %c64_129, %c0_130] : memref<2x224x128xf32, #tpu.memory_space<vmem>>, vector<1x32x128xf32>
    %316 = vector.shape_cast %315 : vector<1x32x128xf32> to vector<32x128xf32>
    %cst_131 = arith.constant dense<0.000000e+00> : vector<24x128xf32>
    %317 = tpu.matmul %314, %316, %cst_131 {dimension_numbers = #tpu.dot_dimension_numbers<[1], [0], [0], [1], [0, 0, 1, 1], [], []>} : vector<24x32xf32>, vector<32x128xf32>, vector<24x128xf32> -> vector<24x128xf32>
    %c1_132 = arith.constant 1 : index
    %c6_133 = arith.constant 6 : index
    %c0_134 = arith.constant 0 : index
    %318 = vector.load %arg4[%c1_132, %c6_133, %c0_134] : memref<2x16x128xf32, #tpu.memory_space<vmem>>, vector<1x1x128xf32>
    %319 = vector.shape_cast %318 : vector<1x1x128xf32> to vector<1x128xf32>
    %320 = vector.broadcast %319 : vector<1x128xf32> to vector<24x128xf32>
    %321 = arith.addf %317, %320 : vector<24x128xf32>
    %cst_135 = arith.constant 5.000000e-01 : f32
    %322 = vector.broadcast %cst_135 : f32 to vector<24x128xf32>
    %323 = arith.mulf %322, %321 : vector<24x128xf32>
    %cst_136 = arith.constant 0.707106769 : f32
    %324 = vector.broadcast %cst_136 : f32 to vector<24x128xf32>
    %325 = arith.mulf %321, %324 : vector<24x128xf32>
    %326 = math.erf %325 : vector<24x128xf32>
    %cst_137 = arith.constant 1.000000e+00 : f32
    %327 = vector.broadcast %cst_137 : f32 to vector<24x128xf32>
    %328 = arith.addf %327, %326 : vector<24x128xf32>
    %329 = arith.mulf %323, %328 : vector<24x128xf32>
    %c1_138 = arith.constant 1 : index
    %c7_139 = arith.constant 7 : index
    %c0_140 = arith.constant 0 : index
    %330 = vector.load %arg4[%c1_138, %c7_139, %c0_140] : memref<2x16x128xf32, #tpu.memory_space<vmem>>, vector<1x1x128xf32>
    %331 = vector.shape_cast %330 : vector<1x1x128xf32> to vector<1x128xf32>
    %c1_141 = arith.constant 1 : index
    %c8_142 = arith.constant 8 : index
    %c0_143 = arith.constant 0 : index
    %332 = vector.load %arg4[%c1_141, %c8_142, %c0_143] : memref<2x16x128xf32, #tpu.memory_space<vmem>>, vector<1x1x128xf32>
    %333 = vector.shape_cast %332 : vector<1x1x128xf32> to vector<1x128xf32>
    %cst_144 = arith.constant dense<0.000000e+00> : vector<24xf32>
    %334 = vector.multi_reduction <add>, %329, %cst_144 [1] : vector<24x128xf32> to vector<24xf32>
    %335 = vector.shape_cast %334 : vector<24xf32> to vector<24x1xf32>
    %cst_145 = arith.constant 1.280000e+02 : f32
    %336 = vector.broadcast %cst_145 : f32 to vector<24x1xf32>
    %337 = arith.divf %335, %336 : vector<24x1xf32>
    %338 = vector.broadcast %337 : vector<24x1xf32> to vector<24x128xf32>
    %339 = arith.subf %329, %338 : vector<24x128xf32>
    %340 = arith.mulf %339, %339 : vector<24x128xf32>
    %cst_146 = arith.constant dense<0.000000e+00> : vector<24xf32>
    %341 = vector.multi_reduction <add>, %340, %cst_146 [1] : vector<24x128xf32> to vector<24xf32>
    %342 = vector.shape_cast %341 : vector<24xf32> to vector<24x1xf32>
    %cst_147 = arith.constant 1.280000e+02 : f32
    %343 = vector.broadcast %cst_147 : f32 to vector<24x1xf32>
    %344 = arith.divf %342, %343 : vector<24x1xf32>
    %cst_148 = arith.constant 9.99999974E-6 : f32
    %345 = vector.broadcast %cst_148 : f32 to vector<24x1xf32>
    %346 = arith.addf %344, %345 : vector<24x1xf32>
    %347 = math.rsqrt %346 : vector<24x1xf32>
    %348 = vector.broadcast %347 : vector<24x1xf32> to vector<24x128xf32>
    %349 = arith.mulf %339, %348 : vector<24x128xf32>
    %350 = vector.broadcast %331 : vector<1x128xf32> to vector<24x128xf32>
    %351 = arith.mulf %349, %350 : vector<24x128xf32>
    %352 = vector.broadcast %333 : vector<1x128xf32> to vector<24x128xf32>
    %353 = arith.addf %351, %352 : vector<24x128xf32>
    %c1_149 = arith.constant 1 : index
    %c96_150 = arith.constant 96 : index
    %c0_151 = arith.constant 0 : index
    %354 = vector.load %arg3[%c1_149, %c96_150, %c0_151] : memref<2x224x128xf32, #tpu.memory_space<vmem>>, vector<1x128x32xf32>
    %355 = vector.shape_cast %354 : vector<1x128x32xf32> to vector<128x32xf32>
    %cst_152 = arith.constant dense<0.000000e+00> : vector<24x32xf32>
    %356 = tpu.matmul %353, %355, %cst_152 {dimension_numbers = #tpu.dot_dimension_numbers<[1], [0], [0], [1], [0, 0, 1, 1], [], []>} : vector<24x128xf32>, vector<128x32xf32>, vector<24x32xf32> -> vector<24x32xf32>
    %357 = arith.addf %290, %356 : vector<24x32xf32>
    %c1_153 = arith.constant 1 : index
    %c9_154 = arith.constant 9 : index
    %c0_155 = arith.constant 0 : index
    %358 = vector.load %arg4[%c1_153, %c9_154, %c0_155] : memref<2x16x128xf32, #tpu.memory_space<vmem>>, vector<1x1x32xf32>
    %359 = vector.shape_cast %358 : vector<1x1x32xf32> to vector<1x32xf32>
    %360 = vector.broadcast %359 : vector<1x32xf32> to vector<24x32xf32>
    %361 = arith.addf %357, %360 : vector<24x32xf32>
    %362 = vector.extract_strided_slice %361 {offsets = [0, 0], sizes = [1, 32], strides = [1, 1]} : vector<24x32xf32> to vector<1x32xf32>
    %c120 = arith.constant 120 : index
    %c0_156 = arith.constant 0 : index
    %363 = vector.load %arg2[%c120, %c0_156] : memref<128x128xf32, #tpu.memory_space<vmem>>, vector<1x32xf32>
    %c121 = arith.constant 121 : index
    %c0_157 = arith.constant 0 : index
    %364 = vector.load %arg2[%c121, %c0_157] : memref<128x128xf32, #tpu.memory_space<vmem>>, vector<1x32xf32>
    %cst_158 = arith.constant dense<0.000000e+00> : vector<1xf32>
    %365 = vector.multi_reduction <add>, %362, %cst_158 [1] : vector<1x32xf32> to vector<1xf32>
    %366 = vector.shape_cast %365 : vector<1xf32> to vector<1x1xf32>
    %cst_159 = arith.constant 3.200000e+01 : f32
    %367 = vector.broadcast %cst_159 : f32 to vector<1x1xf32>
    %368 = arith.divf %366, %367 : vector<1x1xf32>
    %369 = vector.broadcast %368 : vector<1x1xf32> to vector<1x32xf32>
    %370 = arith.subf %362, %369 : vector<1x32xf32>
    %371 = arith.mulf %370, %370 : vector<1x32xf32>
    %cst_160 = arith.constant dense<0.000000e+00> : vector<1xf32>
    %372 = vector.multi_reduction <add>, %371, %cst_160 [1] : vector<1x32xf32> to vector<1xf32>
    %373 = vector.shape_cast %372 : vector<1xf32> to vector<1x1xf32>
    %cst_161 = arith.constant 3.200000e+01 : f32
    %374 = vector.broadcast %cst_161 : f32 to vector<1x1xf32>
    %375 = arith.divf %373, %374 : vector<1x1xf32>
    %cst_162 = arith.constant 9.99999974E-6 : f32
    %376 = vector.broadcast %cst_162 : f32 to vector<1x1xf32>
    %377 = arith.addf %375, %376 : vector<1x1xf32>
    %378 = math.rsqrt %377 : vector<1x1xf32>
    %379 = vector.broadcast %378 : vector<1x1xf32> to vector<1x32xf32>
    %380 = arith.mulf %370, %379 : vector<1x32xf32>
    %381 = arith.mulf %380, %363 : vector<1x32xf32>
    %382 = arith.addf %381, %364 : vector<1x32xf32>
    %c88 = arith.constant 88 : index
    %c0_163 = arith.constant 0 : index
    %383 = vector.load %arg2[%c88, %c0_163] : memref<128x128xf32, #tpu.memory_space<vmem>>, vector<32x16xf32>
    %cst_164 = arith.constant dense<0.000000e+00> : vector<1x16xf32>
    %384 = tpu.matmul %382, %383, %cst_164 {dimension_numbers = #tpu.dot_dimension_numbers<[1], [0], [0], [1], [0, 0, 1, 1], [], []>} : vector<1x32xf32>, vector<32x16xf32>, vector<1x16xf32> -> vector<1x16xf32>
    %c122 = arith.constant 122 : index
    %c0_165 = arith.constant 0 : index
    %385 = vector.load %arg2[%c122, %c0_165] : memref<128x128xf32, #tpu.memory_space<vmem>>, vector<1x16xf32>
    %386 = arith.addf %384, %385 : vector<1x16xf32>
    %cst_166 = arith.constant 5.000000e-01 : f32
    %387 = vector.broadcast %cst_166 : f32 to vector<1x16xf32>
    %388 = arith.mulf %387, %386 : vector<1x16xf32>
    %cst_167 = arith.constant 0.707106769 : f32
    %389 = vector.broadcast %cst_167 : f32 to vector<1x16xf32>
    %390 = arith.mulf %386, %389 : vector<1x16xf32>
    %391 = math.erf %390 : vector<1x16xf32>
    %cst_168 = arith.constant 1.000000e+00 : f32
    %392 = vector.broadcast %cst_168 : f32 to vector<1x16xf32>
    %393 = arith.addf %392, %391 : vector<1x16xf32>
    %394 = arith.mulf %388, %393 : vector<1x16xf32>
    %c123 = arith.constant 123 : index
    %c0_169 = arith.constant 0 : index
    %395 = vector.load %arg2[%c123, %c0_169] : memref<128x128xf32, #tpu.memory_space<vmem>>, vector<1x16xf32>
    %396 = arith.mulf %394, %395 : vector<1x16xf32>
    %cst_170 = arith.constant dense<0.000000e+00> : vector<1xf32>
    %397 = vector.multi_reduction <add>, %396, %cst_170 [1] : vector<1x16xf32> to vector<1xf32>
    %398 = vector.shape_cast %397 : vector<1xf32> to vector<1x1xf32>
    %c124 = arith.constant 124 : index
    %c0_171 = arith.constant 0 : index
    %399 = vector.load %arg2[%c124, %c0_171] : memref<128x128xf32, #tpu.memory_space<vmem>>, vector<1x1xf32>
    %400 = arith.addf %398, %399 : vector<1x1xf32>
    %401 = vector.shape_cast %400 : vector<1x1xf32> to vector<1x1x1xf32>
    %402 = vector.shape_cast %401 : vector<1x1x1xf32> to vector<1x1x1xf32>
    %403 = vector.broadcast %402 : vector<1x1x1xf32> to vector<1x1x128xf32>
    %c0_172 = arith.constant 0 : index
    %c0_173 = arith.constant 0 : index
    %c0_174 = arith.constant 0 : index
    %404 = vector.load %arg5[%c0_172, %c0_173, %c0_174] : memref<1x1x128xf32, #tpu.memory_space<vmem>>, vector<1x1x128xf32>
    tpu.vector_store %arg5[%c0_172, %c0_173, %c0_174], %403 {strides = array<i32>} : memref<1x1x128xf32, #tpu.memory_space<vmem>>, vector<1x1x128xf32>,
    return
  }
  func.func @transform_0(%arg0: i32) -> (i32, i32, i32) {
    %c0_i32 = arith.constant 0 : i32
    %c0_i32_0 = arith.constant 0 : i32
    %c0_i32_1 = arith.constant 0 : i32
    return %arg0, %c0_i32, %c0_i32_0 : i32, i32, i32
  }
  func.func @transform_1(%arg0: i32) -> (i32, i32) {
    %c0_i32 = arith.constant 0 : i32
    %c0_i32_0 = arith.constant 0 : i32
    %c0_i32_1 = arith.constant 0 : i32
    return %c0_i32, %c0_i32_0 : i32, i32
  }
  func.func @transform_2(%arg0: i32) -> (i32, i32, i32) {
    %c0_i32 = arith.constant 0 : i32
    %c0_i32_0 = arith.constant 0 : i32
    %c0_i32_1 = arith.constant 0 : i32
    %c0_i32_2 = arith.constant 0 : i32
    return %c0_i32, %c0_i32_0, %c0_i32_1 : i32, i32, i32
  }
  func.func @transform_3(%arg0: i32) -> (i32, i32, i32) {
    %c0_i32 = arith.constant 0 : i32
    %c0_i32_0 = arith.constant 0 : i32
    %c0_i32_1 = arith.constant 0 : i32
    %c0_i32_2 = arith.constant 0 : i32
    return %c0_i32, %c0_i32_0, %c0_i32_1 : i32, i32, i32
  }
  func.func @transform_4(%arg0: i32) -> (i32, i32, i32) {
    %c0_i32 = arith.constant 0 : i32
    %c0_i32_0 = arith.constant 0 : i32
    %c0_i32_1 = arith.constant 0 : i32
    return %arg0, %c0_i32, %c0_i32_0 : i32, i32, i32
  }
}

</mosaic_0001>

<bundles_post_ra>
// kernel: vit_forward.1
= control target key start
LH: loop header
LB: loop body
LE: loop exit
PB: predicated region body
PF: predicated region fallthrough
CT: control target
= control target key end

     0   :  { %s4632_s15 = smov 0   ;;  %s5863_s0 = inlined_call_operand.vmem [shape: f32[2,24,64], index: 0, kind: input, shape index: {}]   ;;  %s5864_s1 = inlined_call_operand.vmem [shape: f32[128,128], index: 1, kind: input, shape index: {}]   ;;  %s5865_s2 = inlined_call_operand.vmem [shape: f32[2,224,128], index: 2, kind: input, shape index: {}]   ;;  %s5866_s3 = inlined_call_operand.vmem [shape: f32[2,16,128], index: 3, kind: input, shape index: {}]   ;;  %s5867_s4 = inlined_call_operand.vmem [shape: f32[2,1,128], index: 4, kind: output, shape index: {}]  }
   0x1 LB: > { %s3592_s16 = sadd.s32 4294967295, %s4587_s15   ;;  %p3596_p0 = scmp.ge.s32.totalorder %s4587_s15, 1  ;;  %s4587_s15 = sphi %s4632_s15, %s14_s15  }
   0x2   : > { %p162_p1 = scmp.lt.s32.totalorder %s4587_s15, 3 }
   0x4   : > { %p163_p2 = pnand %p3596_p0, %p162_p1 }
   0x5   : > { %p186_p3 = scmp.lt.s32.totalorder (!%p163_p2), %s3592_s16, 1  ;;  %s4591_s7 = smov (!%p163_p2), 96  }
   0x6   : > { %166 = sbr.rel (%p163_p2) target bundleno = 6562 (0x19a2), region = 36  ;;  %s4593_s9 = smov (!%p163_p2), 120  }
   0x7   : > { %s4594_s10 = smov (!%p163_p2), 80   ;;  %s4595_s11 = smov (!%p163_p2), 112  }
   0x8   : > { %s4596_s12 = smov (!%p163_p2), 72   ;;  %s4597_s13 = smov (!%p163_p2), 104  }
   0x9   : > { %s4598_s14 = smov (!%p163_p2), 64   ;;  %s4599_s17 = smov (!%p163_p2), 56  }
   0xa   : > { %s4601_s18 = smov (!%p163_p2), 48   ;;  %s4602_s19 = smov (!%p163_p2), 40  }
   0xb   : > { %v204_v0 = vld [vmem:[%s5864_s1 + $0x38] sm:$0xff]  ;;  %v4589_v1 = vmov 0.0   ;;  %v203_v2 = vld [vmem:[%s5864_s1 + $0x30] sm:$0xff]  ;;  %vm4590_vm0 = vmmov 0   ;;  %v202_v3 = vld [vmem:[%s5864_s1 + $0x28] sm:$0xff]  ;;  %s5869_s16 = smov (!%p186_p3, %s3592_s16), 1 }
   0xc   : > { %3944 = vmatprep.subr.mxu0 %v4589_v1  ;;  %3960 = vmatprep.mubr.msk.f32.mxu0 %vm4590_vm0, %v4589_v1  ;;  %v201_v4 = vld [vmem:[%s5864_s1 + $0x20] sm:$0xff]  ;;  %v200_v5 = vld [vmem:[%s5864_s1 + $0x18] sm:$0xff]  ;;  %s4404_s27 = smul.u32 24, %s5869_s16  ;;  %v199_v6 = vld [vmem:[%s5864_s1 + $0x10] sm:$0xff]  ;;  %vm208_vm1 = vcmask 523264   ;;  %vm304_vm2 = vcmask 261120  }
   0xd   : > { %3945 = vmatpush3.msra.mxu0 %v204_v0  ;;  %3986 = vmatprep.subr.mxu1 %v4589_v1  ;;  %v198_v7 = vld [vmem:[%s5864_s1 + $0x8] sm:$0xff]  ;;  %v197_v8 = vld [vmem:[%s5864_s1] sm:$0xff]  ;;  %v207_v21 = vld [vmem:[%s5864_s1 + $0x50] sm:$0xff]  ;;  %vm466_vm3 = vcmask 64512   ;;  %vm559_vm5 = vcmask 195584   ;;  %s4603_s22 = smov 8  }
   0xe   : > { %3946 = vmatprep.subr.mxu0 %v4589_v1  ;;  %3992 = vmatprep.mubr.msk.f32.mxu1 %vm4590_vm0, %v4589_v1  ;;  %s190_s8 = scalar_lea.vmem %s5863_s0, %s4404_s27  ;;  %v205_v12 = vld [vmem:[%s5864_s1 + $0x40] sm:$0xff]  ;;  %v206_v16 = vld [vmem:[%s5864_s1 + $0x48] sm:$0xff]  ;;  %v362_v42 = vld [vmem:[%s5865_s2 + $0x18] sm:$0xff]  ;;  %s4604_s23 = smov 16   ;;  %vm1435_vm6 = vcmask 130048   ;;  %vm3432_vm7 = vcmask 253952  }
   0xf   : > { %3947 = vmatpush3.msra.mxu0 %v203_v2  ;;  %v194_v9 = vld [vmem:[%s190_s8] sm:$0xff]  ;;  %v195_v10 = vld [vmem:[%s190_s8 + $0x8] sm:$0xff]  ;;  %v196_v11 = vld [vmem:[%s190_s8 + $0x10] sm:$0xff]  ;;  %s4592_s8 = smov 88   ;;  %s4605_s30 = smov 24   ;;  %vm3533_vm8 = vcmask 122880  }
  0x10   : > { %3948 = vmatprep.subr.mxu0 %v4589_v1  ;;  %v361_v43 = vld [vmem:[%s5865_s2 + $0x10] sm:$0xff]  ;;  %v360_v44 = vld [vmem:[%s5865_s2 + $0x8] sm:$0xff]  ;;  %v359_v45 = vld [vmem:[%s5865_s2] sm:$0xff] }
  0x11   : > { %3949 = vmatpush3.msra.mxu0 %v202_v3  ;;  %v3601_v56 = vld [vmem:[%s5866_s3] ss:$0 sm:$0xff]  ;;  %v3602_v58 = vld [vmem:[%s5866_s3 + $0x1] ss:$0 sm:$0xff] }
  0x12   : > { %3950 = vmatprep.subr.mxu0 %v4589_v1 }
  0x13   : > { %3951 = vmatpush3.msra.mxu0 %v201_v4 }
  0x14   : > { %3952 = vmatprep.subr.mxu0 %v4589_v1 }
  0x15   : > { %3953 = vmatpush3.msra.mxu0 %v200_v5 }
  0x16   : > { %3954 = vmatprep.subr.mxu0 %v4589_v1 }
  0x17   : > { %3955 = vmatpush3.msra.mxu0 %v199_v6 }
  0x18   : > { %3956 = vmatprep.subr.mxu0 %v4589_v1 }
  0x19   : > { %3957 = vmatpush3.msra.mxu0 %v198_v7 }
  0x1a   : > { %3958 = vmatprep.subr.mxu0 %v4589_v1 }
  0x1b   : > { %3959 = vmatpush3.msra.mxu0 %v197_v8  ;;  %v3603_v8 = vld [vmem:[%s5866_s3 + $0x2] ss:$0 sm:$0xff] }
  0x1c   : > { %3961 = vmatmul.mubr.msk.f32.vlgmr.msra.gmra.mxu0 %vm208_vm1, %v194_v9  ;;  %3969 = vmatprep.subr.mxu0 %v4589_v1 }
  0x1d   : > { %3963 = vmatprep.mubr.msk.f32.mxu0 %vm4590_vm0, %v4589_v1  ;;  %3970 = vmatpush3.msra.mxu0 %v362_v42 }
  0x1e   : > { %3971 = vmatprep.subr.mxu0 %v4589_v1 }
  0x1f   : > { %3972 = vmatpush3.msra.mxu0 %v361_v43  ;;  %v298_v43 = vlaneseq }
  0x20   : > { %3964 = vmatmul.mubr.msk.f32.gmra.mxu0 %vm208_vm1, %v195_v10  ;;  %3973 = vmatprep.subr.mxu0 %v4589_v1 }
  0x21   : > { %3966 = vmatprep.mubr.msk.f32.mxu0 %vm4590_vm0, %v4589_v1  ;;  %3974 = vmatpush3.msra.mxu0 %v360_v44  ;;  %v299_v44 = vand.u32 127, %v298_v43 }
  0x22   : > { %3975 = vmatprep.subr.mxu0 %v4589_v1 }
  0x23   : > { %3976 = vmatpush3.msra.mxu0 %v359_v45  ;;  %vm300_vm4 = vcmp.lt.s32.totalorder %v299_v44, 17  ;;  %v4600_v45 = vmov -1e+30  }
  0x24   : > { %3967 = vmatmul.mubr.msk.f32.gmra.mxu0 %vm208_vm1, %v196_v11  ;;  %4001 = vmatprep.subr.mxu0 %v4589_v1 }
  0x25   : > { %3977 = vmatprep.mubr.msk.f32.mxu0 %vm4590_vm0, %v4589_v1 }
  0xdc   : > { %v284_v13 = vpop.f32.mrf.mxu0 }
  0xdd   : > { %v4693_v14 = vadd.f32 %v284_v13, %v205_v12 }
  0xde   : > { %v3962_v15 = vpop.f32.mrf.mxu0 }
  0xdf   : > { %v305_v17 = vsel %vm304_vm2, %v4693_v14, 0.0 }
  0xe0   : > { %306 = vadd.xlane.f32.xlu0 %v305_v17  ;;  %v289_v18 = vpop.f32.mrf.mxu0 }
  0xe1   : > { %v4700_v19 = vadd.f32 %v289_v18, %v206_v16 }
  0xe2   : > { %v3965_v20 = vpop.f32.mrf.mxu0 }
  0xe3   : > { %v308_v22 = vsel %vm304_vm2, %v4700_v19, 0.0 }
  0xe4   : > { %309 = vadd.xlane.f32.xlu0 %v308_v22  ;;  %v294_v23 = vpop.f32.mrf.mxu0 }
  0xe5   : > { %v4707_v24 = vadd.f32 %v294_v23, %v207_v21 }
  0xe6   : > { %v3968_v25 = vpop.f32.mrf.mxu0 }
  0xe7   : > { %v311_v26 = vsel %vm304_vm2, %v4707_v24, 0.0 }
  0xe8   : > { %312 = vadd.xlane.f32.xlu1 %v311_v26 }
 0x169   : > { %v307_v27 = vpop.xlane.xlu0 %306 }
 0x16a   : > { %v315_v28 = vmul.f32 0.03125, %v307_v27 }
 0x16c   : > { %v318_v29 = vsub.f32 %v4693_v14, %v315_v28 }
 0x16d   : > { %v310_v30 = vpop.xlane.xlu0 %309 }
 0x16e   : > { %v316_v31 = vmul.f32 0.03125, %v310_v30  ;;  %v321_v32 = vmul.f32 %v318_v29, %v318_v29 }
 0x170   : > { %v319_v33 = vsub.f32 %v4700_v19, %v316_v31  ;;  %v324_v34 = vsel %vm304_vm2, %v321_v32, 0.0 }
 0x171   : > { %325 = vadd.xlane.f32.xlu1 %v324_v34  ;;  %v313_v35 = vpop.xlane.xlu1 %312 }
 0x172   : > { %v317_v36 = vmul.f32 0.03125, %v313_v35  ;;  %v322_v37 = vmul.f32 %v319_v33, %v319_v33 }
 0x174   : > { %v320_v38 = vsub.f32 %v4707_v24, %v317_v36  ;;  %v327_v39 = vsel %vm304_vm2, %v322_v37, 0.0 }
 0x175   : > { %328 = vadd.xlane.f32.xlu0 %v327_v39 }
 0x176   : > { %v323_v40 = vmul.f32 %v320_v38, %v320_v38 }
 0x178   : > { %v330_v41 = vsel %vm304_vm2, %v323_v40, 0.0 }
 0x179   : > { %331 = vadd.xlane.f32.xlu1 %v330_v41 }
 0x1fa   : > { %v326_v46 = vpop.xlane.xlu1 %325 }
 0x1fb   : > { %v333_v47 = vmul.f32 0.03125, %v326_v46  ;;  %v4873_v46 = vsel %vm300_vm4, 0.0, %v4600_v45 }
 0x1fd   : > { %v336_v48 = vadd.f32 1e-05, %v333_v47 }
 0x1fe   : > { %v329_v49 = vpop.xlane.xlu0 %328 }
 0x1ff   : > { %4433 = vrsqrt.f32 %v336_v48  ;;  %v334_v50 = vmul.f32 0.03125, %v329_v49 }
 0x201   : > { %v337_v51 = vadd.f32 1e-05, %v334_v50 }
 0x202   : > { %v332_v52 = vpop.xlane.xlu1 %331 }
 0x203   : > { %4435 = vrsqrt.f32 %v337_v51  ;;  %v335_v53 = vmul.f32 0.03125, %v332_v52 }
 0x205   : > { %v338_v54 = vadd.f32 1e-05, %v335_v53 }
 0x207   : > { %4437 = vrsqrt.f32 %v338_v54 }
 0x20c   : > { %v4434_v55 = vpop.eup %4433 }
 0x20d   : > { %v342_v57 = vmul.f32 %v4434_v55, %v318_v29 }
 0x20f   : > { %v349_v59 = vmul.f32 %v3601_v56, %v342_v57 }
 0x210   : > { %v4436_v60 = vpop.eup %4435 }
 0x211   : > { %v356_v61 = vadd.f32 %v3602_v58, %v349_v59  ;;  %v343_v62 = vmul.f32 %v4436_v60, %v319_v33 }
 0x213   : > { %3978 = vmatmul.mubr.msk.f32.vlgmr.msra.gmra.mxu0 %vm304_vm2, %v356_v61  ;;  %v350_v63 = vmul.f32 %v3601_v56, %v343_v62 }
 0x214   : > { %v4438_v0 = vpop.eup %4437  ;;  %3980 = vmatprep.mubr.msk.f32.mxu0 %vm4590_vm0, %v4589_v1 }
 0x215   : > { %v357_v2 = vadd.f32 %v3602_v58, %v350_v63  ;;  %v344_v3 = vmul.f32 %v4438_v0, %v320_v38 }
 0x217   : > { %3981 = vmatmul.mubr.msk.f32.gmra.mxu0 %vm304_vm2, %v357_v2  ;;  %v351_v4 = vmul.f32 %v3601_v56, %v344_v3 }
 0x218   : > { %3983 = vmatprep.mubr.msk.f32.mxu0 %vm4590_vm0, %v4589_v1 }
 0x219   : > { %v358_v5 = vadd.f32 %v3602_v58, %v351_v4 }
 0x21b   : > { %3984 = vmatmul.mubr.msk.f32.gmra.mxu0 %vm304_vm2, %v358_v5 }
 0x21c   : > { %4007 = vmatprep.mubr.msk.f32.mxu0 %vm4590_vm0, %v4589_v1 }
 0x2d3   : > { %v443_v6 = vpop.f32.mrf.mxu0 }
 0x2d4   : > { %v4755_v13 = vadd.f32 %v3603_v8, %v443_v6 }
 0x2d5   : > { %v3979_v7 = vpop.f32.mrf.mxu0 }
 0x2d7   : > { %v448_v9 = vpop.f32.mrf.mxu0 }
 0x2d8   : > { %v4751_v10 = vadd.f32 %v3603_v8, %v448_v9 }
 0x2d9   : > { %v3982_v11 = vpop.f32.mrf.mxu0 }
 0x2da   : > { %462 = vrot.lane.b32.xlu1 %v4751_v10, %s4591_s7 }
 0x2db   : > { %v453_v12 = vpop.f32.mrf.mxu0 }
 0x2dc   : > { %v4757_v15 = vadd.f32 %v3603_v8, %v453_v12 }
 0x2dd   : > { %v3985_v16 = vpop.f32.mrf.mxu0 }
 0x2de   : > { %460 = vrot.lane.b32.xlu1 %v4755_v13, %s4591_s7  ;;  %464 = vrot.lane.b32.xlu0 %v4757_v15, %s4591_s7 }
 0x2e2   : > { %701 = vrot.lane.b32.xlu1 %v4757_v15, %s4592_s8  ;;  %699 = vrot.lane.b32.xlu0 %v4751_v10, %s4592_s8 }
 0x2e6   : > { %697 = vrot.lane.b32.xlu1 %v4755_v13, %s4592_s8  ;;  %691 = vrot.lane.b32.xlu0 %v4755_v13, %s4593_s9 }
 0x2ea   : > { %936 = vrot.lane.b32.xlu1 %v4757_v15, %s4594_s10  ;;  %693 = vrot.lane.b32.xlu0 %v4751_v10, %s4593_s9 }
 0x2ee   : > { %934 = vrot.lane.b32.xlu1 %v4751_v10, %s4594_s10  ;;  %695 = vrot.lane.b32.xlu0 %v4757_v15, %s4593_s9 }
 0x2f2   : > { %932 = vrot.lane.b32.xlu1 %v4755_v13, %s4594_s10  ;;  %926 = vrot.lane.b32.xlu0 %v4755_v13, %s4595_s11 }
 0x2f6   : > { %1171 = vrot.lane.b32.xlu1 %v4757_v15, %s4596_s12  ;;  %928 = vrot.lane.b32.xlu0 %v4751_v10, %s4595_s11 }
 0x2fa   : > { %1169 = vrot.lane.b32.xlu1 %v4751_v10, %s4596_s12  ;;  %930 = vrot.lane.b32.xlu0 %v4757_v15, %s4595_s11 }
 0x2fe   : > { %1167 = vrot.lane.b32.xlu1 %v4755_v13, %s4596_s12  ;;  %1161 = vrot.lane.b32.xlu0 %v4755_v13, %s4597_s13 }
 0x302   : > { %1163 = vrot.lane.b32.xlu1 %v4751_v10, %s4597_s13  ;;  %1165 = vrot.lane.b32.xlu0 %v4757_v15, %s4597_s13 }
 0x306   : > { %593 = vrot.lane.b32.xlu1 %v4755_v13, %s4598_s14  ;;  %595 = vrot.lane.b32.xlu0 %v4751_v10, %s4598_s14 }
 0x30a   : > { %597 = vrot.lane.b32.xlu1 %v4757_v15, %s4598_s14 }
 0x30e   : > { %832 = vrot.lane.b32.xlu1 %v4757_v15, %s4599_s17 }
 0x34c   : > { %v463_v17 = vpop.permute.xlu1 %462 }
 0x350   : > { %v461_v18 = vpop.permute.xlu1 %460  ;;  %v465_v20 = vpop.permute.xlu0 %464 }
 0x351   : > { %3987 = vmatpush3.xpose.msk.msra.mxu1 %vm466_vm3, %v465_v20 }
 0x352   : > { %3988 = vmatprep.subr.mxu1 %v4589_v1 }
 0x354   : > { %v702_v21 = vpop.permute.xlu1 %701  ;;  %v700_v22 = vpop.permute.xlu0 %699 }
 0x355   : > { %3989 = vmatpush3.xpose.msk.msra.mxu1 %vm466_vm3, %v463_v17 }
 0x356   : > { %3990 = vmatprep.subr.mxu1 %v4589_v1 }
 0x358   : > { %v698_v23 = vpop.permute.xlu1 %697  ;;  %v692_v25 = vpop.permute.xlu0 %691 }
 0x359   : > { %3991 = vmatpush3.xpose.msk.msra.mxu1 %vm466_vm3, %v461_v18 }
 0x35a   : > { %4016 = vmatprep.subr.mxu1 %v4589_v1 }
 0x35c   : > { %v937_v26 = vpop.permute.xlu1 %936  ;;  %3993 = vmatmul.mubr.msk.f32.vlgmr.msra.gmra.mxu1 %vm466_vm3, %v4755_v13  ;;  %v694_v27 = vpop.permute.xlu0 %693 }
 0x35d   : > { %4017 = vmatpush3.xpose.msk.msra.mxu1 %vm466_vm3, %v702_v21  ;;  %3995 = vmatprep.mubr.msk.f32.mxu1 %vm4590_vm0, %v4589_v1 }
 0x35e   : > { %4018 = vmatprep.subr.mxu1 %v4589_v1 }
 0x360   : > { %v935_v28 = vpop.permute.xlu1 %934  ;;  %3996 = vmatmul.mubr.msk.f32.gmra.mxu1 %vm466_vm3, %v4751_v10  ;;  %v696_v29 = vpop.permute.xlu0 %695 }
 0x361   : > { %4019 = vmatpush3.xpose.msk.msra.mxu1 %vm466_vm3, %v700_v22  ;;  %3998 = vmatprep.mubr.msk.f32.mxu1 %vm4590_vm0, %v4589_v1 }
 0x362   : > { %4020 = vmatprep.subr.mxu1 %v4589_v1 }
 0x364   : > { %v933_v30 = vpop.permute.xlu1 %932  ;;  %3999 = vmatmul.mubr.msk.f32.gmra.mxu1 %vm466_vm3, %v4757_v15  ;;  %v927_v31 = vpop.permute.xlu0 %926 }
 0x365   : > { %4021 = vmatpush3.xpose.msk.msra.mxu1 %vm466_vm3, %v698_v23  ;;  %4022 = vmatprep.mubr.msk.f32.mxu1 %vm4590_vm0, %v4589_v1 }
 0x366   : > { %4046 = vmatprep.subr.mxu1 %v4589_v1 }
 0x368   : > { %v1172_v32 = vpop.permute.xlu1 %1171  ;;  %4023 = vmatmul.mubr.msk.f32.vlgmr.msra.gmra.mxu1 %vm466_vm3, %v692_v25  ;;  %v929_v33 = vpop.permute.xlu0 %928 }
 0x369   : > { %4047 = vmatpush3.xpose.msk.msra.mxu1 %vm466_vm3, %v937_v26  ;;  %4025 = vmatprep.mubr.msk.f32.mxu1 %vm4590_vm0, %v4589_v1 }
 0x36a   : > { %4048 = vmatprep.subr.mxu1 %v4589_v1 }
 0x36c   : > { %v1170_v34 = vpop.permute.xlu1 %1169  ;;  %4026 = vmatmul.mubr.msk.f32.gmra.mxu1 %vm466_vm3, %v694_v27  ;;  %v931_v35 = vpop.permute.xlu0 %930 }
 0x36d   : > { %4049 = vmatpush3.xpose.msk.msra.mxu1 %vm466_vm3, %v935_v28  ;;  %4028 = vmatprep.mubr.msk.f32.mxu1 %vm4590_vm0, %v4589_v1 }
 0x36e   : > { %4050 = vmatprep.subr.mxu1 %v4589_v1 }
 0x370   : > { %v1168_v36 = vpop.permute.xlu1 %1167  ;;  %4029 = vmatmul.mubr.msk.f32.gmra.mxu1 %vm466_vm3, %v696_v29  ;;  %v1162_v37 = vpop.permute.xlu0 %1161 }
 0x371   : > { %4051 = vmatpush3.xpose.msk.msra.mxu1 %vm466_vm3, %v933_v30  ;;  %4052 = vmatprep.mubr.msk.f32.mxu1 %vm4590_vm0, %v4589_v1 }
 0x372   : > { %4076 = vmatprep.subr.mxu1 %v4589_v1 }
 0x374   : > { %v1164_v38 = vpop.permute.xlu1 %1163  ;;  %4053 = vmatmul.mubr.msk.f32.vlgmr.msra.gmra.mxu1 %vm466_vm3, %v927_v31  ;;  %v1166_v39 = vpop.permute.xlu0 %1165 }
 0x375   : > { %4077 = vmatpush3.xpose.msk.msra.mxu1 %vm466_vm3, %v1172_v32  ;;  %4055 = vmatprep.mubr.msk.f32.mxu1 %vm4590_vm0, %v4589_v1 }
 0x376   : > { %4078 = vmatprep.subr.mxu1 %v4589_v1 }
 0x378   : > { %v594_v40 = vpop.permute.xlu1 %593  ;;  %4056 = vmatmul.mubr.msk.f32.gmra.mxu1 %vm466_vm3, %v929_v33  ;;  %v596_v42 = vpop.permute.xlu0 %595 }
 0x379   : > { %4079 = vmatpush3.xpose.msk.msra.mxu1 %vm466_vm3, %v1170_v34  ;;  %4058 = vmatprep.mubr.msk.f32.mxu1 %vm4590_vm0, %v4589_v1 }
 0x37a   : > { %4080 = vmatprep.subr.mxu1 %v4589_v1 }
 0x37c   : > { %v598_v41 = vpop.permute.xlu1 %597  ;;  %4059 = vmatmul.mubr.msk.f32.gmra.mxu1 %vm466_vm3, %v931_v35 }
 0x37d   : > { %4002 = vmatpush3.msra.mxu0 %v598_v41  ;;  %4081 = vmatpush3.xpose.msk.msra.mxu1 %vm466_vm3, %v1168_v36 }
 0x37e   : > { %4003 = vmatprep.subr.mxu0 %v4589_v1  ;;  %4082 = vmatprep.mubr.msk.f32.mxu1 %vm4590_vm0, %v4589_v1 }
 0x37f   : > { %4004 = vmatpush3.msra.mxu0 %v596_v42  ;;  %4106 = vmatprep.subr.mxu1 %v4589_v1 }
 0x380   : > { %4005 = vmatprep.subr.mxu0 %v4589_v1  ;;  %4083 = vmatmul.mubr.msk.f32.vlgmr.msra.gmra.mxu1 %vm466_vm3, %v1162_v37 }
 0x381   : > { %4006 = vmatpush3.msra.mxu0 %v594_v40  ;;  %4085 = vmatprep.mubr.msk.f32.mxu1 %vm4590_vm0, %v4589_v1 }
 0x382   : > { %4031 = vmatprep.subr.mxu0 %v4589_v1 }
 0x384   : > { %4086 = vmatmul.mubr.msk.f32.gmra.mxu1 %vm466_vm3, %v1164_v38  ;;  %v4941_v38 = vpop.permute.xlu1 %832 }
 0x385   : > { %4088 = vmatprep.mubr.msk.f32.mxu1 %vm4590_vm0, %v4589_v1 }
 0x388   : > { %4089 = vmatmul.mubr.msk.f32.gmra.mxu1 %vm466_vm3, %v1166_v39 }
 0x389   : > { %4114 = vmatprep.mubr.msk.f32.mxu1 %vm4590_vm0, %v4589_v1 }
 0x41c   : > { %v545_v47 = vpop.f32.mrf.mxu1 }
 0x41d   : > { %v4876_v48 = vadd.f32 %v545_v47, %v4873_v46 }
 0x41e   : > { %v3994_v49 = vpop.f32.mrf.mxu1 }
 0x41f   : > { %v560_v50 = vsel %vm559_vm5, %v4876_v48, -inf }
 0x420   : > { %561 = vmax.xlane.f32.xlu1 %v560_v50  ;;  %v550_v51 = vpop.f32.mrf.mxu1 }
 0x421   : > { %v4881_v52 = vadd.f32 %v550_v51, %v4873_v46 }
 0x422   : > { %v3997_v53 = vpop.f32.mrf.mxu1 }
 0x423   : > { %v563_v54 = vsel %vm559_vm5, %v4881_v52, -inf }
 0x424   : > { %564 = vmax.xlane.f32.xlu0 %v563_v54  ;;  %v555_v55 = vpop.f32.mrf.mxu1 }
 0x425   : > { %v4886_v56 = vadd.f32 %v555_v55, %v4873_v46 }
 0x426   : > { %v4000_v57 = vpop.f32.mrf.mxu1 }
 0x427   : > { %v566_v58 = vsel %vm559_vm5, %v4886_v56, -inf }
 0x428   : > { %567 = vmax.xlane.f32.xlu0 %v566_v58  ;;  %v781_v59 = vpop.f32.mrf.mxu1 }
 0x429   : > { %v4891_v60 = vadd.f32 %v781_v59, %v4873_v46 }
 0x42a   : > { %v4024_v61 = vpop.f32.mrf.mxu1 }
 0x42b   : > { %v795_v62 = vsel %vm559_vm5, %v4891_v60, -inf }
 0x42c   : > { %796 = vmax.xlane.f32.xlu0 %v795_v62  ;;  %v786_v63 = vpop.f32.mrf.mxu1 }
 0x42d   : > { %v4896_v0 = vadd.f32 %v786_v63, %v4873_v46 }
 0x42e   : > { %v4027_v2 = vpop.f32.mrf.mxu1 }
 0x42f   : > { %v798_v3 = vsel %vm559_vm5, %v4896_v0, -inf }
 0x430   : > { %799 = vmax.xlane.f32.xlu1 %v798_v3  ;;  %v791_v4 = vpop.f32.mrf.mxu1 }
 0x431   : > { %v4901_v5 = vadd.f32 %v791_v4, %v4873_v46 }
 0x432   : > { %v4030_v6 = vpop.f32.mrf.mxu1 }
 0x433   : > { %v801_v7 = vsel %vm559_vm5, %v4901_v5, -inf }
 0x434   : > { %802 = vmax.xlane.f32.xlu0 %v801_v7  ;;  %v1016_v8 = vpop.f32.mrf.mxu1 }
 0x435   : > { %v4906_v9 = vadd.f32 %v1016_v8, %v4873_v46 }
 0x436   : > { %v4054_v11 = vpop.f32.mrf.mxu1 }
 0x437   : > { %v1030_v12 = vsel %vm559_vm5, %v4906_v9, -inf }
 0x438   : > { %1031 = vmax.xlane.f32.xlu1 %v1030_v12  ;;  %v1021_v16 = vpop.f32.mrf.mxu1 }
 0x439   : > { %v4911_v17 = vadd.f32 %v1021_v16, %v4873_v46 }
 0x43a   : > { %v4057_v18 = vpop.f32.mrf.mxu1 }
 0x43b   : > { %v1033_v20 = vsel %vm559_vm5, %v4911_v17, -inf }
 0x43c   : > { %1034 = vmax.xlane.f32.xlu0 %v1033_v20  ;;  %v1026_v21 = vpop.f32.mrf.mxu1 }
 0x43d   : > { %v4916_v22 = vadd.f32 %v1026_v21, %v4873_v46 }
 0x43e   : > { %v4060_v23 = vpop.f32.mrf.mxu1 }
 0x43f   : > { %v1036_v25 = vsel %vm559_vm5, %v4916_v22, -inf }
 0x440   : > { %1037 = vmax.xlane.f32.xlu1 %v1036_v25  ;;  %v1251_v26 = vpop.f32.mrf.mxu1 }
 0x441   : > { %v4921_v27 = vadd.f32 %v1251_v26, %v4873_v46 }
 0x442   : > { %v4084_v28 = vpop.f32.mrf.mxu1 }
 0x443   : > { %v1265_v29 = vsel %vm559_vm5, %v4921_v27, -inf }
 0x444   : > { %1266 = vmax.xlane.f32.xlu0 %v1265_v29  ;;  %v1256_v30 = vpop.f32.mrf.mxu1 }
 0x445   : > { %v4932_v34 = vadd.f32 %v1256_v30, %v4873_v46 }
 0x446   : > { %v4087_v31 = vpop.f32.mrf.mxu1 }
 0x447   : > { %v1268_v36 = vsel %vm559_vm5, %v4932_v34, -inf }
 0x448   : > { %v1261_v32 = vpop.f32.mrf.mxu1 }
 0x449   : > { %v4935_v35 = vadd.f32 %v1261_v32, %v4873_v46 }
 0x44a   : > { %v4090_v33 = vpop.f32.mrf.mxu1 }
 0x44b   : > { %v1271_v37 = vsel %vm559_vm5, %v4935_v35, -inf }
 0x451   : > { %828 = vrot.lane.b32.xlu1 %v4755_v13, %s4599_s17 }
 0x455   : > { %1067 = vrot.lane.b32.xlu1 %v4757_v15, %s4601_s18 }
 0x45a   : > { %830 = vrot.lane.b32.xlu0 %v4751_v10, %s4599_s17 }
 0x479   : > { %1269 = vmax.xlane.f32.xlu1 %v1268_v36  ;;  %1272 = vmax.xlane.f32.xlu0 %v1271_v37 }
 0x4a9   : > { %v562_v39 = vpop.xlane.xlu1 %561 }
 0x4aa   : > { %v569_v40 = vsub.f32 %v4876_v48, %v562_v39 }
 0x4ac   : > { %v572_v41 = vmul.f32 1.442695, %v569_v40 }
 0x4ad   : > { %v565_v42 = vpop.xlane.xlu0 %564 }
 0x4ae   : > { %4439 = vpow2.f32 %v572_v41  ;;  %v570_v43 = vsub.f32 %v4881_v52, %v565_v42 }
 0x4b0   : > { %v574_v44 = vmul.f32 1.442695, %v570_v43 }
 0x4b1   : > { %v568_v48 = vpop.xlane.xlu0 %567 }
 0x4b2   : > { %4441 = vpow2.f32 %v574_v44  ;;  %v571_v51 = vsub.f32 %v4886_v56, %v568_v48 }
 0x4b4   : > { %v576_v55 = vmul.f32 1.442695, %v571_v51 }
 0x4b5   : > { %v797_v52 = vpop.xlane.xlu0 %796 }
 0x4b6   : > { %v804_v54 = vsub.f32 %v4891_v60, %v797_v52  ;;  %4443 = vpow2.f32 %v576_v55 }
 0x4b8   : > { %v807_v59 = vmul.f32 1.442695, %v804_v54 }
 0x4b9   : > { %v800_v53 = vpop.xlane.xlu1 %799 }
 0x4ba   : > { %v805_v57 = vsub.f32 %v4896_v0, %v800_v53  ;;  %4445 = vpow2.f32 %v807_v59 }
 0x4bb   : > { %v4945_v45 = vpop.eup %4439 }
 0x4bc   : > { %v578_v47 = vsel %vm559_vm5, %v4945_v45, 0.0  ;;  %v809_v61 = vmul.f32 1.442695, %v805_v57 }
 0x4bd   : > { %579 = vadd.xlane.f32.xlu1 %v578_v47  ;;  %v803_v58 = vpop.xlane.xlu0 %802 }
 0x4be   : > { %v806_v62 = vsub.f32 %v4901_v5, %v803_v58  ;;  %4447 = vpow2.f32 %v809_v61 }
 0x4bf   : > { %v4949_v49 = vpop.eup %4441 }
 0x4c0   : > { %v581_v50 = vsel %vm559_vm5, %v4949_v49, 0.0  ;;  %v811_v2 = vmul.f32 1.442695, %v806_v62 }
 0x4c1   : > { %582 = vadd.xlane.f32.xlu0 %v581_v50  ;;  %v1032_v63 = vpop.xlane.xlu1 %1031 }
 0x4c2   : > { %v1039_v3 = vsub.f32 %v4906_v9, %v1032_v63  ;;  %4449 = vpow2.f32 %v811_v2 }
 0x4c3   : > { %v4964_v11 = vpop.eup %4443 }
 0x4c4   : > { %v1042_v6 = vmul.f32 1.442695, %v1039_v3  ;;  %v584_v9 = vsel %vm559_vm5, %v4964_v11, 0.0 }
 0x4c5   : > { %v1035_v56 = vpop.xlane.xlu0 %1034 }
 0x4c6   : > { %4451 = vpow2.f32 %v1042_v6  ;;  %v1040_v39 = vsub.f32 %v4911_v17, %v1035_v56 }
 0x4c7   : > { %v4966_v5 = vpop.eup %4445 }
 0x4c8   : > { %v813_v20 = vsel %vm559_vm5, %v4966_v5, 0.0  ;;  %v1044_v42 = vmul.f32 1.442695, %v1040_v39  ;;  %v1445_v39 = vld [vmem:[%s5865_s2 + $0x38] sm:$0xff] }
 0x4c9   : > { %v1038_v4 = vpop.xlane.xlu1 %1037  ;;  %4107 = vmatpush3.msra.mxu1 %v1445_v39 }
 0x4ca   : > { %v1041_v60 = vsub.f32 %v4916_v22, %v1038_v4  ;;  %4108 = vmatprep.subr.mxu1 %v4589_v1 }
 0x4cb   : > { %v4970_v16 = vpop.eup %4447 }
 0x4cc   : > { %v1046_v0 = vmul.f32 1.442695, %v1041_v60  ;;  %v816_v18 = vsel %vm559_vm5, %v4970_v16, 0.0 }
 0x4cd   : > { %v1267_v7 = vpop.xlane.xlu0 %1266  ;;  %v829_v36 = vpop.permute.xlu1 %828 }
 0x4ce   : > { %1063 = vrot.lane.b32.xlu1 %v4755_v13, %s4601_s18  ;;  %v1274_v8 = vsub.f32 %v4921_v27, %v1267_v7  ;;  %4453 = vpow2.f32 %v1046_v0 }
 0x4cf   : > { %v4976_v21 = vpop.eup %4449 }
 0x4d0   : > { %v1277_v12 = vmul.f32 1.442695, %v1274_v8  ;;  %v819_v22 = vsel %vm559_vm5, %v4976_v21, 0.0 }
 0x4d1   : > { %v831_v27 = vpop.permute.xlu0 %830  ;;  %v1068_v37 = vpop.permute.xlu1 %1067 }
 0x4d2   : > { %4455 = vpow2.f32 %v1277_v12 }
 0x4d3   : > { %v4980_v23 = vpop.eup %4451 }
 0x4d4   : > { %v1048_v25 = vsel %vm559_vm5, %v4980_v23, 0.0 }
 0x4d7   : > { %1065 = vrot.lane.b32.xlu0 %v4751_v10, %s4601_s18 }
 0x4db   : > { %v4984_v26 = vpop.eup %4453 }
 0x4dc   : > { %v1054_v28 = vsel %vm559_vm5, %v4984_v26, 0.0 }
 0x4df   : > { %v4988_v29 = vpop.eup %4455 }
 0x4e0   : > { %v1283_v33 = vsel %vm559_vm5, %v4988_v29, 0.0 }
 0x4f2   : > { %585 = vadd.xlane.f32.xlu1 %v584_v9 }
 0x4f6   : > { %817 = vadd.xlane.f32.xlu1 %v816_v18  ;;  %814 = vadd.xlane.f32.xlu0 %v813_v20 }
 0x4fa   : > { %820 = vadd.xlane.f32.xlu0 %v819_v22 }
 0x4fe   : > { %1049 = vadd.xlane.f32.xlu0 %v1048_v25 }
 0x502   : > { %1055 = vadd.xlane.f32.xlu0 %v1054_v28  ;;  %v1273_v30 = vpop.xlane.xlu0 %1272  ;;  %v1270_v40 = vpop.xlane.xlu1 %1269 }
 0x503   : > { %v1276_v31 = vsub.f32 %v4935_v35, %v1273_v30  ;;  %v1275_v35 = vsub.f32 %v4932_v34, %v1270_v40 }
 0x505   : > { %v1281_v32 = vmul.f32 1.442695, %v1276_v31  ;;  %v1279_v44 = vmul.f32 1.442695, %v1275_v35 }
 0x506   : > { %1284 = vadd.xlane.f32.xlu0 %v1283_v33 }
 0x507   : > { %1302 = vrot.lane.b32.xlu1 %v4757_v15, %s4602_s19  ;;  %4457 = vpow2.f32 %v1281_v32 }
 0x508   : > { %4459 = vpow2.f32 %v1044_v42 }
 0x509   : > { %4461 = vpow2.f32 %v1279_v44 }
 0x514   : > { %v4996_v41 = vpop.eup %4457 }
 0x515   : > { %v1289_v43 = vsel %vm559_vm5, %v4996_v41, 0.0  ;;  %v5001_v47 = vpop.eup %4459 }
 0x516   : > { %1290 = vadd.xlane.f32.xlu0 %v1289_v43  ;;  %v1051_v15 = vsel %vm559_vm5, %v5001_v47, 0.0  ;;  %v5005_v50 = vpop.eup %4461 }
 0x517   : > { %v1286_v17 = vsel %vm559_vm5, %v5005_v50, 0.0 }
 0x52b   : > { %1052 = vadd.xlane.f32.xlu1 %v1051_v15  ;;  %v1444_v15 = vld [vmem:[%s5865_s2 + $0x30] sm:$0xff] }
 0x52c   : > { %1298 = vrot.lane.b32.xlu0 %v4755_v13, %s4602_s19  ;;  %4109 = vmatpush3.msra.mxu1 %v1444_v15  ;;  %v1604_v15 = vld [vmem:[%s5865_s2 + $0x58] sm:$0xff] }
 0x52d   : > { %4110 = vmatprep.subr.mxu1 %v4589_v1 }
 0x52f   : > { %1287 = vadd.xlane.f32.xlu1 %v1286_v17  ;;  %v1442_v17 = vld [vmem:[%s5865_s2 + $0x20] sm:$0xff] }
 0x540   : > { %1300 = vrot.lane.b32.xlu1 %v4751_v10, %s4602_s19 }
 0x546   : > { %v580_v34 = vpop.xlane.xlu1 %579 }
 0x547   : > { %4463 = vrcp.f32 %v580_v34 }
 0x54a   : > { %v583_v48 = vpop.xlane.xlu0 %582  ;;  %v1064_v10 = vpop.permute.xlu1 %1063 }
 0x54b   : > { %4465 = vrcp.f32 %v583_v48 }
 0x554   : > { %v4464_v51 = vpop.eup %4463 }
 0x555   : > { %v588_v52 = vmul.f32 %v4464_v51, %v4945_v45 }
 0x557   : > { %4008 = vmatmul.mubr.msk.f32.vlgmr.msra.gmra.mxu0 %vm559_vm5, %v588_v52 }
 0x558   : > { %v4466_v53 = vpop.eup %4465  ;;  %4032 = vmatpush3.msra.mxu0 %v4941_v38  ;;  %4010 = vmatprep.mubr.msk.f32.mxu0 %vm4590_vm0, %v4589_v1  ;;  %v1066_v38 = vpop.permute.xlu0 %1065 }
 0x559   : > { %4033 = vmatprep.subr.mxu0 %v4589_v1  ;;  %v590_v13 = vmul.f32 %v4466_v53, %v4949_v49 }
 0x55a   : > { %4034 = vmatpush3.msra.mxu0 %v831_v27 }
 0x55b   : > { %4035 = vmatprep.subr.mxu0 %v4589_v1  ;;  %4011 = vmatmul.mubr.msk.f32.gmra.mxu0 %vm559_vm5, %v590_v13 }
 0x55c   : > { %4036 = vmatpush3.msra.mxu0 %v829_v36  ;;  %4013 = vmatprep.mubr.msk.f32.mxu0 %vm4590_vm0, %v4589_v1 }
 0x55d   : > { %4061 = vmatprep.subr.mxu0 %v4589_v1 }
 0x57b   : > { %v586_v45 = vpop.xlane.xlu1 %585 }
 0x57c   : > { %4467 = vrcp.f32 %v586_v45 }
 0x57f   : > { %v815_v54 = vpop.xlane.xlu0 %814  ;;  %v818_v55 = vpop.xlane.xlu1 %817 }
 0x580   : > { %4469 = vrcp.f32 %v815_v54 }
 0x581   : > { %4471 = vrcp.f32 %v818_v55 }
 0x583   : > { %v821_v49 = vpop.xlane.xlu0 %820  ;;  %v1303_v60 = vpop.permute.xlu1 %1302 }
 0x584   : > { %4473 = vrcp.f32 %v821_v49 }
 0x587   : > { %v1050_v57 = vpop.xlane.xlu0 %1049 }
 0x588   : > { %4475 = vrcp.f32 %v1050_v57 }
 0x589   : > { %v4468_v58 = vpop.eup %4467 }
 0x58a   : > { %v592_v59 = vmul.f32 %v4468_v58, %v4964_v11 }
 0x58b   : > { %v1056_v7 = vpop.xlane.xlu0 %1055 }
 0x58c   : > { %4014 = vmatmul.mubr.msk.f32.gmra.mxu0 %vm559_vm5, %v592_v59 }
 0x58d   : > { %4037 = vmatprep.mubr.msk.f32.mxu0 %vm4590_vm0, %v4589_v1  ;;  %v4470_v61 = vpop.eup %4469 }
 0x58e   : > { %v823_v62 = vmul.f32 %v4470_v61, %v4966_v5  ;;  %v4472_v63 = vpop.eup %4471 }
 0x58f   : > { %v825_v2 = vmul.f32 %v4472_v63, %v4970_v16  ;;  %v1285_v0 = vpop.xlane.xlu0 %1284 }
 0x590   : > { %4038 = vmatmul.mubr.msk.f32.vlgmr.msra.gmra.mxu0 %vm559_vm5, %v823_v62 }
 0x591   : > { %4062 = vmatpush3.msra.mxu0 %v1068_v37  ;;  %4040 = vmatprep.mubr.msk.f32.mxu0 %vm4590_vm0, %v4589_v1  ;;  %v4474_v3 = vpop.eup %4473 }
 0x592   : > { %4063 = vmatprep.subr.mxu0 %v4589_v1  ;;  %v827_v56 = vmul.f32 %v4474_v3, %v4976_v21 }
 0x593   : > { %4064 = vmatpush3.msra.mxu0 %v1066_v38 }
 0x594   : > { %4065 = vmatprep.subr.mxu0 %v4589_v1  ;;  %4041 = vmatmul.mubr.msk.f32.gmra.mxu0 %vm559_vm5, %v825_v2 }
 0x595   : > { %4066 = vmatpush3.msra.mxu0 %v1064_v10  ;;  %4043 = vmatprep.mubr.msk.f32.mxu0 %vm4590_vm0, %v4589_v1  ;;  %v4476_v4 = vpop.eup %4475 }
 0x596   : > { %4091 = vmatprep.subr.mxu0 %v4589_v1  ;;  %v1058_v6 = vmul.f32 %v4476_v4, %v4980_v23 }
 0x598   : > { %4044 = vmatmul.mubr.msk.f32.gmra.mxu0 %vm559_vm5, %v827_v56 }
 0x599   : > { %4067 = vmatprep.mubr.msk.f32.mxu0 %vm4590_vm0, %v4589_v1 }
 0x59c   : > { %4068 = vmatmul.mubr.msk.f32.vlgmr.msra.gmra.mxu0 %vm559_vm5, %v1058_v6 }
 0x59d   : > { %4092 = vmatpush3.msra.mxu0 %v1303_v60  ;;  %4070 = vmatprep.mubr.msk.f32.mxu0 %vm4590_vm0, %v4589_v1 }
 0x59e   : > { %4093 = vmatprep.subr.mxu0 %v4589_v1 }
 0x59f   : > { %v1291_v11 = vpop.xlane.xlu0 %1290 }
 0x5a3   : > { %v1299_v9 = vpop.permute.xlu0 %1298 }
 0x5b4   : > { %v1053_v8 = vpop.xlane.xlu1 %1052 }
 0x5b5   : > { %4477 = vrcp.f32 %v1053_v8 }
 0x5b6   : > { %4479 = vrcp.f32 %v1056_v7 }
 0x5b7   : > { %4481 = vrcp.f32 %v1285_v0 }
 0x5b8   : > { %v1288_v5 = vpop.xlane.xlu1 %1287 }
 0x5b9   : > { %4483 = vrcp.f32 %v1288_v5 }
 0x5ba   : > { %4485 = vrcp.f32 %v1291_v11 }
 0x5bc   : > { %v1301_v12 = vpop.permute.xlu1 %1300 }
 0x5bd   : > { %4094 = vmatpush3.msra.mxu0 %v1301_v12  ;;  %v3646_v12 = vld [vmem:[%s5866_s3 + $0x3] ss:$0 sm:$0xff] }
 0x5be   : > { %4095 = vmatprep.subr.mxu0 %v4589_v1 }
 0x5bf   : > { %4096 = vmatpush3.msra.mxu0 %v1299_v9 }
 0x5c0   : > { %4123 = vmatprep.subr.mxu0 %v4589_v1 }
 0x5c2   : > { %v4478_v16 = vpop.eup %4477 }
 0x5c3   : > { %v1060_v18 = vmul.f32 %v4478_v16, %v5001_v47  ;;  %v4480_v20 = vpop.eup %4479 }
 0x5c4   : > { %v1062_v21 = vmul.f32 %v4480_v20, %v4984_v26  ;;  %v4482_v22 = vpop.eup %4481 }
 0x5c5   : > { %4071 = vmatmul.mubr.msk.f32.gmra.mxu0 %vm559_vm5, %v1060_v18  ;;  %v1293_v23 = vmul.f32 %v4482_v22, %v4988_v29 }
 0x5c6   : > { %4073 = vmatprep.mubr.msk.f32.mxu0 %vm4590_vm0, %v4589_v1  ;;  %v4484_v25 = vpop.eup %4483 }
 0x5c7   : > { %v1295_v27 = vmul.f32 %v4484_v25, %v5005_v50  ;;  %v4486_v28 = vpop.eup %4485  ;;  %v1443_v50 = vld [vmem:[%s5865_s2 + $0x28] sm:$0xff] }
 0x5c8   : > { %v1297_v26 = vmul.f32 %v4486_v28, %v4996_v41  ;;  %4111 = vmatpush3.msra.mxu1 %v1443_v50  ;;  %v1603_v50 = vld [vmem:[%s5865_s2 + $0x50] sm:$0xff] }
 0x5c9   : > { %4074 = vmatmul.mubr.msk.f32.gmra.mxu0 %vm559_vm5, %v1062_v21  ;;  %4112 = vmatprep.subr.mxu1 %v4589_v1 }
 0x5ca   : > { %4097 = vmatprep.mubr.msk.f32.mxu0 %vm4590_vm0, %v4589_v1  ;;  %4113 = vmatpush3.msra.mxu1 %v1442_v17  ;;  %v1602_v17 = vld [vmem:[%s5865_s2 + $0x48] sm:$0xff] }
 0x5cb   : > { %4140 = vmatprep.subr.mxu1 %v4589_v1 }
 0x5cd   : > { %4098 = vmatmul.mubr.msk.f32.vlgmr.msra.gmra.mxu0 %vm559_vm5, %v1293_v23 }
 0x5ce   : > { %4100 = vmatprep.mubr.msk.f32.mxu0 %vm4590_vm0, %v4589_v1  ;;  %4124 = vmatpush3.msra.mxu0 %v1604_v15 }
 0x5cf   : > { %4125 = vmatprep.subr.mxu0 %v4589_v1 }
 0x5d0   : > { %4126 = vmatpush3.msra.mxu0 %v1603_v50 }
 0x5d1   : > { %4101 = vmatmul.mubr.msk.f32.gmra.mxu0 %vm559_vm5, %v1295_v27  ;;  %4127 = vmatprep.subr.mxu0 %v4589_v1 }
 0x5d2   : > { %4103 = vmatprep.mubr.msk.f32.mxu0 %vm4590_vm0, %v4589_v1  ;;  %4128 = vmatpush3.msra.mxu0 %v1602_v17 }
 0x5d3   : > { %4129 = vmatprep.subr.mxu0 %v4589_v1 }
 0x5d5   : > { %4104 = vmatmul.mubr.msk.f32.gmra.mxu0 %vm559_vm5, %v1297_v26 }
 0x5d6   : > { %4131 = vmatprep.mubr.msk.f32.mxu0 %vm4590_vm0, %v4589_v1 }
 0x617   : > { %v677_v29 = vpop.f32.mrf.mxu0 }
 0x619   : > { %v4009_v30 = vpop.f32.mrf.mxu0 }
 0x61b   : > { %v682_v31 = vpop.f32.mrf.mxu0 }
 0x61d   : > { %v4012_v32 = vpop.f32.mrf.mxu0 }
 0x64c   : > { %v5071_v33 = vpop.f32.mrf.mxu0 }
 0x64e   : > { %v4015_v36 = vpop.f32.mrf.mxu0 }
 0x650   : > { %v912_v37 = vpop.f32.mrf.mxu0 }
 0x651   : > { %1399 = vrot.lane.b32.xlu1 %v912_v37, %s4603_s22 }
 0x652   : > { %v4039_v40 = vpop.f32.mrf.mxu0 }
 0x654   : > { %v917_v41 = vpop.f32.mrf.mxu0 }
 0x655   : > { %1401 = vrot.lane.b32.xlu0 %v917_v41, %s4603_s22 }
 0x656   : > { %v4042_v42 = vpop.f32.mrf.mxu0 }
 0x658   : > { %v922_v35 = vpop.f32.mrf.mxu0 }
 0x65a   : > { %v4045_v43 = vpop.f32.mrf.mxu0 }
 0x65c   : > { %v1147_v44 = vpop.f32.mrf.mxu0 }
 0x65d   : > { %1411 = vrot.lane.b32.xlu0 %v1147_v44, %s4604_s23 }
 0x65e   : > { %v4069_v47 = vpop.f32.mrf.mxu0 }
 0x685   : > { %v1152_v34 = vpop.f32.mrf.mxu0 }
 0x686   : > { %1413 = vrot.lane.b32.xlu1 %v1152_v34, %s4604_s23  ;;  %v1601_v34 = vld [vmem:[%s5865_s2 + $0x40] sm:$0xff] }
 0x687   : > { %v4072_v48 = vpop.f32.mrf.mxu0  ;;  %4130 = vmatpush3.msra.mxu0 %v1601_v34 }
 0x688   : > { %4181 = vmatprep.subr.mxu0 %v4589_v1 }
 0x689   : > { %v1157_v51 = vpop.f32.mrf.mxu0 }
 0x68b   : > { %v4075_v52 = vpop.f32.mrf.mxu0 }
 0x68d   : > { %v1382_v53 = vpop.f32.mrf.mxu0 }
 0x68e   : > { %1423 = vrot.lane.b32.xlu1 %v1382_v53, %s4605_s30 }
 0x68f   : > { %v4099_v13 = vpop.f32.mrf.mxu0 }
 0x691   : > { %v1387_v10 = vpop.f32.mrf.mxu0 }
 0x692   : > { %1403 = vrot.lane.b32.xlu1 %v922_v35, %s4603_s22  ;;  %1425 = vrot.lane.b32.xlu0 %v1387_v10, %s4605_s30 }
 0x693   : > { %v4102_v38 = vpop.f32.mrf.mxu0 }
 0x695   : > { %v1392_v45 = vpop.f32.mrf.mxu0 }
 0x696   : > { %1415 = vrot.lane.b32.xlu0 %v1157_v51, %s4604_s23  ;;  %1427 = vrot.lane.b32.xlu1 %v1392_v45, %s4605_s30 }
 0x697   : > { %v4105_v54 = vpop.f32.mrf.mxu0 }
 0x6c3   : > { %v1400_v55 = vpop.permute.xlu1 %1399 }
 0x6c4   : > { %v1432_v59 = vsel %vm466_vm3, %v677_v29, %v1400_v55 }
 0x6c7   : > { %v1402_v49 = vpop.permute.xlu0 %1401 }
 0x6c8   : > { %v1433_v2 = vsel %vm466_vm3, %v682_v31, %v1402_v49  ;;  %v3647_v49 = vld [vmem:[%s5866_s3 + $0x4] ss:$0 sm:$0xff] }
 0x6cf   : > { %v1412_v58 = vpop.permute.xlu0 %1411 }
 0x6d0   : > { %v1436_v61 = vsel %vm1435_vm6, %v1432_v59, %v1412_v58  ;;  %v3648_v58 = vld [vmem:[%s5866_s3 + $0x5] ss:$0 sm:$0xff] }
 0x6f8   : > { %v1414_v57 = vpop.permute.xlu1 %1413 }
 0x6f9   : > { %v1437_v3 = vsel %vm1435_vm6, %v1433_v2, %v1414_v57 }
 0x700   : > { %v1424_v62 = vpop.permute.xlu1 %1423 }
 0x701   : > { %v1439_v63 = vsel %vm559_vm5, %v1436_v61, %v1424_v62 }
 0x702   : > { %4115 = vmatmul.mubr.msk.f32.vlgmr.msra.gmra.mxu1 %vm304_vm2, %v1439_v63 }
 0x703   : > { %4117 = vmatprep.mubr.msk.f32.mxu1 %vm4590_vm0, %v4589_v1 }
 0x704   : > { %v1404_v56 = vpop.permute.xlu1 %1403  ;;  %v1426_v4 = vpop.permute.xlu0 %1425 }
 0x705   : > { %v1440_v6 = vsel %vm559_vm5, %v1437_v3, %v1426_v4  ;;  %v1434_v60 = vsel %vm466_vm3, %v5071_v33, %v1404_v56 }
 0x706   : > { %4118 = vmatmul.mubr.msk.f32.gmra.mxu1 %vm304_vm2, %v1440_v6 }
 0x707   : > { %4120 = vmatprep.mubr.msk.f32.mxu1 %vm4590_vm0, %v4589_v1 }
 0x708   : > { %v1416_v7 = vpop.permute.xlu0 %1415  ;;  %v1428_v0 = vpop.permute.xlu1 %1427 }
 0x709   : > { %v1438_v8 = vsel %vm1435_vm6, %v1434_v60, %v1416_v7  ;;  %v3649_v7 = vld [vmem:[%s5866_s3 + $0x6] ss:$0 sm:$0xff] }
 0x70a   : > { %v1441_v11 = vsel %vm559_vm5, %v1438_v8, %v1428_v0 }
 0x70b   : > { %4121 = vmatmul.mubr.msk.f32.gmra.mxu1 %vm304_vm2, %v1441_v11 }
 0x70c   : > { %4172 = vmatprep.mubr.msk.f32.mxu1 %vm4590_vm0, %v4589_v1 }
 0x7c2   : > { %v1521_v5 = vpop.f32.mrf.mxu1 }
 0x7c3   : > { %v1535_v9 = vadd.f32 %v1521_v5, %v4693_v14 }
 0x7c4   : > { %v4116_v16 = vpop.f32.mrf.mxu1 }
 0x7c5   : > { %v5121_v18 = vadd.f32 %v3646_v12, %v1535_v9 }
 0x7c6   : > { %v1526_v20 = vpop.f32.mrf.mxu1 }
 0x7c7   : > { %v1536_v21 = vadd.f32 %v1526_v20, %v4700_v19  ;;  %v1548_v22 = vsel %vm304_vm2, %v5121_v18, 0.0 }
 0x7c8   : > { %1549 = vadd.xlane.f32.xlu0 %v1548_v22  ;;  %v4119_v23 = vpop.f32.mrf.mxu1 }
 0x7c9   : > { %v5126_v25 = vadd.f32 %v3646_v12, %v1536_v21 }
 0x7cb   : > { %v1531_v27 = vpop.f32.mrf.mxu1  ;;  %v1551_v28 = vsel %vm304_vm2, %v5126_v25, 0.0 }
 0x7cc   : > { %v1537_v26 = vadd.f32 %v1531_v27, %v4707_v24  ;;  %1552 = vadd.xlane.f32.xlu1 %v1551_v28 }
 0x7cd   : > { %v4122_v14 = vpop.f32.mrf.mxu1 }
 0x7ce   : > { %v5131_v29 = vadd.f32 %v3646_v12, %v1537_v26 }
 0x7d0   : > { %v1554_v19 = vsel %vm304_vm2, %v5131_v29, 0.0 }
 0x7d1   : > { %1555 = vadd.xlane.f32.xlu0 %v1554_v19 }
 0x851   : > { %v1550_v30 = vpop.xlane.xlu0 %1549 }
 0x852   : > { %v1557_v31 = vmul.f32 0.03125, %v1550_v30 }
 0x854   : > { %v1560_v32 = vsub.f32 %v5121_v18, %v1557_v31 }
 0x855   : > { %v1553_v33 = vpop.xlane.xlu1 %1552 }
 0x856   : > { %v1558_v36 = vmul.f32 0.03125, %v1553_v33  ;;  %v1563_v37 = vmul.f32 %v1560_v32, %v1560_v32 }
 0x858   : > { %v1561_v39 = vsub.f32 %v5126_v25, %v1558_v36  ;;  %v1566_v40 = vsel %vm304_vm2, %v1563_v37, 0.0 }
 0x859   : > { %1567 = vadd.xlane.f32.xlu0 %v1566_v40 }
 0x85a   : > { %v1556_v24 = vpop.xlane.xlu0 %1555  ;;  %v1564_v41 = vmul.f32 %v1561_v39, %v1561_v39 }
 0x85b   : > { %v1559_v42 = vmul.f32 0.03125, %v1556_v24  ;;  %v1779_v24 = vld [vmem:[%s5865_s2 + $0xd8] sm:$0xff] }
 0x85c   : > { %v1569_v35 = vsel %vm304_vm2, %v1564_v41, 0.0  ;;  %v1778_v41 = vld [vmem:[%s5865_s2 + $0xd0] sm:$0xff]  ;;  %4141 = vmatpush3.msra.mxu1 %v1779_v24 }
 0x85d   : > { %v1562_v43 = vsub.f32 %v5131_v29, %v1559_v42  ;;  %1570 = vadd.xlane.f32.xlu0 %v1569_v35  ;;  %4142 = vmatprep.subr.mxu1 %v4589_v1  ;;  %v1777_v42 = vld [vmem:[%s5865_s2 + $0xc8] sm:$0xff]  ;;  %v1776_v35 = vld [vmem:[%s5865_s2 + $0xc0] sm:$0xff] }
 0x85e   : > { %4143 = vmatpush3.msra.mxu1 %v1778_v41 }
 0x85f   : > { %v1565_v44 = vmul.f32 %v1562_v43, %v1562_v43  ;;  %4144 = vmatprep.subr.mxu1 %v4589_v1 }
 0x860   : > { %4145 = vmatpush3.msra.mxu1 %v1777_v42 }
 0x861   : > { %v1572_v47 = vsel %vm304_vm2, %v1565_v44, 0.0  ;;  %4146 = vmatprep.subr.mxu1 %v4589_v1 }
 0x862   : > { %1573 = vadd.xlane.f32.xlu1 %v1572_v47  ;;  %4147 = vmatpush3.msra.mxu1 %v1776_v35 }
 0x863   : > { %4148 = vmatprep.subr.mxu1 %v4589_v1 }
 0x8e2   : > { %v1568_v48 = vpop.xlane.xlu0 %1567 }
 0x8e3   : > { %v1575_v51 = vmul.f32 0.03125, %v1568_v48 }
 0x8e5   : > { %v1578_v52 = vadd.f32 1e-05, %v1575_v51 }
 0x8e6   : > { %v1571_v53 = vpop.xlane.xlu0 %1570 }
 0x8e7   : > { %4487 = vrsqrt.f32 %v1578_v52  ;;  %v1576_v13 = vmul.f32 0.03125, %v1571_v53 }
 0x8e9   : > { %v1579_v10 = vadd.f32 1e-05, %v1576_v13 }
 0x8eb   : > { %4489 = vrsqrt.f32 %v1579_v10  ;;  %v1574_v38 = vpop.xlane.xlu1 %1573  ;;  %v1775_v10 = vld [vmem:[%s5865_s2 + $0xb8] sm:$0xff] }
 0x8ec   : > { %v1577_v45 = vmul.f32 0.03125, %v1574_v38  ;;  %4149 = vmatpush3.msra.mxu1 %v1775_v10  ;;  %v1774_v38 = vld [vmem:[%s5865_s2 + $0xb0] sm:$0xff] }
 0x8ed   : > { %4150 = vmatprep.subr.mxu1 %v4589_v1 }
 0x8ee   : > { %v1580_v54 = vadd.f32 1e-05, %v1577_v45  ;;  %4151 = vmatpush3.msra.mxu1 %v1774_v38  ;;  %v1773_v45 = vld [vmem:[%s5865_s2 + $0xa8] sm:$0xff] }
 0x8ef   : > { %4152 = vmatprep.subr.mxu1 %v4589_v1 }
 0x8f0   : > { %4491 = vrsqrt.f32 %v1580_v54  ;;  %4153 = vmatpush3.msra.mxu1 %v1773_v45  ;;  %v1772_v54 = vld [vmem:[%s5865_s2 + $0xa0] sm:$0xff] }
 0x8f1   : > { %4154 = vmatprep.subr.mxu1 %v4589_v1 }
 0x8f2   : > { %4155 = vmatpush3.msra.mxu1 %v1772_v54 }
 0x8f3   : > { %4156 = vmatprep.subr.mxu1 %v4589_v1 }
 0x8f4   : > { %v4488_v55 = vpop.eup %4487 }
 0x8f5   : > { %v1584_v57 = vmul.f32 %v4488_v55, %v1560_v32  ;;  %v1771_v55 = vld [vmem:[%s5865_s2 + $0x98] sm:$0xff] }
 0x8f6   : > { %4157 = vmatpush3.msra.mxu1 %v1771_v55  ;;  %v3663_v55 = vld [vmem:[%s5865_s2 + $0xf8] sm:$0xff] }
 0x8f7   : > { %v1591_v59 = vmul.f32 %v3647_v49, %v1584_v57  ;;  %4158 = vmatprep.subr.mxu1 %v4589_v1  ;;  %v1769_v57 = vld [vmem:[%s5865_s2 + $0x88] sm:$0xff] }
 0x8f8   : > { %v4490_v61 = vpop.eup %4489 }
 0x8f9   : > { %v1598_v62 = vadd.f32 %v3648_v58, %v1591_v59  ;;  %v1585_v63 = vmul.f32 %v4490_v61, %v1561_v39  ;;  %v1767_v59 = vld [vmem:[%s5865_s2 + $0x78] sm:$0xff]  ;;  %v1766_v61 = vld [vmem:[%s5865_s2 + $0x70] sm:$0xff] }
 0x8fb   : > { %4132 = vmatmul.mubr.msk.f32.vlgmr.msra.gmra.mxu0 %vm304_vm2, %v1598_v62  ;;  %v1592_v2 = vmul.f32 %v3647_v49, %v1585_v63  ;;  %v1765_v62 = vld [vmem:[%s5865_s2 + $0x68] sm:$0xff]  ;;  %v1764_v63 = vld [vmem:[%s5865_s2 + $0x60] sm:$0xff] }
 0x8fc   : > { %4134 = vmatprep.mubr.msk.f32.mxu0 %vm4590_vm0, %v4589_v1  ;;  %4182 = vmatpush3.msra.mxu0 %v3663_v55 }
 0x8fd   : > { %v4492_v3 = vpop.eup %4491  ;;  %v1599_v56 = vadd.f32 %v3648_v58, %v1592_v2  ;;  %4183 = vmatprep.subr.mxu0 %v4589_v1 }
 0x8fe   : > { %v1586_v4 = vmul.f32 %v4492_v3, %v1562_v43 }
 0x8ff   : > { %4135 = vmatmul.mubr.msk.f32.gmra.mxu0 %vm304_vm2, %v1599_v56 }
 0x900   : > { %4137 = vmatprep.mubr.msk.f32.mxu0 %vm4590_vm0, %v4589_v1  ;;  %v1593_v6 = vmul.f32 %v3647_v49, %v1586_v4  ;;  %v1770_v49 = vld [vmem:[%s5865_s2 + $0x90] sm:$0xff] }
 0x901   : > { %4159 = vmatpush3.msra.mxu1 %v1770_v49  ;;  %v3662_v49 = vld [vmem:[%s5865_s2 + $0xf0] sm:$0xff] }
 0x902   : > { %v1600_v60 = vadd.f32 %v3648_v58, %v1593_v6  ;;  %4160 = vmatprep.subr.mxu1 %v4589_v1  ;;  %v1768_v58 = vld [vmem:[%s5865_s2 + $0x80] sm:$0xff]  ;;  %4184 = vmatpush3.msra.mxu0 %v3662_v49 }
 0x903   : > { %4161 = vmatpush3.msra.mxu1 %v1769_v57  ;;  %v3661_v57 = vld [vmem:[%s5865_s2 + $0xe8] sm:$0xff]  ;;  %4185 = vmatprep.subr.mxu0 %v4589_v1 }
 0x904   : > { %4138 = vmatmul.mubr.msk.f32.gmra.mxu0 %vm304_vm2, %v1600_v60  ;;  %4162 = vmatprep.subr.mxu1 %v4589_v1 }
 0x905   : > { %4189 = vmatprep.mubr.msk.f32.mxu0 %vm4590_vm0, %v4589_v1  ;;  %4163 = vmatpush3.msra.mxu1 %v1768_v58  ;;  %v3660_v58 = vld [vmem:[%s5865_s2 + $0xe0] sm:$0xff] }
 0x906   : > { %4164 = vmatprep.subr.mxu1 %v4589_v1  ;;  %4186 = vmatpush3.msra.mxu0 %v3661_v57 }
 0x907   : > { %4165 = vmatpush3.msra.mxu1 %v1767_v59  ;;  %4187 = vmatprep.subr.mxu0 %v4589_v1 }
 0x908   : > { %4166 = vmatprep.subr.mxu1 %v4589_v1  ;;  %4188 = vmatpush3.msra.mxu0 %v3660_v58 }
 0x909   : > { %4167 = vmatpush3.msra.mxu1 %v1766_v61  ;;  %4198 = vmatprep.subr.mxu0 %v4589_v1 }
 0x90a   : > { %4168 = vmatprep.subr.mxu1 %v4589_v1 }
 0x90b   : > { %4169 = vmatpush3.msra.mxu1 %v1765_v62 }
 0x90c   : > { %4170 = vmatprep.subr.mxu1 %v4589_v1 }
 0x90d   : > { %4171 = vmatpush3.msra.mxu1 %v1764_v63 }
 0x90e   : > { %4228 = vmatprep.subr.mxu1 %v4589_v1 }
 0x9bb   : > { %v1685_v0 = vpop.f32.mrf.mxu0 }
 0x9bc   : > { %v1686_v8 = vadd.f32 %v3649_v7, %v1685_v0 }
 0x9bd   : > { %v4133_v11 = vpop.f32.mrf.mxu0 }
 0x9be   : > { %v1702_v5 = vmul.f32 0.70710677, %v1686_v8  ;;  %v1699_v26 = vmul.f32 0.5, %v1686_v8 }
 0x9bf   : > { %v1690_v12 = vpop.f32.mrf.mxu0 }
 0x9c0   : > { %4493 = verf.f32 %v1702_v5  ;;  %v1691_v9 = vadd.f32 %v3649_v7, %v1690_v12  ;;  %v3653_v5 = vld [vmem:[%s5866_s3 + $0x7] ss:$0 sm:$0xff] }
 0x9c1   : > { %v4136_v16 = vpop.f32.mrf.mxu0 }
 0x9c2   : > { %v1703_v20 = vmul.f32 0.70710677, %v1691_v9  ;;  %v1700_v31 = vmul.f32 0.5, %v1691_v9  ;;  %v3654_v9 = vld [vmem:[%s5866_s3 + $0x8] ss:$0 sm:$0xff] }
 0x9c4   : > { %4495 = verf.f32 %v1703_v20  ;;  %v1695_v21 = vpop.f32.mrf.mxu0 }
 0x9c5   : > { %v1696_v22 = vadd.f32 %v3649_v7, %v1695_v21 }
 0x9c6   : > { %v4139_v23 = vpop.f32.mrf.mxu0 }
 0x9c7   : > { %v1704_v27 = vmul.f32 0.70710677, %v1696_v22  ;;  %v1701_v37 = vmul.f32 0.5, %v1696_v22 }
 0x9c9   : > { %4497 = verf.f32 %v1704_v27 }
 0x9cd   : > { %v4494_v28 = vpop.eup %4493 }
 0x9ce   : > { %v1708_v14 = vadd.f32 1.0, %v4494_v28 }
 0x9d0   : > { %v1711_v19 = vmul.f32 %v1708_v14, %v1699_v26 }
 0x9d1   : > { %v4496_v30 = vpop.eup %4495 }
 0x9d2   : > { %1716 = vadd.xlane.f32.xlu0 %v1711_v19  ;;  %v1709_v32 = vadd.f32 1.0, %v4496_v30 }
 0x9d4   : > { %v1712_v33 = vmul.f32 %v1709_v32, %v1700_v31  ;;  %v3655_v31 = vld [vmem:[%s5866_s3 + $0x9] ss:$0 sm:$0xff] }
 0x9d6   : > { %v4498_v36 = vpop.eup %4497  ;;  %1718 = vadd.xlane.f32.xlu1 %v1712_v33 }
 0x9d7   : > { %v1710_v39 = vadd.f32 1.0, %v4498_v36 }
 0x9d9   : > { %v1713_v40 = vmul.f32 %v1710_v39, %v1701_v37 }
 0x9db   : > { %1720 = vadd.xlane.f32.xlu0 %v1713_v40 }
 0xa5b   : > { %v1717_v43 = vpop.xlane.xlu0 %1716 }
 0xa5c   : > { %v1723_v44 = vmul.f32 0.0078125, %v1717_v43 }
 0xa5e   : > { %v5191_v47 = vsub.f32 %v1711_v19, %v1723_v44 }
 0xa5f   : > { %v1719_v15 = vpop.xlane.xlu1 %1718 }
 0xa60   : > { %v1724_v50 = vmul.f32 0.0078125, %v1719_v15  ;;  %v1729_v17 = vmul.f32 %v5191_v47, %v5191_v47 }
 0xa62   : > { %v5195_v34 = vsub.f32 %v1712_v33, %v1724_v50  ;;  %1732 = vadd.xlane.f32.xlu1 %v1729_v17 }
 0xa64   : > { %v1721_v48 = vpop.xlane.xlu0 %1720  ;;  %v1730_v51 = vmul.f32 %v5195_v34, %v5195_v34 }
 0xa65   : > { %v1725_v52 = vmul.f32 0.0078125, %v1721_v48 }
 0xa66   : > { %1734 = vadd.xlane.f32.xlu0 %v1730_v51 }
 0xa67   : > { %v5199_v53 = vsub.f32 %v1713_v40, %v1725_v52 }
 0xa69   : > { %v1731_v13 = vmul.f32 %v5199_v53, %v5199_v53 }
 0xa6b   : > { %1736 = vadd.xlane.f32.xlu1 %v1731_v13 }
 0xaeb   : > { %v1733_v2 = vpop.xlane.xlu1 %1732 }
 0xaec   : > { %v1738_v3 = vmul.f32 0.0078125, %v1733_v2 }
 0xaee   : > { %v1741_v56 = vadd.f32 1e-05, %v1738_v3 }
 0xaef   : > { %v1735_v4 = vpop.xlane.xlu0 %1734 }
 0xaf0   : > { %4499 = vrsqrt.f32 %v1741_v56  ;;  %v1739_v6 = vmul.f32 0.0078125, %v1735_v4 }
 0xaf2   : > { %v1742_v60 = vadd.f32 1e-05, %v1739_v6 }
 0xaf4   : > { %4501 = vrsqrt.f32 %v1742_v60  ;;  %v1737_v7 = vpop.xlane.xlu1 %1736 }
 0xaf5   : > { %v1740_v0 = vmul.f32 0.0078125, %v1737_v7  ;;  %v3658_v7 = vld [vmem:[%s5866_s3 + $0x10] ss:$0 sm:$0xff] }
 0xaf7   : > { %v1743_v8 = vadd.f32 1e-05, %v1740_v0 }
 0xaf9   : > { %4503 = vrsqrt.f32 %v1743_v8  ;;  %v3659_v8 = vld [vmem:[%s5866_s3 + $0x11] ss:$0 sm:$0xff] }
 0xafd   : > { %v4500_v11 = vpop.eup %4499 }
 0xafe   : > { %v1747_v12 = vmul.f32 %v4500_v11, %v5191_v47 }
 0xb00   : > { %v1754_v16 = vmul.f32 %v3653_v5, %v1747_v12 }
 0xb01   : > { %v4502_v20 = vpop.eup %4501 }
 0xb02   : > { %v1761_v21 = vadd.f32 %v3654_v9, %v1754_v16  ;;  %v1748_v22 = vmul.f32 %v4502_v20, %v5195_v34 }
 0xb04   : > { %4173 = vmatmul.mubr.f32.vlgmr.msra.gmra.mxu1 %v1761_v21  ;;  %v1755_v23 = vmul.f32 %v3653_v5, %v1748_v22 }
 0xb05   : > { %4175 = vmatprep.mubr.msk.f32.mxu1 %vm4590_vm0, %v4589_v1 }
 0xb06   : > { %v4504_v27 = vpop.eup %4503  ;;  %v1762_v28 = vadd.f32 %v3654_v9, %v1755_v23 }
 0xb07   : > { %v1749_v26 = vmul.f32 %v4504_v27, %v5199_v53 }
 0xb08   : > { %4176 = vmatmul.mubr.f32.gmra.mxu1 %v1762_v28 }
 0xb09   : > { %4178 = vmatprep.mubr.msk.f32.mxu1 %vm4590_vm0, %v4589_v1  ;;  %v1756_v14 = vmul.f32 %v3653_v5, %v1749_v26 }
 0xb0b   : > { %v1763_v19 = vadd.f32 %v3654_v9, %v1756_v14  ;;  %v3665_v14 = vld [vmem:[%s5866_s3 + $0x12] ss:$0 sm:$0xff] }
 0xb0d   : > { %4179 = vmatmul.mubr.f32.gmra.mxu1 %v1763_v19 }
 0xb0e   : > { %4234 = vmatprep.mubr.msk.f32.mxu1 %vm4590_vm0, %v4589_v1 }
 0xbc4   : > { %v1846_v30 = vpop.f32.mrf.mxu1 }
 0xbc5   : > { %v1860_v32 = vadd.f32 %v1846_v30, %v5121_v18 }
 0xbc6   : > { %v4174_v33 = vpop.f32.mrf.mxu1 }
 0xbc7   : > { %v5270_v36 = vadd.f32 %v3655_v31, %v1860_v32 }
 0xbc8   : > { %v1851_v37 = vpop.f32.mrf.mxu1 }
 0xbc9   : > { %v1861_v39 = vadd.f32 %v1851_v37, %v5126_v25  ;;  %v1874_v40 = vsel %vm304_vm2, %v5270_v36, 0.0 }
 0xbca   : > { %1875 = vadd.xlane.f32.xlu0 %v1874_v40  ;;  %v4177_v24 = vpop.f32.mrf.mxu1 }
 0xbcb   : > { %v5275_v41 = vadd.f32 %v3655_v31, %v1861_v39 }
 0xbcd   : > { %v1856_v42 = vpop.f32.mrf.mxu1  ;;  %v1877_v35 = vsel %vm304_vm2, %v5275_v41, 0.0 }
 0xbce   : > { %v1862_v43 = vadd.f32 %v1856_v42, %v5131_v29  ;;  %1878 = vadd.xlane.f32.xlu1 %v1877_v35 }
 0xbcf   : > { %v4180_v18 = vpop.f32.mrf.mxu1 }
 0xbd0   : > { %v5280_v44 = vadd.f32 %v3655_v31, %v1862_v43 }
 0xbd2   : > { %v1880_v25 = vsel %vm304_vm2, %v5280_v44, 0.0 }
 0xbd3   : > { %1881 = vadd.xlane.f32.xlu0 %v1880_v25 }
 0xc53   : > { %v1876_v47 = vpop.xlane.xlu0 %1875 }
 0xc54   : > { %v1883_v15 = vmul.f32 0.03125, %v1876_v47 }
 0xc56   : > { %v1886_v50 = vsub.f32 %v5270_v36, %v1883_v15 }
 0xc57   : > { %v1879_v17 = vpop.xlane.xlu1 %1878 }
 0xc58   : > { %v1884_v34 = vmul.f32 0.03125, %v1879_v17  ;;  %v1889_v48 = vmul.f32 %v1886_v50, %v1886_v50 }
 0xc5a   : > { %v1887_v51 = vsub.f32 %v5275_v41, %v1884_v34  ;;  %v1892_v52 = vsel %vm304_vm2, %v1889_v48, 0.0 }
 0xc5b   : > { %1893 = vadd.xlane.f32.xlu1 %v1892_v52 }
 0xc5c   : > { %v1882_v29 = vpop.xlane.xlu0 %1881  ;;  %v1890_v53 = vmul.f32 %v1887_v51, %v1887_v51 }
 0xc5d   : > { %v1885_v13 = vmul.f32 0.03125, %v1882_v29 }
 0xc5e   : > { %v1895_v10 = vsel %vm304_vm2, %v1890_v53, 0.0 }
 0xc5f   : > { %v1888_v38 = vsub.f32 %v5280_v44, %v1885_v13  ;;  %1896 = vadd.xlane.f32.xlu0 %v1895_v10 }
 0xc61   : > { %v1891_v45 = vmul.f32 %v1888_v38, %v1888_v38 }
 0xc63   : > { %v1898_v54 = vsel %vm304_vm2, %v1891_v45, 0.0 }
 0xc64   : > { %1899 = vadd.xlane.f32.xlu1 %v1898_v54 }
 0xce4   : > { %v1894_v59 = vpop.xlane.xlu1 %1893 }
 0xce5   : > { %v1901_v61 = vmul.f32 0.03125, %v1894_v59 }
 0xce7   : > { %v1904_v62 = vadd.f32 1e-05, %v1901_v61 }
 0xce8   : > { %v1897_v63 = vpop.xlane.xlu0 %1896 }
 0xce9   : > { %4505 = vrsqrt.f32 %v1904_v62  ;;  %v1902_v2 = vmul.f32 0.03125, %v1897_v63 }
 0xceb   : > { %v1905_v3 = vadd.f32 1e-05, %v1902_v2 }
 0xced   : > { %4507 = vrsqrt.f32 %v1905_v3  ;;  %v1900_v56 = vpop.xlane.xlu1 %1899 }
 0xcee   : > { %v1903_v4 = vmul.f32 0.03125, %v1900_v56 }
 0xcf0   : > { %v1906_v6 = vadd.f32 1e-05, %v1903_v4 }
 0xcf2   : > { %4509 = vrsqrt.f32 %v1906_v6 }
 0xcf6   : > { %v4506_v60 = vpop.eup %4505 }
 0xcf7   : > { %v1910_v0 = vmul.f32 %v4506_v60, %v1886_v50 }
 0xcf9   : > { %v1917_v11 = vmul.f32 %v3658_v7, %v1910_v0 }
 0xcfa   : > { %v4508_v5 = vpop.eup %4507 }
 0xcfb   : > { %v1924_v12 = vadd.f32 %v3659_v8, %v1917_v11  ;;  %v1911_v9 = vmul.f32 %v4508_v5, %v1887_v51 }
 0xcfd   : > { %4190 = vmatmul.mubr.msk.f32.vlgmr.msra.gmra.mxu0 %vm304_vm2, %v1924_v12  ;;  %v1918_v16 = vmul.f32 %v3658_v7, %v1911_v9 }
 0xcfe   : > { %4192 = vmatprep.mubr.msk.f32.mxu0 %vm4590_vm0, %v4589_v1 }
 0xcff   : > { %v4510_v20 = vpop.eup %4509  ;;  %v1925_v21 = vadd.f32 %v3659_v8, %v1918_v16 }
 0xd00   : > { %v1912_v22 = vmul.f32 %v4510_v20, %v1888_v38 }
 0xd01   : > { %4193 = vmatmul.mubr.msk.f32.gmra.mxu0 %vm304_vm2, %v1925_v21 }
 0xd02   : > { %4195 = vmatprep.mubr.msk.f32.mxu0 %vm4590_vm0, %v4589_v1  ;;  %v1919_v23 = vmul.f32 %v3658_v7, %v1912_v22 }
 0xd04   : > { %v1926_v27 = vadd.f32 %v3659_v8, %v1919_v23 }
 0xd06   : > { %4196 = vmatmul.mubr.msk.f32.gmra.mxu0 %vm304_vm2, %v1926_v27 }
 0xd07   : > { %4204 = vmatprep.mubr.msk.f32.mxu0 %vm4590_vm0, %v4589_v1 }
 0xdbd   : > { %v2012_v28 = vpop.f32.mrf.mxu0 }
 0xdbe   : > { %v5328_v32 = vadd.f32 %v3665_v14, %v2012_v28 }
 0xdbf   : > { %v4191_v26 = vpop.f32.mrf.mxu0 }
 0xdc1   : > { %v2017_v19 = vpop.f32.mrf.mxu0 }
 0xdc2   : > { %v5324_v30 = vadd.f32 %v3665_v14, %v2017_v19 }
 0xdc3   : > { %v4194_v31 = vpop.f32.mrf.mxu0 }
 0xdc4   : > { %2031 = vrot.lane.b32.xlu1 %v5324_v30, %s4591_s7 }
 0xdc6   : > { %v2022_v33 = vpop.f32.mrf.mxu0 }
 0xdc7   : > { %v5330_v37 = vadd.f32 %v3665_v14, %v2022_v33 }
 0xdc8   : > { %2029 = vrot.lane.b32.xlu1 %v5328_v32, %s4591_s7  ;;  %v4197_v39 = vpop.f32.mrf.mxu0 }
 0xdc9   : > { %2033 = vrot.lane.b32.xlu0 %v5330_v37, %s4591_s7 }
 0xdcc   : > { %2268 = vrot.lane.b32.xlu1 %v5330_v37, %s4592_s8 }
 0xdcd   : > { %2266 = vrot.lane.b32.xlu0 %v5324_v30, %s4592_s8 }
 0xdd0   : > { %2264 = vrot.lane.b32.xlu1 %v5328_v32, %s4592_s8 }
 0xdd1   : > { %2258 = vrot.lane.b32.xlu0 %v5328_v32, %s4593_s9 }
 0xdd4   : > { %2503 = vrot.lane.b32.xlu1 %v5330_v37, %s4594_s10 }
 0xdd5   : > { %2260 = vrot.lane.b32.xlu0 %v5324_v30, %s4593_s9 }
 0xdd8   : > { %2501 = vrot.lane.b32.xlu1 %v5324_v30, %s4594_s10 }
 0xdd9   : > { %2262 = vrot.lane.b32.xlu0 %v5330_v37, %s4593_s9 }
 0xddc   : > { %2499 = vrot.lane.b32.xlu1 %v5328_v32, %s4594_s10 }
 0xddd   : > { %2493 = vrot.lane.b32.xlu0 %v5328_v32, %s4595_s11 }
 0xde0   : > { %2738 = vrot.lane.b32.xlu1 %v5330_v37, %s4596_s12 }
 0xde1   : > { %2495 = vrot.lane.b32.xlu0 %v5324_v30, %s4595_s11 }
 0xde4   : > { %2736 = vrot.lane.b32.xlu1 %v5324_v30, %s4596_s12 }
 0xde5   : > { %2497 = vrot.lane.b32.xlu0 %v5330_v37, %s4595_s11 }
 0xde8   : > { %2734 = vrot.lane.b32.xlu1 %v5328_v32, %s4596_s12 }
 0xde9   : > { %2728 = vrot.lane.b32.xlu0 %v5328_v32, %s4597_s13 }
 0xdec   : > { %2160 = vrot.lane.b32.xlu1 %v5328_v32, %s4598_s14 }
 0xded   : > { %2162 = vrot.lane.b32.xlu0 %v5324_v30, %s4598_s14 }
 0xdf0   : > { %2164 = vrot.lane.b32.xlu1 %v5330_v37, %s4598_s14 }
 0xdf4   : > { %2399 = vrot.lane.b32.xlu1 %v5330_v37, %s4599_s17 }
 0xe36   : > { %v2032_v40 = vpop.permute.xlu1 %2031 }
 0xe3a   : > { %v2030_v24 = vpop.permute.xlu1 %2029 }
 0xe3b   : > { %v2034_v42 = vpop.permute.xlu0 %2033 }
 0xe3c   : > { %4199 = vmatpush3.xpose.msk.msra.mxu0 %vm466_vm3, %v2034_v42 }
 0xe3d   : > { %4200 = vmatprep.subr.mxu0 %v4589_v1 }
 0xe3e   : > { %v2269_v35 = vpop.permute.xlu1 %2268 }
 0xe3f   : > { %4229 = vmatpush3.xpose.msk.msra.mxu1 %vm466_vm3, %v2269_v35  ;;  %v2267_v43 = vpop.permute.xlu0 %2266 }
 0xe40   : > { %4201 = vmatpush3.xpose.msk.msra.mxu0 %vm466_vm3, %v2032_v40  ;;  %4230 = vmatprep.subr.mxu1 %v4589_v1 }
 0xe41   : > { %4202 = vmatprep.subr.mxu0 %v4589_v1 }
 0xe42   : > { %v2265_v18 = vpop.permute.xlu1 %2264 }
 0xe43   : > { %4231 = vmatpush3.xpose.msk.msra.mxu1 %vm466_vm3, %v2267_v43  ;;  %v2259_v25 = vpop.permute.xlu0 %2258 }
 0xe44   : > { %4203 = vmatpush3.xpose.msk.msra.mxu0 %vm466_vm3, %v2030_v24  ;;  %4232 = vmatprep.subr.mxu1 %v4589_v1 }
 0xe45   : > { %4213 = vmatprep.subr.mxu0 %v4589_v1 }
 0xe46   : > { %v2504_v47 = vpop.permute.xlu1 %2503 }
 0xe47   : > { %4205 = vmatmul.mubr.msk.f32.vlgmr.msra.gmra.mxu0 %vm466_vm3, %v5328_v32  ;;  %4233 = vmatpush3.xpose.msk.msra.mxu1 %vm466_vm3, %v2265_v18  ;;  %v2261_v15 = vpop.permute.xlu0 %2260 }
 0xe48   : > { %4207 = vmatprep.mubr.msk.f32.mxu0 %vm4590_vm0, %v4589_v1  ;;  %4258 = vmatprep.subr.mxu1 %v4589_v1 }
 0xe4a   : > { %v2502_v50 = vpop.permute.xlu1 %2501  ;;  %4235 = vmatmul.mubr.msk.f32.vlgmr.msra.gmra.mxu1 %vm466_vm3, %v2259_v25 }
 0xe4b   : > { %4208 = vmatmul.mubr.msk.f32.gmra.mxu0 %vm466_vm3, %v5324_v30  ;;  %4259 = vmatpush3.xpose.msk.msra.mxu1 %vm466_vm3, %v2504_v47  ;;  %v2263_v17 = vpop.permute.xlu0 %2262 }
 0xe4c   : > { %4237 = vmatprep.mubr.msk.f32.mxu1 %vm4590_vm0, %v4589_v1  ;;  %4210 = vmatprep.mubr.msk.f32.mxu0 %vm4590_vm0, %v4589_v1 }
 0xe4d   : > { %4260 = vmatprep.subr.mxu1 %v4589_v1 }
 0xe4e   : > { %v2500_v34 = vpop.permute.xlu1 %2499  ;;  %4238 = vmatmul.mubr.msk.f32.gmra.mxu1 %vm466_vm3, %v2261_v15 }
 0xe4f   : > { %4211 = vmatmul.mubr.msk.f32.gmra.mxu0 %vm466_vm3, %v5330_v37  ;;  %4261 = vmatpush3.xpose.msk.msra.mxu1 %vm466_vm3, %v2502_v50  ;;  %v2494_v48 = vpop.permute.xlu0 %2493 }
 0xe50   : > { %4240 = vmatprep.mubr.msk.f32.mxu1 %vm4590_vm0, %v4589_v1  ;;  %4262 = vmatprep.subr.mxu1 %v4589_v1 }
 0xe51   : > { %4219 = vmatprep.mubr.msk.f32.mxu0 %vm4590_vm0, %v4589_v1 }
 0xe52   : > { %v2739_v51 = vpop.permute.xlu1 %2738  ;;  %4241 = vmatmul.mubr.msk.f32.gmra.mxu1 %vm466_vm3, %v2263_v17 }
 0xe53   : > { %4263 = vmatpush3.xpose.msk.msra.mxu1 %vm466_vm3, %v2500_v34  ;;  %v2496_v52 = vpop.permute.xlu0 %2495  ;;  %4264 = vmatprep.mubr.msk.f32.mxu1 %vm4590_vm0, %v4589_v1 }
 0xe54   : > { %4288 = vmatprep.subr.mxu1 %v4589_v1 }
 0xe56   : > { %v2737_v29 = vpop.permute.xlu1 %2736  ;;  %4265 = vmatmul.mubr.msk.f32.vlgmr.msra.gmra.mxu1 %vm466_vm3, %v2494_v48 }
 0xe57   : > { %4289 = vmatpush3.xpose.msk.msra.mxu1 %vm466_vm3, %v2739_v51  ;;  %4267 = vmatprep.mubr.msk.f32.mxu1 %vm4590_vm0, %v4589_v1  ;;  %v2498_v53 = vpop.permute.xlu0 %2497 }
 0xe58   : > { %4290 = vmatprep.subr.mxu1 %v4589_v1 }
 0xe5a   : > { %v2735_v13 = vpop.permute.xlu1 %2734  ;;  %4268 = vmatmul.mubr.msk.f32.gmra.mxu1 %vm466_vm3, %v2496_v52 }
 0xe5b   : > { %4291 = vmatpush3.xpose.msk.msra.mxu1 %vm466_vm3, %v2737_v29  ;;  %4270 = vmatprep.mubr.msk.f32.mxu1 %vm4590_vm0, %v4589_v1  ;;  %v2729_v10 = vpop.permute.xlu0 %2728 }
 0xe5c   : > { %4292 = vmatprep.subr.mxu1 %v4589_v1 }
 0xe5e   : > { %v2161_v38 = vpop.permute.xlu1 %2160  ;;  %4271 = vmatmul.mubr.msk.f32.gmra.mxu1 %vm466_vm3, %v2498_v53 }
 0xe5f   : > { %4293 = vmatpush3.xpose.msk.msra.mxu1 %vm466_vm3, %v2735_v13  ;;  %4294 = vmatprep.mubr.msk.f32.mxu1 %vm4590_vm0, %v4589_v1  ;;  %v2163_v54 = vpop.permute.xlu0 %2162 }
 0xe60   : > { %4318 = vmatprep.subr.mxu1 %v4589_v1 }
 0xe62   : > { %v2165_v45 = vpop.permute.xlu1 %2164  ;;  %4295 = vmatmul.mubr.msk.f32.vlgmr.msra.gmra.mxu1 %vm466_vm3, %v2729_v10 }
 0xe63   : > { %4214 = vmatpush3.msra.mxu0 %v2165_v45  ;;  %4297 = vmatprep.mubr.msk.f32.mxu1 %vm4590_vm0, %v4589_v1 }
 0xe64   : > { %4215 = vmatprep.subr.mxu0 %v4589_v1 }
 0xe65   : > { %4216 = vmatpush3.msra.mxu0 %v2163_v54 }
 0xe66   : > { %4217 = vmatprep.subr.mxu0 %v4589_v1  ;;  %v5479_v25 = vpop.permute.xlu1 %2399 }
 0xe67   : > { %4218 = vmatpush3.msra.mxu0 %v2161_v38 }
 0xe68   : > { %4243 = vmatprep.subr.mxu0 %v4589_v1 }
 0xf07   : > { %v2113_v55 = vpop.f32.mrf.mxu0 }
 0xf08   : > { %v2114_v49 = vadd.f32 %v2113_v55, %v4873_v46 }
 0xf09   : > { %v4206_v57 = vpop.f32.mrf.mxu0 }
 0xf0a   : > { %v2348_v58 = vpop.f32.mrf.mxu1  ;;  %v2127_v59 = vsel %vm559_vm5, %v2114_v49, -inf }
 0xf0b   : > { %v2349_v61 = vadd.f32 %v2348_v58, %v4873_v46  ;;  %2128 = vmax.xlane.f32.xlu1 %v2127_v59  ;;  %v2118_v62 = vpop.f32.mrf.mxu0 }
 0xf0c   : > { %v4236_v63 = vpop.f32.mrf.mxu1  ;;  %v2119_v2 = vadd.f32 %v2118_v62, %v4873_v46 }
 0xf0d   : > { %v4209_v3 = vpop.f32.mrf.mxu0  ;;  %v2362_v56 = vsel %vm559_vm5, %v2349_v61, -inf }
 0xf0e   : > { %2363 = vmax.xlane.f32.xlu0 %v2362_v56  ;;  %v2353_v4 = vpop.f32.mrf.mxu1  ;;  %v2130_v5 = vsel %vm559_vm5, %v2119_v2, -inf }
 0xf0f   : > { %v2354_v6 = vadd.f32 %v2353_v4, %v4873_v46  ;;  %v2123_v60 = vpop.f32.mrf.mxu0 }
 0xf10   : > { %v4239_v7 = vpop.f32.mrf.mxu1  ;;  %v2124_v0 = vadd.f32 %v2123_v60, %v4873_v46 }
 0xf11   : > { %v4212_v8 = vpop.f32.mrf.mxu0  ;;  %v2365_v11 = vsel %vm559_vm5, %v2354_v6, -inf }
 0xf12   : > { %v2358_v12 = vpop.f32.mrf.mxu1  ;;  %2366 = vmax.xlane.f32.xlu1 %v2365_v11  ;;  %2131 = vmax.xlane.f32.xlu0 %v2130_v5  ;;  %v2133_v20 = vsel %vm559_vm5, %v2124_v0, -inf }
 0xf13   : > { %v5446_v16 = vadd.f32 %v2358_v12, %v4873_v46 }
 0xf14   : > { %v4242_v9 = vpop.f32.mrf.mxu1 }
 0xf15   : > { %v2368_v28 = vsel %vm559_vm5, %v5446_v16, -inf }
 0xf16   : > { %v2583_v21 = vpop.f32.mrf.mxu1  ;;  %2134 = vmax.xlane.f32.xlu0 %v2133_v20 }
 0xf17   : > { %v5450_v22 = vadd.f32 %v2583_v21, %v4873_v46 }
 0xf18   : > { %v4266_v23 = vpop.f32.mrf.mxu1 }
 0xf19   : > { %v2597_v27 = vsel %vm559_vm5, %v5450_v22, -inf }
 0xf1a   : > { %v2588_v26 = vpop.f32.mrf.mxu1  ;;  %2598 = vmax.xlane.f32.xlu1 %v2597_v27  ;;  %2369 = vmax.xlane.f32.xlu0 %v2368_v28 }
 0xf1b   : > { %v5457_v14 = vadd.f32 %v2588_v26, %v4873_v46 }
 0xf1c   : > { %v4269_v19 = vpop.f32.mrf.mxu1 }
 0xf1d   : > { %v2600_v31 = vsel %vm559_vm5, %v5457_v14, -inf }
 0xf1e   : > { %v2593_v33 = vpop.f32.mrf.mxu1  ;;  %2601 = vmax.xlane.f32.xlu0 %v2600_v31 }
 0xf1f   : > { %v5462_v39 = vadd.f32 %v2593_v33, %v4873_v46 }
 0xf20   : > { %v4272_v40 = vpop.f32.mrf.mxu1 }
 0xf21   : > { %v2603_v24 = vsel %vm559_vm5, %v5462_v39, -inf }
 0xf22   : > { %v2818_v42 = vpop.f32.mrf.mxu1  ;;  %2604 = vmax.xlane.f32.xlu1 %v2603_v24 }
 0xf23   : > { %v5467_v35 = vadd.f32 %v2818_v42, %v4873_v46 }
 0xf24   : > { %v4296_v43 = vpop.f32.mrf.mxu1 }
 0xf25   : > { %v2832_v18 = vsel %vm559_vm5, %v5467_v35, -inf }
 0xf26   : > { %2833 = vmax.xlane.f32.xlu0 %v2832_v18 }
 0xf33   : > { %2395 = vrot.lane.b32.xlu1 %v5328_v32, %s4599_s17 }
 0xf37   : > { %2634 = vrot.lane.b32.xlu1 %v5330_v37, %s4601_s18 }
 0xf3b   : > { %2632 = vrot.lane.b32.xlu1 %v5324_v30, %s4601_s18 }
 0xf3c   : > { %2397 = vrot.lane.b32.xlu0 %v5324_v30, %s4599_s17 }
 0xf94   : > { %v2129_v47 = vpop.xlane.xlu1 %2128 }
 0xf95   : > { %v2136_v15 = vsub.f32 %v2114_v49, %v2129_v47 }
 0xf97   : > { %v2139_v50 = vmul.f32 1.442695, %v2136_v15  ;;  %v2364_v17 = vpop.xlane.xlu0 %2363 }
 0xf98   : > { %v2371_v34 = vsub.f32 %v2349_v61, %v2364_v17 }
 0xf99   : > { %4511 = vpow2.f32 %v2139_v50 }
 0xf9a   : > { %v2374_v48 = vmul.f32 1.442695, %v2371_v34 }
 0xf9b   : > { %v2367_v51 = vpop.xlane.xlu1 %2366  ;;  %v2132_v52 = vpop.xlane.xlu0 %2131 }
 0xf9c   : > { %4513 = vpow2.f32 %v2374_v48  ;;  %v2372_v29 = vsub.f32 %v2354_v6, %v2367_v51  ;;  %v2137_v53 = vsub.f32 %v2119_v2, %v2132_v52 }
 0xf9e   : > { %v2376_v13 = vmul.f32 1.442695, %v2372_v29  ;;  %v2141_v10 = vmul.f32 1.442695, %v2137_v53 }
 0xf9f   : > { %v2135_v38 = vpop.xlane.xlu0 %2134 }
 0xfa0   : > { %4515 = vpow2.f32 %v2376_v13  ;;  %v2138_v45 = vsub.f32 %v2124_v0, %v2135_v38 }
 0xfa1   : > { %4517 = vpow2.f32 %v2141_v10 }
 0xfa2   : > { %v2143_v54 = vmul.f32 1.442695, %v2138_v45 }
 0xfa3   : > { %v2370_v56 = vpop.xlane.xlu0 %2369  ;;  %v2599_v60 = vpop.xlane.xlu1 %2598 }
 0xfa4   : > { %4519 = vpow2.f32 %v2143_v54  ;;  %v2373_v4 = vsub.f32 %v5446_v16, %v2370_v56  ;;  %v2606_v0 = vsub.f32 %v5450_v22, %v2599_v60 }
 0xfa6   : > { %v5481_v55 = vpop.eup %4511  ;;  %v2378_v8 = vmul.f32 1.442695, %v2373_v4  ;;  %v2609_v12 = vmul.f32 1.442695, %v2606_v0 }
 0xfa7   : > { %v2145_v49 = vsel %vm559_vm5, %v5481_v55, 0.0  ;;  %v2602_v6 = vpop.xlane.xlu0 %2601 }
 0xfa8   : > { %2146 = vadd.xlane.f32.xlu1 %v2145_v49  ;;  %v2607_v7 = vsub.f32 %v5457_v14, %v2602_v6  ;;  %4521 = vpow2.f32 %v2378_v8 }
 0xfa9   : > { %v5485_v57 = vpop.eup %4513 }
 0xfaa   : > { %v2380_v58 = vsel %vm559_vm5, %v5485_v57, 0.0  ;;  %v2611_v5 = vmul.f32 1.442695, %v2607_v7 }
 0xfab   : > { %2381 = vadd.xlane.f32.xlu0 %v2380_v58  ;;  %v2605_v11 = vpop.xlane.xlu1 %2604 }
 0xfac   : > { %v2608_v9 = vsub.f32 %v5462_v39, %v2605_v11  ;;  %4523 = vpow2.f32 %v2611_v5 }
 0xfad   : > { %v5489_v59 = vpop.eup %4515  ;;  %4525 = vpow2.f32 %v2609_v12 }
 0xfae   : > { %v5491_v61 = vpop.eup %4517  ;;  %v2383_v62 = vsel %vm559_vm5, %v5489_v59, 0.0  ;;  %v2613_v21 = vmul.f32 1.442695, %v2608_v9 }
 0xfaf   : > { %2384 = vadd.xlane.f32.xlu1 %v2383_v62  ;;  %v2148_v63 = vsel %vm559_vm5, %v5491_v61, 0.0  ;;  %v2834_v20 = vpop.xlane.xlu0 %2833  ;;  %v2396_v24 = vpop.permute.xlu1 %2395 }
 0xfb0   : > { %2149 = vadd.xlane.f32.xlu0 %v2148_v63  ;;  %v2841_v23 = vsub.f32 %v5467_v35, %v2834_v20  ;;  %4527 = vpow2.f32 %v2613_v21 }
 0xfb1   : > { %v5497_v2 = vpop.eup %4519 }
 0xfb2   : > { %v2151_v3 = vsel %vm559_vm5, %v5497_v2, 0.0  ;;  %v2844_v16 = vmul.f32 1.442695, %v2841_v23 }
 0xfb3   : > { %2152 = vadd.xlane.f32.xlu1 %v2151_v3  ;;  %v2635_v42 = vpop.permute.xlu1 %2634  ;;  %v2398_v43 = vpop.permute.xlu0 %2397 }
 0xfb4   : > { %4529 = vpow2.f32 %v2844_v16 }
 0xfb5   : > { %v5510_v27 = vpop.eup %4521 }
 0xfb6   : > { %v2386_v22 = vsel %vm559_vm5, %v5510_v27, 0.0 }
 0xfb7   : > { %v2633_v35 = vpop.permute.xlu1 %2632 }
 0xfb9   : > { %v5512_v28 = vpop.eup %4523 }
 0xfba   : > { %v5516_v26 = vpop.eup %4525  ;;  %v2618_v14 = vsel %vm559_vm5, %v5512_v28, 0.0 }
 0xfbb   : > { %v2615_v19 = vsel %vm559_vm5, %v5516_v26, 0.0 }
 0xfbd   : > { %v5522_v31 = vpop.eup %4527 }
 0xfbe   : > { %v2621_v33 = vsel %vm559_vm5, %v5522_v31, 0.0 }
 0xfc1   : > { %v5526_v39 = vpop.eup %4529 }
 0xfc2   : > { %v2850_v40 = vsel %vm559_vm5, %v5526_v39, 0.0 }
 0xfc4   : > { %2630 = vrot.lane.b32.xlu1 %v5328_v32, %s4601_s18 }
 0xfc6   : > { %2869 = vrot.lane.b32.xlu0 %v5330_v37, %s4602_s19 }
 0xfe5   : > { %2387 = vadd.xlane.f32.xlu0 %v2386_v22  ;;  %v3707_v22 = vld [vmem:[%s5865_s2 + $0x110] sm:$0xff] }
 0xfe8   : > { %2619 = vadd.xlane.f32.xlu1 %v2618_v14 }
 0xfe9   : > { %2616 = vadd.xlane.f32.xlu0 %v2615_v19  ;;  %v3705_v19 = vld [vmem:[%s5865_s2 + $0x100] sm:$0xff] }
 0xfed   : > { %2622 = vadd.xlane.f32.xlu0 %v2621_v33 }
 0xff1   : > { %2851 = vadd.xlane.f32.xlu0 %v2850_v40 }
 0xff9   : > { %2867 = vrot.lane.b32.xlu1 %v5324_v30, %s4602_s19 }
 0xffd   : > { %2730 = vrot.lane.b32.xlu1 %v5324_v30, %s4597_s13 }
0x1007   : > { %2865 = vrot.lane.b32.xlu0 %v5328_v32, %s4602_s19  ;;  %s193_s19 = scalar_lea.vmem %s5867_s4, %s5869_s16 }
0x100b   : > { %2732 = vrot.lane.b32.xlu0 %v5330_v37, %s4597_s13 }
0x1031   : > { %v2147_v18 = vpop.xlane.xlu1 %2146 }
0x1032   : > { %4531 = vrcp.f32 %v2147_v18 }
0x1034   : > { %v2382_v47 = vpop.xlane.xlu0 %2381 }
0x1038   : > { %v2385_v15 = vpop.xlane.xlu1 %2384 }
0x1039   : > { %v2150_v50 = vpop.xlane.xlu0 %2149 }
0x103a   : > { %4533 = vrcp.f32 %v2150_v50 }
0x103c   : > { %v2153_v17 = vpop.xlane.xlu1 %2152 }
0x103d   : > { %4535 = vrcp.f32 %v2153_v17  ;;  %v2870_v10 = vpop.permute.xlu0 %2869 }
0x103e   : > { %4537 = vrcp.f32 %v2382_v47 }
0x103f   : > { %v4532_v34 = vpop.eup %4531  ;;  %4539 = vrcp.f32 %v2385_v15 }
0x1040   : > { %v2155_v30 = vmul.f32 %v4532_v34, %v5481_v55  ;;  %v2631_v13 = vpop.permute.xlu1 %2630 }
0x1042   : > { %4220 = vmatmul.mubr.msk.f32.vlgmr.msra.gmra.mxu0 %vm559_vm5, %v2155_v30 }
0x1043   : > { %4244 = vmatpush3.msra.mxu0 %v5479_v25  ;;  %4222 = vmatprep.mubr.msk.f32.mxu0 %vm4590_vm0, %v4589_v1 }
0x1044   : > { %4245 = vmatprep.subr.mxu0 %v4589_v1 }
0x1045   : > { %4246 = vmatpush3.msra.mxu0 %v2398_v43 }
0x1046   : > { %4247 = vmatprep.subr.mxu0 %v4589_v1 }
0x1047   : > { %v4534_v32 = vpop.eup %4533  ;;  %4248 = vmatpush3.msra.mxu0 %v2396_v24 }
0x1048   : > { %v2157_v37 = vmul.f32 %v4534_v32, %v5491_v61  ;;  %4273 = vmatprep.subr.mxu0 %v4589_v1 }
0x104a   : > { %v4536_v48 = vpop.eup %4535  ;;  %4223 = vmatmul.mubr.msk.f32.gmra.mxu0 %vm559_vm5, %v2157_v37 }
0x104b   : > { %4225 = vmatprep.mubr.msk.f32.mxu0 %vm4590_vm0, %v4589_v1  ;;  %v2159_v25 = vmul.f32 %v4536_v48, %v5497_v2  ;;  %v4538_v51 = vpop.eup %4537 }
0x104c   : > { %v2390_v52 = vmul.f32 %v4538_v51, %v5485_v57  ;;  %v4540_v29 = vpop.eup %4539 }
0x104d   : > { %v2392_v53 = vmul.f32 %v4540_v29, %v5489_v59 }
0x104e   : > { %4226 = vmatmul.mubr.msk.f32.gmra.mxu0 %vm559_vm5, %v2159_v25 }
0x104f   : > { %4249 = vmatprep.mubr.msk.f32.mxu0 %vm4590_vm0, %v4589_v1 }
0x1052   : > { %4250 = vmatmul.mubr.msk.f32.vlgmr.msra.gmra.mxu0 %vm559_vm5, %v2390_v52 }
0x1053   : > { %4274 = vmatpush3.msra.mxu0 %v2635_v42  ;;  %4252 = vmatprep.mubr.msk.f32.mxu0 %vm4590_vm0, %v4589_v1 }
0x1054   : > { %4275 = vmatprep.subr.mxu0 %v4589_v1 }
0x1055   : > { %4276 = vmatpush3.msra.mxu0 %v2633_v35 }
0x1056   : > { %4277 = vmatprep.subr.mxu0 %v4589_v1  ;;  %4253 = vmatmul.mubr.msk.f32.gmra.mxu0 %vm559_vm5, %v2392_v53 }
0x1057   : > { %4278 = vmatpush3.msra.mxu0 %v2631_v13  ;;  %4255 = vmatprep.mubr.msk.f32.mxu0 %vm4590_vm0, %v4589_v1 }
0x1058   : > { %4303 = vmatprep.subr.mxu0 %v4589_v1 }
0x106e   : > { %v2388_v38 = vpop.xlane.xlu0 %2387 }
0x106f   : > { %4541 = vrcp.f32 %v2388_v38 }
0x1071   : > { %v2620_v45 = vpop.xlane.xlu1 %2619 }
0x1072   : > { %v2617_v54 = vpop.xlane.xlu0 %2616 }
0x1073   : > { %4543 = vrcp.f32 %v2617_v54 }
0x1074   : > { %4545 = vrcp.f32 %v2620_v45 }
0x1075   : > { %v2868_v55 = vpop.permute.xlu1 %2867 }
0x1076   : > { %v2623_v49 = vpop.xlane.xlu0 %2622 }
0x1077   : > { %4547 = vrcp.f32 %v2623_v49 }
0x1079   : > { %v2731_v57 = vpop.permute.xlu1 %2730 }
0x107a   : > { %v2852_v58 = vpop.xlane.xlu0 %2851  ;;  %4298 = vmatmul.mubr.msk.f32.gmra.mxu1 %vm466_vm3, %v2731_v57 }
0x107b   : > { %4300 = vmatprep.mubr.msk.f32.mxu1 %vm4590_vm0, %v4589_v1  ;;  %4549 = vrcp.f32 %v2852_v58 }
0x107c   : > { %v4542_v59 = vpop.eup %4541 }
0x107d   : > { %v2394_v61 = vmul.f32 %v4542_v59, %v5510_v27 }
0x107e   : > { %v2866_v62 = vpop.permute.xlu0 %2865 }
0x107f   : > { %4256 = vmatmul.mubr.msk.f32.gmra.mxu0 %vm559_vm5, %v2394_v61  ;;  %v5636_v61 = vld [vmem:[%s5866_s3 + $0x13] ss:$0 sm:$0xff] }
0x1080   : > { %v4544_v63 = vpop.eup %4543  ;;  %4279 = vmatprep.mubr.msk.f32.mxu0 %vm4590_vm0, %v4589_v1 }
0x1081   : > { %v2625_v2 = vmul.f32 %v4544_v63, %v5516_v26  ;;  %v4546_v3 = vpop.eup %4545  ;;  %v3706_v26 = vld [vmem:[%s5865_s2 + $0x108] sm:$0xff] }
0x1082   : > { %v2733_v56 = vpop.permute.xlu0 %2732  ;;  %v2627_v4 = vmul.f32 %v4546_v3, %v5512_v28  ;;  %v3708_v28 = vld [vmem:[%s5865_s2 + $0x118] sm:$0xff] }
0x1083   : > { %4280 = vmatmul.mubr.msk.f32.vlgmr.msra.gmra.mxu0 %vm559_vm5, %v2625_v2  ;;  %4301 = vmatmul.mubr.msk.f32.gmra.mxu1 %vm466_vm3, %v2733_v56 }
0x1084   : > { %4304 = vmatpush3.msra.mxu0 %v2870_v10  ;;  %4282 = vmatprep.mubr.msk.f32.mxu0 %vm4590_vm0, %v4589_v1  ;;  %v4548_v6 = vpop.eup %4547 }
0x1085   : > { %4305 = vmatprep.subr.mxu0 %v4589_v1  ;;  %4326 = vmatprep.mubr.msk.f32.mxu1 %vm4590_vm0, %v4589_v1  ;;  %v2629_v60 = vmul.f32 %v4548_v6, %v5522_v31 }
0x1086   : > { %4306 = vmatpush3.msra.mxu0 %v2868_v55  ;;  %4319 = vmatpush3.msra.mxu1 %v3708_v28 }
0x1087   : > { %4307 = vmatprep.subr.mxu0 %v4589_v1  ;;  %4283 = vmatmul.mubr.msk.f32.gmra.mxu0 %vm559_vm5, %v2627_v4 }
0x1088   : > { %4308 = vmatpush3.msra.mxu0 %v2866_v62  ;;  %4285 = vmatprep.mubr.msk.f32.mxu0 %vm4590_vm0, %v4589_v1  ;;  %v4550_v7 = vpop.eup %4549 }
0x1089   : > { %4335 = vmatprep.subr.mxu0 %v4589_v1  ;;  %v2860_v0 = vmul.f32 %v4550_v7, %v5526_v39  ;;  %4320 = vmatprep.subr.mxu1 %v4589_v1 }
0x108a   : > { %4321 = vmatpush3.msra.mxu1 %v3707_v22 }
0x108b   : > { %4286 = vmatmul.mubr.msk.f32.gmra.mxu0 %vm559_vm5, %v2629_v60  ;;  %4322 = vmatprep.subr.mxu1 %v4589_v1 }
0x108c   : > { %4309 = vmatprep.mubr.msk.f32.mxu0 %vm4590_vm0, %v4589_v1  ;;  %4323 = vmatpush3.msra.mxu1 %v3706_v26 }
0x108d   : > { %4324 = vmatprep.subr.mxu1 %v4589_v1 }
0x108e   : > { %4325 = vmatpush3.msra.mxu1 %v3705_v19 }
0x108f   : > { %4310 = vmatmul.mubr.msk.f32.vlgmr.msra.gmra.mxu0 %vm559_vm5, %v2860_v0  ;;  %4352 = vmatprep.subr.mxu1 %v4589_v1 }
0x1090   : > { %4312 = vmatprep.mubr.msk.f32.mxu0 %vm4590_vm0, %v4589_v1 }
0x1102   : > { %v2244_v8 = vpop.f32.mrf.mxu0 }
0x1104   : > { %v4221_v11 = vpop.f32.mrf.mxu0 }
0x110a   : > { %v5594_v5 = vpop.f32.mrf.mxu0 }
0x110c   : > { %v4224_v12 = vpop.f32.mrf.mxu0 }
0x110e   : > { %v5596_v9 = vpop.f32.mrf.mxu0 }
0x1110   : > { %v4227_v20 = vpop.f32.mrf.mxu0 }
0x1112   : > { %v2479_v21 = vpop.f32.mrf.mxu0 }
0x1113   : > { %2966 = vrot.lane.b32.xlu1 %v2479_v21, %s4603_s22  ;;  %v3721_v21 = vld [vmem:[%s5865_s2 + $0x138] sm:$0xff] }
0x1114   : > { %v4251_v23 = vpop.f32.mrf.mxu0  ;;  %4336 = vmatpush3.msra.mxu0 %v3721_v21  ;;  %v3742_v21 = vld [vmem:[%s5865_s2 + $0x198] sm:$0xff] }
0x1115   : > { %4337 = vmatprep.subr.mxu0 %v4589_v1  ;;  %v3720_v23 = vld [vmem:[%s5865_s2 + $0x130] sm:$0xff] }
0x1116   : > { %v5599_v16 = vpop.f32.mrf.mxu0  ;;  %4338 = vmatpush3.msra.mxu0 %v3720_v23 }
0x1117   : > { %4339 = vmatprep.subr.mxu0 %v4589_v1 }
0x1118   : > { %v4254_v27 = vpop.f32.mrf.mxu0 }
0x1119   : > { %v3718_v27 = vld [vmem:[%s5865_s2 + $0x120] sm:$0xff] }
0x113a   : > { %v2823_v14 = vpop.f32.mrf.mxu1 }
0x113b   : > { %v2824_v34 = vadd.f32 %v2823_v14, %v4873_v46 }
0x113c   : > { %v4299_v31 = vpop.f32.mrf.mxu1 }
0x113d   : > { %v2835_v30 = vsel %vm559_vm5, %v2824_v34, -inf }
0x113f   : > { %v5616_v33 = vpop.f32.mrf.mxu0 }
0x1141   : > { %v4257_v39 = vpop.f32.mrf.mxu0 }
0x1143   : > { %v2714_v40 = vpop.f32.mrf.mxu0  ;;  %v2828_v24 = vpop.f32.mrf.mxu1 }
0x1144   : > { %2978 = vrot.lane.b32.xlu0 %v2714_v40, %s4604_s23  ;;  %v2829_v32 = vadd.f32 %v2828_v24, %v4873_v46  ;;  %v5679_v24 = vld [vmem:[%s5866_s3 + $0x14] ss:$0 sm:$0xff] }
0x1145   : > { %v4281_v42 = vpop.f32.mrf.mxu0  ;;  %v4302_v35 = vpop.f32.mrf.mxu1 }
0x1146   : > { %v2838_v37 = vsel %vm559_vm5, %v2829_v32, -inf  ;;  %v5684_v35 = vld [vmem:[%s5866_s3 + $0x15] ss:$0 sm:$0xff] }
0x1147   : > { %v2719_v43 = vpop.f32.mrf.mxu0 }
0x1149   : > { %v4284_v18 = vpop.f32.mrf.mxu0 }
0x114b   : > { %v2724_v47 = vpop.f32.mrf.mxu0 }
0x114d   : > { %v4287_v15 = vpop.f32.mrf.mxu0 }
0x114f   : > { %v2949_v50 = vpop.f32.mrf.mxu0 }
0x1150   : > { %2990 = vrot.lane.b32.xlu1 %v2949_v50, %s4605_s30 }
0x1151   : > { %v4311_v17 = vpop.f32.mrf.mxu0 }
0x1163   : > { %2836 = vmax.xlane.f32.xlu0 %v2835_v30 }
0x1174   : > { %2839 = vmax.xlane.f32.xlu1 %v2838_v37 }
0x1185   : > { %v2967_v48 = vpop.permute.xlu1 %2966 }
0x1186   : > { %v2999_v51 = vsel %vm466_vm3, %v2244_v8, %v2967_v48 }
0x11b6   : > { %v2979_v25 = vpop.permute.xlu0 %2978 }
0x11b7   : > { %v3002_v52 = vsel %vm1435_vm6, %v2999_v51, %v2979_v25  ;;  %v5708_v51 = vld [vmem:[%s5866_s3 + $0x16] ss:$0 sm:$0xff] }
0x11c2   : > { %v2991_v29 = vpop.permute.xlu1 %2990 }
0x11c3   : > { %v3005_v53 = vsel %vm559_vm5, %v3002_v52, %v2991_v29 }
0x11c4   : > { %4327 = vmatmul.mubr.msk.f32.vlgmr.msra.gmra.mxu1 %vm304_vm2, %v3005_v53 }
0x11c5   : > { %4329 = vmatprep.mubr.msk.f32.mxu1 %vm4590_vm0, %v4589_v1 }
0x11ec   : > { %v2837_v13 = vpop.xlane.xlu0 %2836 }
0x11ed   : > { %v2842_v10 = vsub.f32 %v2824_v34, %v2837_v13 }
0x11ef   : > { %v2846_v46 = vmul.f32 1.442695, %v2842_v10 }
0x11f1   : > { %4551 = vpow2.f32 %v2846_v46 }
0x11fd   : > { %v2840_v38 = vpop.xlane.xlu1 %2839 }
0x11fe   : > { %v4552_v45 = vpop.eup %4551  ;;  %v2843_v54 = vsub.f32 %v2829_v32, %v2840_v38 }
0x11ff   : > { %v2853_v55 = vsel %vm559_vm5, %v4552_v45, 0.0 }
0x1200   : > { %v2848_v49 = vmul.f32 1.442695, %v2843_v54  ;;  %2854 = vadd.xlane.f32.xlu0 %v2853_v55 }
0x1202   : > { %4553 = vpow2.f32 %v2848_v49 }
0x120f   : > { %v4554_v57 = vpop.eup %4553 }
0x1210   : > { %v2856_v58 = vsel %vm559_vm5, %v4554_v57, 0.0 }
0x1211   : > { %2857 = vadd.xlane.f32.xlu0 %v2856_v58 }
0x1284   : > { %v3087_v59 = vpop.f32.mrf.mxu1 }
0x1285   : > { %v3101_v62 = vadd.f32 %v3087_v59, %v5270_v36 }
0x1286   : > { %v4328_v63 = vpop.f32.mrf.mxu1 }
0x1287   : > { %v5640_v2 = vadd.f32 %v5636_v61, %v3101_v62 }
0x1289   : > { %v2855_v3 = vpop.xlane.xlu0 %2854  ;;  %v3114_v56 = vsel %vm304_vm2, %v5640_v2, 0.0 }
0x128a   : > { %4555 = vrcp.f32 %v2855_v3  ;;  %3115 = vadd.xlane.f32.xlu0 %v3114_v56  ;;  %v3745_v56 = vld [vmem:[%s5865_s2 + $0x1b0] sm:$0xff] }
0x1297   : > { %v4556_v4 = vpop.eup %4555 }
0x1298   : > { %v2862_v6 = vmul.f32 %v4556_v4, %v4552_v45 }
0x129a   : > { %4313 = vmatmul.mubr.msk.f32.gmra.mxu0 %vm559_vm5, %v2862_v6  ;;  %v2858_v60 = vpop.xlane.xlu0 %2857 }
0x129b   : > { %4557 = vrcp.f32 %v2858_v60  ;;  %4315 = vmatprep.mubr.msk.f32.mxu0 %vm4590_vm0, %v4589_v1 }
0x12a0   : > { %2968 = vrot.lane.b32.xlu0 %v5599_v16, %s4603_s22  ;;  %v3719_v16 = vld [vmem:[%s5865_s2 + $0x128] sm:$0xff] }
0x12a1   : > { %4340 = vmatpush3.msra.mxu0 %v3719_v16  ;;  %v3741_v16 = vld [vmem:[%s5865_s2 + $0x190] sm:$0xff] }
0x12a2   : > { %4341 = vmatprep.subr.mxu0 %v4589_v1 }
0x12a3   : > { %4342 = vmatpush3.msra.mxu0 %v3718_v27 }
0x12a4   : > { %2982 = vrot.lane.b32.xlu0 %v2724_v47, %s4604_s23  ;;  %4393 = vmatprep.subr.mxu0 %v4589_v1 }
0x12a8   : > { %v4558_v36 = vpop.eup %4557 }
0x12a9   : > { %v2864_v7 = vmul.f32 %v4558_v36, %v4554_v57 }
0x12ab   : > { %4316 = vmatmul.mubr.msk.f32.gmra.mxu0 %vm559_vm5, %v2864_v7 }
0x12ac   : > { %4343 = vmatprep.mubr.msk.f32.mxu0 %vm4590_vm0, %v4589_v1 }
0x1313   : > { %v3116_v0 = vpop.xlane.xlu0 %3115 }
0x1314   : > { %v3123_v8 = vmul.f32 0.03125, %v3116_v0 }
0x1316   : > { %v3126_v11 = vsub.f32 %v5640_v2, %v3123_v8 }
0x1317   : > { %v2969_v18 = vpop.permute.xlu0 %2968 }
0x1318   : > { %v3129_v12 = vmul.f32 %v3126_v11, %v3126_v11  ;;  %v3000_v15 = vsel %vm466_vm3, %v5594_v5, %v2969_v18  ;;  %v3731_v18 = vld [vmem:[%s5865_s2 + $0x140] sm:$0xff] }
0x131a   : > { %v3132_v20 = vsel %vm304_vm2, %v3129_v12, 0.0 }
0x131b   : > { %3133 = vadd.xlane.f32.xlu1 %v3132_v20  ;;  %v2983_v37 = vpop.permute.xlu0 %2982 }
0x132c   : > { %2980 = vrot.lane.b32.xlu1 %v2719_v43, %s4604_s23 }
0x135a   : > { %v2954_v28 = vpop.f32.mrf.mxu0 }
0x135b   : > { %2992 = vrot.lane.b32.xlu1 %v2954_v28, %s4605_s30  ;;  %v3740_v28 = vld [vmem:[%s5865_s2 + $0x188] sm:$0xff] }
0x135c   : > { %v4314_v22 = vpop.f32.mrf.mxu0 }
0x135f   : > { %2970 = vrot.lane.b32.xlu1 %v5616_v33, %s4603_s22 }
0x136b   : > { %v2959_v26 = vpop.f32.mrf.mxu0 }
0x136c   : > { %2994 = vrot.lane.b32.xlu1 %v2959_v26, %s4605_s30  ;;  %v3739_v26 = vld [vmem:[%s5865_s2 + $0x180] sm:$0xff] }
0x136d   : > { %v4317_v14 = vpop.f32.mrf.mxu0 }
0x13a4   : > { %v3134_v19 = vpop.xlane.xlu1 %3133 }
0x13a5   : > { %v3141_v31 = vmul.f32 0.03125, %v3134_v19  ;;  %v3738_v19 = vld [vmem:[%s5865_s2 + $0x178] sm:$0xff] }
0x13a7   : > { %v3144_v39 = vadd.f32 1e-05, %v3141_v31  ;;  %v3737_v31 = vld [vmem:[%s5865_s2 + $0x170] sm:$0xff] }
0x13a8   : > { %v2981_v47 = vpop.permute.xlu1 %2980 }
0x13a9   : > { %4559 = vrsqrt.f32 %v3144_v39  ;;  %v3003_v50 = vsel %vm1435_vm6, %v3000_v15, %v2981_v47  ;;  %v3736_v39 = vld [vmem:[%s5865_s2 + $0x168] sm:$0xff] }
0x13b6   : > { %v4560_v40 = vpop.eup %4559 }
0x13b7   : > { %v3150_v42 = vmul.f32 %v4560_v40, %v3126_v11  ;;  %v3735_v40 = vld [vmem:[%s5865_s2 + $0x160] sm:$0xff] }
0x13b9   : > { %v3157_v33 = vmul.f32 %v5679_v24, %v3150_v42  ;;  %v3734_v42 = vld [vmem:[%s5865_s2 + $0x158] sm:$0xff] }
0x13bb   : > { %v3164_v43 = vadd.f32 %v5684_v35, %v3157_v33  ;;  %v3733_v33 = vld [vmem:[%s5865_s2 + $0x150] sm:$0xff] }
0x13bd   : > { %4344 = vmatmul.mubr.msk.f32.vlgmr.msra.gmra.mxu0 %vm304_vm2, %v3164_v43  ;;  %v3732_v43 = vld [vmem:[%s5865_s2 + $0x148] sm:$0xff] }
0x13be   : > { %4346 = vmatprep.mubr.msk.f32.mxu0 %vm4590_vm0, %v4589_v1 }
0x13cd   : > { %v2993_v17 = vpop.permute.xlu1 %2992 }
0x13ce   : > { %v3006_v34 = vsel %vm559_vm5, %v3003_v50, %v2993_v17 }
0x13cf   : > { %4330 = vmatmul.mubr.msk.f32.gmra.mxu1 %vm304_vm2, %v3006_v34 }
0x13d0   : > { %4332 = vmatprep.mubr.msk.f32.mxu1 %vm4590_vm0, %v4589_v1 }
0x13d1   : > { %v2971_v30 = vpop.permute.xlu1 %2970 }
0x13d2   : > { %v3001_v32 = vsel %vm466_vm3, %v5596_v9, %v2971_v30 }
0x13d3   : > { %v3004_v48 = vsel %vm1435_vm6, %v3001_v32, %v2983_v37  ;;  %v5789_v37 = vld [vmem:[%s5866_s3 + $0x17] ss:$0 sm:$0xff] }
0x13de   : > { %v2995_v25 = vpop.permute.xlu1 %2994 }
0x13df   : > { %v3007_v5 = vsel %vm559_vm5, %v3004_v48, %v2995_v25 }
0x13e0   : > { %4333 = vmatmul.mubr.msk.f32.gmra.mxu1 %vm304_vm2, %v3007_v5 }
0x13e1   : > { %4384 = vmatprep.mubr.msk.f32.mxu1 %vm4590_vm0, %v4589_v1 }
0x147d   : > { %v3251_v52 = vpop.f32.mrf.mxu0 }
0x147e   : > { %v3252_v29 = vadd.f32 %v5708_v51, %v3251_v52  ;;  %v5794_v52 = vld [vmem:[%s5866_s3 + $0x18] ss:$0 sm:$0xff] }
0x147f   : > { %v4345_v9 = vpop.f32.mrf.mxu0 }
0x1480   : > { %v3268_v53 = vmul.f32 0.70710677, %v3252_v29  ;;  %v3265_v46 = vmul.f32 0.5, %v3252_v29 }
0x1482   : > { %4561 = verf.f32 %v3268_v53 }
0x148f   : > { %v4562_v13 = vpop.eup %4561  ;;  %v3092_v10 = vpop.f32.mrf.mxu1 }
0x1490   : > { %v3102_v38 = vadd.f32 %v3092_v10, %v5275_v41  ;;  %v3274_v45 = vadd.f32 1.0, %v4562_v13  ;;  %v3746_v41 = vld [vmem:[%s5865_s2 + $0x1b8] sm:$0xff] }
0x1491   : > { %v4331_v54 = vpop.f32.mrf.mxu1  ;;  %4353 = vmatpush3.msra.mxu1 %v3746_v41 }
0x1492   : > { %v3277_v55 = vmul.f32 %v3274_v45, %v3265_v46  ;;  %v3110_v49 = vadd.f32 %v5636_v61, %v3102_v38  ;;  %4354 = vmatprep.subr.mxu1 %v4589_v1 }
0x1493   : > { %4355 = vmatpush3.msra.mxu1 %v3745_v56 }
0x1494   : > { %3282 = vadd.xlane.f32.xlu0 %v3277_v55  ;;  %v3117_v57 = vsel %vm304_vm2, %v3110_v49, 0.0  ;;  %4356 = vmatprep.subr.mxu1 %v4589_v1 }
0x1498   : > { %3118 = vadd.xlane.f32.xlu0 %v3117_v57 }
0x14a0   : > { %v3097_v58 = vpop.f32.mrf.mxu1 }
0x14a1   : > { %v3103_v59 = vadd.f32 %v3097_v58, %v5280_v44  ;;  %v3744_v44 = vld [vmem:[%s5865_s2 + $0x1a8] sm:$0xff]  ;;  %v3748_v58 = vld [vmem:[%s5866_s3 + $0x19] ss:$0 sm:$0xff] }
0x14a2   : > { %v4334_v62 = vpop.f32.mrf.mxu1  ;;  %4357 = vmatpush3.msra.mxu1 %v3744_v44 }
0x14a3   : > { %v3111_v63 = vadd.f32 %v5636_v61, %v3103_v59  ;;  %v3743_v61 = vld [vmem:[%s5865_s2 + $0x1a0] sm:$0xff]  ;;  %4358 = vmatprep.subr.mxu1 %v4589_v1 }
0x14a4   : > { %4359 = vmatpush3.msra.mxu1 %v3743_v61 }
0x14a5   : > { %v3120_v3 = vsel %vm304_vm2, %v3111_v63, 0.0  ;;  %4360 = vmatprep.subr.mxu1 %v4589_v1 }
0x14a6   : > { %3121 = vadd.xlane.f32.xlu0 %v3120_v3  ;;  %4361 = vmatpush3.msra.mxu1 %v3742_v21 }
0x14a7   : > { %4362 = vmatprep.subr.mxu1 %v4589_v1 }
0x14a8   : > { %4363 = vmatpush3.msra.mxu1 %v3741_v16 }
0x14a9   : > { %4364 = vmatprep.subr.mxu1 %v4589_v1 }
0x14aa   : > { %4365 = vmatpush3.msra.mxu1 %v3740_v28 }
0x14ab   : > { %4366 = vmatprep.subr.mxu1 %v4589_v1 }
0x14ac   : > { %4367 = vmatpush3.msra.mxu1 %v3739_v26 }
0x14ad   : > { %4368 = vmatprep.subr.mxu1 %v4589_v1 }
0x14ae   : > { %4369 = vmatpush3.msra.mxu1 %v3738_v19  ;;  %v3450_v19 = vld [vmem:[%s5864_s1 + $0x68] sm:$0xff] }
0x14af   : > { %4370 = vmatprep.subr.mxu1 %v4589_v1 }
0x14b0   : > { %4371 = vmatpush3.msra.mxu1 %v3737_v31  ;;  %v3449_v31 = vld [vmem:[%s5864_s1 + $0x60] sm:$0xff] }
0x14b1   : > { %4372 = vmatprep.subr.mxu1 %v4589_v1 }
0x14b2   : > { %4373 = vmatpush3.msra.mxu1 %v3736_v39  ;;  %v3448_v39 = vld [vmem:[%s5864_s1 + $0x58] sm:$0xff] }
0x14b3   : > { %4374 = vmatprep.subr.mxu1 %v4589_v1 }
0x14b4   : > { %4375 = vmatpush3.msra.mxu1 %v3735_v40 }
0x14b5   : > { %4376 = vmatprep.subr.mxu1 %v4589_v1 }
0x14b6   : > { %4377 = vmatpush3.msra.mxu1 %v3734_v42 }
0x14b7   : > { %4378 = vmatprep.subr.mxu1 %v4589_v1 }
0x14b8   : > { %4379 = vmatpush3.msra.mxu1 %v3733_v33 }
0x14b9   : > { %4380 = vmatprep.subr.mxu1 %v4589_v1 }
0x14ba   : > { %4381 = vmatpush3.msra.mxu1 %v3732_v43 }
0x14bb   : > { %4382 = vmatprep.subr.mxu1 %v4589_v1 }
0x14bc   : > { %4383 = vmatpush3.msra.mxu1 %v3731_v18 }
0x151d   : > { %v3283_v4 = vpop.xlane.xlu0 %3282 }
0x151e   : > { %v3288_v6 = vmul.f32 0.0078125, %v3283_v4 }
0x1520   : > { %v3291_v60 = vsub.f32 %v3277_v55, %v3288_v6 }
0x1521   : > { %v3119_v36 = vpop.xlane.xlu0 %3118 }
0x1522   : > { %v3124_v7 = vmul.f32 0.03125, %v3119_v36  ;;  %v3294_v0 = vmul.f32 %v3291_v60, %v3291_v60 }
0x1524   : > { %v5733_v8 = vsub.f32 %v3110_v49, %v3124_v7  ;;  %3297 = vadd.xlane.f32.xlu1 %v3294_v0 }
0x1526   : > { %v3130_v11 = vmul.f32 %v5733_v8, %v5733_v8 }
0x1528   : > { %v3135_v12 = vsel %vm304_vm2, %v3130_v11, 0.0 }
0x1529   : > { %3136 = vadd.xlane.f32.xlu0 %v3135_v12 }
0x152f   : > { %v3122_v20 = vpop.xlane.xlu0 %3121 }
0x1530   : > { %v3125_v23 = vmul.f32 0.03125, %v3122_v20 }
0x1532   : > { %v3128_v27 = vsub.f32 %v3111_v63, %v3125_v23 }
0x1534   : > { %v3131_v22 = vmul.f32 %v3128_v27, %v3128_v27 }
0x1536   : > { %v3138_v14 = vsel %vm304_vm2, %v3131_v22, 0.0 }
0x1537   : > { %3139 = vadd.xlane.f32.xlu1 %v3138_v14 }
0x15ad   : > { %v3298_v47 = vpop.xlane.xlu1 %3297 }
0x15ae   : > { %v3303_v15 = vmul.f32 0.0078125, %v3298_v47 }
0x15b0   : > { %v3306_v50 = vadd.f32 1e-05, %v3303_v15 }
0x15b2   : > { %4563 = vrsqrt.f32 %v3306_v50  ;;  %v3137_v17 = vpop.xlane.xlu0 %3136 }
0x15b3   : > { %v3142_v34 = vmul.f32 0.03125, %v3137_v17  ;;  %v3430_v17 = vld [vmem:[%s5864_s1 + $0x78] sm:$0x1] }
0x15b5   : > { %v3145_v30 = vadd.f32 1e-05, %v3142_v34 }
0x15b7   : > { %4565 = vrsqrt.f32 %v3145_v30  ;;  %v3431_v30 = vld [vmem:[%s5864_s1 + $0x79] sm:$0x1] }
0x15bf   : > { %v4564_v32 = vpop.eup %4563 }
0x15c0   : > { %v3312_v48 = vmul.f32 %v4564_v32, %v3291_v60  ;;  %v3140_v25 = vpop.xlane.xlu1 %3139 }
0x15c1   : > { %v3143_v5 = vmul.f32 0.03125, %v3140_v25 }
0x15c2   : > { %v3319_v29 = vmul.f32 %v5789_v37, %v3312_v48 }
0x15c3   : > { %v3146_v9 = vadd.f32 1e-05, %v3143_v5 }
0x15c4   : > { %v4566_v53 = vpop.eup %4565  ;;  %v3326_v13 = vadd.f32 %v5794_v52, %v3319_v29 }
0x15c5   : > { %4567 = vrsqrt.f32 %v3146_v9  ;;  %v3151_v10 = vmul.f32 %v4566_v53, %v5733_v8 }
0x15c6   : > { %4385 = vmatmul.mubr.f32.vlgmr.msra.gmra.mxu1 %v3326_v13 }
0x15c7   : > { %v3158_v46 = vmul.f32 %v5679_v24, %v3151_v10  ;;  %4387 = vmatprep.mubr.msk.f32.mxu1 %vm4590_vm0, %v4589_v1 }
0x15c9   : > { %v3165_v38 = vadd.f32 %v5684_v35, %v3158_v46 }
0x15cb   : > { %4347 = vmatmul.mubr.msk.f32.gmra.mxu0 %vm304_vm2, %v3165_v38 }
0x15cc   : > { %4349 = vmatprep.mubr.msk.f32.mxu0 %vm4590_vm0, %v4589_v1 }
0x15d2   : > { %v4568_v45 = vpop.eup %4567 }
0x15d3   : > { %v3152_v54 = vmul.f32 %v4568_v45, %v3128_v27 }
0x15d5   : > { %v3159_v55 = vmul.f32 %v5679_v24, %v3152_v54 }
0x15d7   : > { %v3166_v49 = vadd.f32 %v5684_v35, %v3159_v55 }
0x15d9   : > { %4350 = vmatmul.mubr.msk.f32.gmra.mxu0 %vm304_vm2, %v3166_v49 }
0x15da   : > { %4401 = vmatprep.mubr.msk.f32.mxu0 %vm4590_vm0, %v4589_v1 }
0x1686   : > { %v3411_v57 = vpop.f32.mrf.mxu1 }
0x1687   : > { %v3423_v59 = vadd.f32 %v3411_v57, %v5640_v2 }
0x1688   : > { %v4386_v62 = vpop.f32.mrf.mxu1 }
0x1689   : > { %v3429_v63 = vadd.f32 %v3748_v58, %v3423_v59  ;;  %v3452_v58 = vld [vmem:[%s5864_s1 + $0x7a] sm:$0x1] }
0x168b   : > { %v3256_v3 = vpop.f32.mrf.mxu0  ;;  %v3433_v24 = vsel %vm3432_vm7, %v3429_v63, 0.0 }
0x168c   : > { %v3257_v35 = vadd.f32 %v5708_v51, %v3256_v3  ;;  %3434 = vadd.xlane.f32.xlu0 %v3433_v24 }
0x168d   : > { %v4348_v41 = vpop.f32.mrf.mxu0 }
0x168e   : > { %v3269_v56 = vmul.f32 0.70710677, %v3257_v35  ;;  %v3266_v6 = vmul.f32 0.5, %v3257_v35  ;;  %v3531_v41 = vld [vmem:[%s5864_s1 + $0x7b] sm:$0x1] }
0x1690   : > { %4569 = verf.f32 %v3269_v56 }
0x1699   : > { %v3261_v44 = vpop.f32.mrf.mxu0 }
0x169a   : > { %v3262_v2 = vadd.f32 %v5708_v51, %v3261_v44  ;;  %v3451_v51 = vld [vmem:[%s5864_s1 + $0x70] sm:$0xff] }
0x169b   : > { %v4351_v61 = vpop.f32.mrf.mxu0  ;;  %4394 = vmatpush3.msra.mxu0 %v3451_v51 }
0x169c   : > { %v3270_v7 = vmul.f32 0.70710677, %v3262_v2  ;;  %v3267_v16 = vmul.f32 0.5, %v3262_v2  ;;  %4395 = vmatprep.subr.mxu0 %v4589_v1 }
0x169d   : > { %v4570_v4 = vpop.eup %4569  ;;  %4396 = vmatpush3.msra.mxu0 %v3450_v19 }
0x169e   : > { %v3275_v60 = vadd.f32 1.0, %v4570_v4  ;;  %4571 = verf.f32 %v3270_v7  ;;  %4397 = vmatprep.subr.mxu0 %v4589_v1  ;;  %v4606_v4 = vmov 0  }
0x169f   : > { %4398 = vmatpush3.msra.mxu0 %v3449_v31  ;;  %4431 = vset.pattern.permute.xlu1 %v4606_v4 }
0x16a0   : > { %v3278_v36 = vmul.f32 %v3275_v60, %v3266_v6  ;;  %4399 = vmatprep.subr.mxu0 %v4589_v1  ;;  %4432 = vset.pattern.permute.xlu0 %v4606_v4 }
0x16a1   : > { %4400 = vmatpush3.msra.mxu0 %v3448_v39 }
0x16a2   : > { %3284 = vadd.xlane.f32.xlu0 %v3278_v36 }
0x16ab   : > { %v4572_v11 = vpop.eup %4571 }
0x16ac   : > { %v3276_v21 = vadd.f32 1.0, %v4572_v11 }
0x16ae   : > { %v3279_v27 = vmul.f32 %v3276_v21, %v3267_v16 }
0x1715   : > { %v3435_v0 = vpop.xlane.xlu0 %3434 }
0x1716   : > { %v3436_v8 = vmul.f32 0.03125, %v3435_v0 }
0x1718   : > { %v3437_v12 = vsub.f32 %v3429_v63, %v3436_v8 }
0x171a   : > { %v3438_v20 = vmul.f32 %v3437_v12, %v3437_v12 }
0x171c   : > { %v3439_v23 = vsel %vm3432_vm7, %v3438_v20, 0.0 }
0x171d   : > { %3440 = vadd.xlane.f32.xlu1 %v3439_v23 }
0x1721   : > { %3286 = vadd.xlane.f32.xlu1 %v3279_v27 }
0x172b   : > { %v3285_v28 = vpop.xlane.xlu0 %3284 }
0x172c   : > { %v3289_v22 = vmul.f32 0.0078125, %v3285_v28 }
0x172e   : > { %v3292_v26 = vsub.f32 %v3278_v36, %v3289_v22  ;;  %v3537_v36 = vld [vmem:[%s5864_s1 + $0x7c] sm:$0x1] }
0x1730   : > { %v3295_v14 = vmul.f32 %v3292_v26, %v3292_v26 }
0x1732   : > { %3299 = vadd.xlane.f32.xlu0 %v3295_v14 }
0x17a6   : > { %v3441_v40 = vpop.xlane.xlu1 %3440 }
0x17a7   : > { %v3442_v42 = vmul.f32 0.03125, %v3441_v40 }
0x17a9   : > { %v3443_v33 = vadd.f32 1e-05, %v3442_v42 }
0x17aa   : > { %v3287_v43 = vpop.xlane.xlu1 %3286 }
0x17ab   : > { %4573 = vrsqrt.f32 %v3443_v33  ;;  %v3290_v18 = vmul.f32 0.0078125, %v3287_v43 }
0x17ad   : > { %v3293_v47 = vsub.f32 %v3279_v27, %v3290_v18 }
0x17af   : > { %v3296_v15 = vmul.f32 %v3293_v47, %v3293_v47 }
0x17b1   : > { %3301 = vadd.xlane.f32.xlu1 %v3296_v15 }
0x17b8   : > { %v4574_v50 = vpop.eup %4573 }
0x17b9   : > { %v3445_v34 = vmul.f32 %v4574_v50, %v3437_v12 }
0x17bb   : > { %v3446_v32 = vmul.f32 %v3445_v34, %v3430_v17  ;;  %v3300_v48 = vpop.xlane.xlu0 %3299 }
0x17bc   : > { %v3304_v25 = vmul.f32 0.0078125, %v3300_v48 }
0x17bd   : > { %v3447_v5 = vadd.f32 %v3446_v32, %v3431_v30 }
0x17be   : > { %v3307_v29 = vadd.f32 1e-05, %v3304_v25 }
0x17bf   : > { %4402 = vmatmul.mubr.msk.f32.vlgmr.msra.gmra.mxu0 %vm304_vm2, %v3447_v5 }
0x17c0   : > { %4575 = vrsqrt.f32 %v3307_v29 }
0x17cd   : > { %v4576_v9 = vpop.eup %4575 }
0x17ce   : > { %v3313_v53 = vmul.f32 %v4576_v9, %v3292_v26 }
0x17d0   : > { %v3320_v13 = vmul.f32 %v5789_v37, %v3313_v53 }
0x17d2   : > { %v3327_v10 = vadd.f32 %v5794_v52, %v3320_v13 }
0x17d4   : > { %4388 = vmatmul.mubr.f32.gmra.mxu1 %v3327_v10 }
0x17d5   : > { %4390 = vmatprep.mubr.msk.f32.mxu1 %vm4590_vm0, %v4589_v1 }
0x183a   : > { %v3302_v46 = vpop.xlane.xlu1 %3301 }
0x183b   : > { %v3305_v38 = vmul.f32 0.0078125, %v3302_v46 }
0x183d   : > { %v3308_v45 = vadd.f32 1e-05, %v3305_v38 }
0x183f   : > { %4577 = vrsqrt.f32 %v3308_v45 }
0x184c   : > { %v4578_v54 = vpop.eup %4577 }
0x184d   : > { %v3314_v55 = vmul.f32 %v4578_v54, %v3293_v47 }
0x184f   : > { %v3321_v49 = vmul.f32 %v5789_v37, %v3314_v55 }
0x1851   : > { %v3328_v57 = vadd.f32 %v5794_v52, %v3321_v49 }
0x1853   : > { %4391 = vmatmul.mubr.f32.gmra.mxu1 %v3328_v57 }
0x187f   : > { %v3522_v59 = vpop.f32.mrf.mxu0 }
0x1880   : > { %v3523_v62 = vadd.f32 %v3522_v59, %v3452_v58 }
0x1881   : > { %v4403_v63 = vpop.f32.mrf.mxu0 }
0x1882   : > { %v3527_v3 = vmul.f32 0.70710677, %v3523_v62  ;;  %v3526_v24 = vmul.f32 0.5, %v3523_v62 }
0x1884   : > { %4579 = verf.f32 %v3527_v3 }
0x1891   : > { %v4580_v1 = vpop.eup %4579 }
0x1892   : > { %v3529_v35 = vadd.f32 1.0, %v4580_v1 }
0x1894   : > { %v3530_v37 = vmul.f32 %v3529_v35, %v3526_v24  ;;  %v3416_v52 = vpop.f32.mrf.mxu1 }
0x1896   : > { %v4389_v56 = vpop.f32.mrf.mxu1  ;;  %v3532_v44 = vmul.f32 %v3531_v41, %v3530_v37 }
0x1898   : > { %v3534_v61 = vsel %vm3533_vm8, %v3532_v44, 0.0 }
0x1899   : > { %3535 = vadd.xlane.f32.xlu0 %v3534_v61 }
0x1913   : > { %v3420_v6 = vpop.f32.mrf.mxu1 }
0x1915   : > { %v4392_v60 = vpop.f32.mrf.mxu1 }
0x1922   : > { %v3536_v2 = vpop.xlane.xlu0 %3535 }
0x1923   : > { %v3538_v7 = vadd.f32 %v3537_v36, %v3536_v2 }
0x1925   : > { %3541 = vperm.xlu1 %4431, %v3538_v7  }
0x19a0   : > { %v3542_v0 = vpop.permute.xlu1 %3541 }
0x19a1   : > { %3544 = vst [vmem:[%s193_s19] sm:$0x1] %v3542_v0 }
0x19a2 PF: > { %s14_s15 = sadd.s32 1, %s4587_s15  }
0x19a3   : > { %p11_p4 = scmp.ge.s32.totalorder %s14_s15, 4  }
0x19a5   :  { %13 = sbr.rel (!%p11_p4) target bundleno = 1 (0x1), region = 68 }

</bundles_post_ra>
